<compile_context>
chip_gen: v7x
topology: tpu7x:2x2x1
jax: 0.10.0
libtpu: 0.0.40
codegen_flags: <defaults>
</compile_context>

<pallas_src>
import functools

import jax
import jax.numpy as jnp
from jax.experimental import pallas as pl
from jax.experimental.pallas import tpu as pltpu

EPS = 1e-5


def _round_up(v, m):
    return (v + m - 1) // m * m


def _inorm_scale_shift(y, gamma, beta, inv_n):
    """Single-pass InstanceNorm stats -> fused per-channel (scale, shift) rows."""
    mean = jnp.sum(y, axis=0, keepdims=True) * inv_n          # E[x]
    ex2 = jnp.sum(y * y, axis=0, keepdims=True) * inv_n       # E[x^2]
    var = jnp.maximum(ex2 - mean * mean, 0.0)                 # biased variance
    scale = gamma * jax.lax.rsqrt(var + EPS)                  # EUP rsqrt
    shift = beta - mean * scale
    return scale, shift


# ---------------------------------------------------------------------------
# Fused kernel: 1x1 conv -> IN+ReLU -> reflect pad (in VMEM) -> 3x3 conv
#               (9 taps folded into one matmul) -> IN+ReLU.
# grid axis 0 = batch index n; one program handles one full image.
# ---------------------------------------------------------------------------
def _dense_layer_kernel(x_ref, w1_ref, g1_ref, b1_ref, w2_ref, g2_ref, b2_ref,
                        o_ref, pad_ref, big_ref, *, H, W):
    HW = H * W
    Hp, Wp = H + 2, W + 2
    Wpp = pad_ref.shape[1]            # padded-row stride (multiple of 8 sublanes)
    Cb = pad_ref.shape[2]
    Cout = g2_ref.shape[1]
    mm_dtype = w1_ref.dtype           # f32 or bf16 (MXU input dtype)
    inv_hw = 1.0 / float(HW)

    # ---- 1x1 conv on the MXU: (HW, Cin) @ (Cin, Cb), f32 accumulation ------
    x = x_ref[0]                                              # (Cin, HW) NCHW
    y = jnp.dot(x.T.astype(mm_dtype), w1_ref[...],
                preferred_element_type=jnp.float32)           # (HW, Cb) f32

    # ---- InstanceNorm(affine) + ReLU ----------------------------------------
    scale1, shift1 = _inorm_scale_shift(y, g1_ref[...], b1_ref[...], inv_hw)
    a = jnp.maximum(y * scale1 + shift1, 0.0)                 # (HW, Cb) f32

    # ---- reflect padding (pad=1) built directly in VMEM scratch -------------
    a3 = a.reshape(H, W, Cb)
    if Wpp > Wp:                       # zero the sublane-alignment columns
        pad_ref[:, Wp:, :] = jnp.zeros((Hp, Wpp - Wp, Cb), jnp.float32)
    pad_ref[1:H + 1, 1:W + 1, :] = a3                          # interior
    pad_ref[1:H + 1, 0:1, :] = a3[:, 1:2, :]                   # left  <- col 1
    pad_ref[1:H + 1, W + 1:W + 2, :] = a3[:, W - 2:W - 1, :]   # right <- col W-2
    pad_ref[0:1, :, :] = pad_ref[2:3, :, :]                    # top (+corners)
    pad_ref[H + 1:H + 2, :, :] = pad_ref[H - 1:H, :, :]        # bottom (+corners)

    # ---- 3x3 conv: all 9 taps folded into ONE wide MXU matmul ---------------
    # M = Hp*Wpp (flattened padded image), K = Cb, N = 9*Cout.
    pad_flat = pad_ref[...].reshape(Hp * Wpp, Cb).astype(mm_dtype)
    big_ref[0:Hp * Wpp, :] = jnp.dot(pad_flat, w2_ref[...],
                                     preferred_element_type=jnp.float32)
    # keep the over-read tail rows deterministic (they only feed discarded rows)
    big_ref[Hp * Wpp:, :] = jnp.zeros(
        (big_ref.shape[0] - Hp * Wpp, big_ref.shape[1]), jnp.float32)

    # combine the 9 tap column-groups at their padded-row offsets
    acc = jnp.zeros((H * Wpp, Cout), jnp.float32)
    for kh in range(3):
        for kw in range(3):
            t = kh * 3 + kw
            off = kh * Wpp + kw
            acc = acc + big_ref[off:off + H * Wpp, t * Cout:(t + 1) * Cout]
    # drop the wrap/alignment columns of each padded row -> valid (HW, Cout)
    z = acc.reshape(H, Wpp, Cout)[:, :W, :].reshape(HW, Cout)

    # ---- InstanceNorm(affine) + ReLU ----------------------------------------
    scale2, shift2 = _inorm_scale_shift(z, g2_ref[...], b2_ref[...], inv_hw)
    out = jnp.maximum(z * scale2 + shift2, 0.0)               # (HW, Cout)

    # lane-dense store: (Cout, HW) puts HW (>=128) on lanes -> unmasked stores
    o_ref[0] = out.T.astype(o_ref.dtype)


def _padded_bytes(shape, dtype):
    """Rough VMEM footprint of one buffer after (8,128) layout padding."""
    shape = tuple(shape)
    if len(shape) == 1:
        shape = (1,) + shape
    lead = 1
    for d in shape[:-2]:
        lead *= d
    sub = _round_up(shape[-2], 8)
    lane = _round_up(shape[-1], 128)
    return lead * sub * lane * jnp.dtype(dtype).itemsize


# ---------------------------------------------------------------------------
# Wrapper: parameter plumbing (weight folding) + bitcast-level reshapes only.
# ---------------------------------------------------------------------------
def dense_layer_forward(x_nchw, params, matmul_dtype=jnp.float32):
    """x_nchw: (N, Cin, H, W) f32 -> (N, growth_rate, H, W) f32.

    matmul_dtype=jnp.bfloat16 enables the bf16 MXU path (f32 accumulation) for
    v5e/v6e throughput at a small numerics cost; default f32 matches PyTorch.
    """
    w1 = params["w1"]                      # (Cb, Cin)  from Conv2d 1x1 (out, in)
    g1, b1 = params["g1"], params["b1"]    # (Cb,)
    w2 = params["w2"]                      # (Cout, Cb, 3, 3)
    g2, b2 = params["g2"], params["b2"]    # (Cout,)

    N, Cin, H, W = x_nchw.shape
    Cb = w1.shape[0]
    Cout = w2.shape[0]
    HW = H * W
    Hp, Wp = H + 2, W + 2
    Wpp = _round_up(Wp, 8)                 # padded-row stride (sublane aligned)
    big_rows = Hp * Wpp + 8                # headroom so tap views stay in-bounds

    # free (bitcast-level) reshape: NCHW stays NCHW, spatial dims flattened
    x_flat = x_nchw.reshape(N, Cin, HW)

    w1_t = jnp.transpose(w1, (1, 0)).astype(matmul_dtype)      # (Cin, Cb)
    # (Cout, Cb, 3, 3) -> (Cb, 9*Cout); column block t=kh*3+kw holds W[:, :, kh, kw].T
    w2_folded = (jnp.transpose(w2, (1, 2, 3, 0))                # (Cb, 3, 3, Cout)
                 .reshape(Cb, 9 * Cout).astype(matmul_dtype))
    g1_2d = g1.reshape(1, Cb).astype(jnp.float32)
    b1_2d = b1.reshape(1, Cb).astype(jnp.float32)
    g2_2d = g2.reshape(1, Cout).astype(jnp.float32)
    b2_2d = b2.reshape(1, Cout).astype(jnp.float32)

    # Explicit scoped-VMEM budget: 2x-buffered blocks + scratch + headroom,
    # capped at 64 MiB so the same config is safe on v7x (see TODO above).
    vmem_need = (
        2 * _padded_bytes((1, Cin, HW), jnp.float32)
        + 2 * _padded_bytes((Cin, Cb), matmul_dtype)
        + 2 * _padded_bytes((Cb, 9 * Cout), matmul_dtype)
        + 4 * _padded_bytes((1, Cb), jnp.float32)
        + 4 * _padded_bytes((1, Cout), jnp.float32)
        + 2 * _padded_bytes((1, Cout, HW), jnp.float32)
        + _padded_bytes((Hp * Wpp, Cb), jnp.float32)
        + _padded_bytes((big_rows, 9 * Cout), jnp.float32)
    )
    vmem_limit = int(min(max(2 * vmem_need + (8 << 20), 32 << 20), 64 << 20))

    kernel = functools.partial(_dense_layer_kernel, H=H, W=W)

    out = pl.pallas_call(
        kernel,
        out_shape=jax.ShapeDtypeStruct((N, Cout, HW), jnp.float32),
        grid=(N,),
        in_specs=[
            pl.BlockSpec((1, Cin, HW), lambda n: (n, 0, 0)),   # x (NCHW, flat)
            pl.BlockSpec((Cin, Cb), lambda n: (0, 0)),          # w1^T
            pl.BlockSpec((1, Cb), lambda n: (0, 0)),             # gamma1
            pl.BlockSpec((1, Cb), lambda n: (0, 0)),             # beta1
            pl.BlockSpec((Cb, 9 * Cout), lambda n: (0, 0)),      # folded 3x3 W
            pl.BlockSpec((1, Cout), lambda n: (0, 0)),            # gamma2
            pl.BlockSpec((1, Cout), lambda n: (0, 0)),            # beta2
        ],
        out_specs=pl.BlockSpec((1, Cout, HW), lambda n: (n, 0, 0)),
        scratch_shapes=[
            pltpu.VMEM((Hp, Wpp, Cb), jnp.float32),              # padded act.
            pltpu.VMEM((big_rows, 9 * Cout), jnp.float32),       # folded taps
        ],
        compiler_params=pltpu.CompilerParams(
            dimension_semantics=("parallel",),                   # batch over TCs
            vmem_limit_bytes=vmem_limit),
    )(x_flat, w1_t, g1_2d, b1_2d, w2_folded, g2_2d, b2_2d)

    # free reshape: (N, Cout, HW) -> NCHW
    return out.reshape(N, Cout, H, W)


# ---------------------------------------------------------------------------
# Pure-JAX reference (correctness check only) and parameter init
# ---------------------------------------------------------------------------
def dense_layer_reference(x_nchw, params):
    w1, g1, b1 = params["w1"], params["g1"], params["b1"]
    w2, g2, b2 = params["w2"], params["g2"], params["b2"]

    def inorm(y, g, b):  # y: NCHW
        mean = jnp.mean(y, axis=(2, 3), keepdims=True)
        var = jnp.mean((y - mean) ** 2, axis=(2, 3), keepdims=True)
        yn = (y - mean) * jax.lax.rsqrt(var + EPS)
        return yn * g.reshape(1, -1, 1, 1) + b.reshape(1, -1, 1, 1)

    y = jnp.einsum("nchw,oc->nohw", x_nchw, w1)                  # 1x1 conv
    y = jnp.maximum(inorm(y, g1, b1), 0.0)
    yp = jnp.pad(y, ((0, 0), (0, 0), (1, 1), (1, 1)), mode="reflect")
    z = jax.lax.conv_general_dilated(
        yp, w2, window_strides=(1, 1), padding="VALID",
        dimension_numbers=("NCHW", "OIHW", "NCHW"))
    return jnp.maximum(inorm(z, g2, b2), 0.0)


def init_params(key, num_features, growth_rate, bottleneck_size):
    cb = bottleneck_size * growth_rate
    k1, k2, k3, k4, k5, k6 = jax.random.split(key, 6)
    return {
        "w1": 0.2 * jax.random.normal(k1, (cb, num_features), jnp.float32),
        "g1": 1.0 + 0.1 * jax.random.normal(k2, (cb,), jnp.float32),
        "b1": 0.1 * jax.random.normal(k3, (cb,), jnp.float32),
        "w2": 0.2 * jax.random.normal(k4, (growth_rate, cb, 3, 3), jnp.float32),
        "g2": 1.0 + 0.1 * jax.random.normal(k5, (growth_rate,), jnp.float32),
        "b2": 0.1 * jax.random.normal(k6, (growth_rate,), jnp.float32),
    }


if __name__ == "__main__":
    # _DenseLayer(num_features=4, growth_rate=4, bottleneck_size=2):
    # bottleneck channels Cb = 8, output channels Cout = 4.
    num_features, growth_rate, bottleneck_size = 4, 4, 2
    N, H, W = 2, 16, 16

    key = jax.random.PRNGKey(0)
    kx, kp = jax.random.split(key)
    x = jax.random.normal(kx, (N, num_features, H, W), jnp.float32)
    params = init_params(kp, num_features, growth_rate, bottleneck_size)

    ref = dense_layer_reference(x, params)

    # exact-precision path (f32 MXU inputs): tight check vs the f32 reference
    out = jax.block_until_ready(jax.jit(dense_layer_forward)(x, params))
    assert out.shape == (N, growth_rate, H, W)
    assert jnp.allclose(out, ref, atol=1e-4, rtol=1e-4), \
        f"f32 max diff {jnp.max(jnp.abs(out - ref))}"

    # bf16-MXU path (v5e/v6e throughput lever): looser numerics check
    out_bf16 = jax.block_until_ready(
        jax.jit(functools.partial(dense_layer_forward,
                                  matmul_dtype=jnp.bfloat16))(x, params))
    assert jnp.allclose(out_bf16, ref, atol=1.5e-1, rtol=1e-1), \
        f"bf16 max diff {jnp.max(jnp.abs(out_bf16 - ref))}"

    print("KERNEL_OK")
</pallas_src>

<mosaic_0001>
module attributes {stable_mosaic.version = 11 : i64} {
  func.func @_dense_layer_kernel(%arg0: i32, %arg1: memref<1x4x256xf32, #tpu.memory_space<vmem>>, %arg2: memref<4x8xf32, #tpu.memory_space<vmem>>, %arg3: memref<1x8xf32, #tpu.memory_space<vmem>>, %arg4: memref<1x8xf32, #tpu.memory_space<vmem>>, %arg5: memref<8x36xf32, #tpu.memory_space<vmem>>, %arg6: memref<1x4xf32, #tpu.memory_space<vmem>>, %arg7: memref<1x4xf32, #tpu.memory_space<vmem>>, %arg8: memref<1x4x256xf32, #tpu.memory_space<vmem>>, %arg9: memref<18x24x8xf32, #tpu.memory_space<vmem>>, %arg10: memref<440x36xf32, #tpu.memory_space<vmem>>) attributes {dimension_semantics = [#tpu.dimension_semantics<parallel>], iteration_bounds = array<i64: 2>, scalar_prefetch = 0 : i64, scratch_operands = 2 : i64, tpu.core_type = #tpu.core_type<tc>, window_params = [{transform_indices = @transform_0, window_bounds = array<i64: 1, 4, 256>}, {pipeline_mode = #tpu.pipeline_mode<synchronous>, transform_indices = @transform_1, window_bounds = array<i64: 4, 8>}, {pipeline_mode = #tpu.pipeline_mode<synchronous>, transform_indices = @transform_2, window_bounds = array<i64: 1, 8>}, {pipeline_mode = #tpu.pipeline_mode<synchronous>, transform_indices = @transform_3, window_bounds = array<i64: 1, 8>}, {pipeline_mode = #tpu.pipeline_mode<synchronous>, transform_indices = @transform_4, window_bounds = array<i64: 8, 36>}, {pipeline_mode = #tpu.pipeline_mode<synchronous>, transform_indices = @transform_5, window_bounds = array<i64: 1, 4>}, {pipeline_mode = #tpu.pipeline_mode<synchronous>, transform_indices = @transform_6, window_bounds = array<i64: 1, 4>}, {transform_indices = @transform_7, window_bounds = array<i64: 1, 4, 256>}]} {
    %c0 = arith.constant 0 : index
    %c0_0 = arith.constant 0 : index
    %c0_1 = arith.constant 0 : index
    %0 = vector.load %arg1[%c0, %c0_0, %c0_1] : memref<1x4x256xf32, #tpu.memory_space<vmem>>, vector<1x4x256xf32>
    %1 = vector.shape_cast %0 : vector<1x4x256xf32> to vector<4x256xf32>
    %2 = tpu.transpose %1, [1, 0] : vector<4x256xf32> -> vector<256x4xf32>
    %c0_2 = arith.constant 0 : index
    %c0_3 = arith.constant 0 : index
    %3 = vector.load %arg2[%c0_2, %c0_3] : memref<4x8xf32, #tpu.memory_space<vmem>>, vector<4x8xf32>
    %cst = arith.constant dense<0.000000e+00> : vector<256x8xf32>
    %4 = tpu.matmul %2, %3, %cst {dimension_numbers = #tpu.dot_dimension_numbers<[1], [0], [0], [1], [0, 0, 1, 1], [], []>} : vector<256x4xf32>, vector<4x8xf32>, vector<256x8xf32> -> vector<256x8xf32>
    %c0_4 = arith.constant 0 : index
    %c0_5 = arith.constant 0 : index
    %5 = vector.load %arg3[%c0_4, %c0_5] : memref<1x8xf32, #tpu.memory_space<vmem>>, vector<1x8xf32>
    %c0_6 = arith.constant 0 : index
    %c0_7 = arith.constant 0 : index
    %6 = vector.load %arg4[%c0_6, %c0_7] : memref<1x8xf32, #tpu.memory_space<vmem>>, vector<1x8xf32>
    %cst_8 = arith.constant dense<0.000000e+00> : vector<8xf32>
    %7 = vector.multi_reduction <add>, %4, %cst_8 [0] : vector<256x8xf32> to vector<8xf32>
    %8 = vector.shape_cast %7 : vector<8xf32> to vector<1x8xf32>
    %cst_9 = arith.constant 3.906250e-03 : f32
    %9 = vector.broadcast %cst_9 : f32 to vector<1x8xf32>
    %10 = arith.mulf %8, %9 : vector<1x8xf32>
    %11 = arith.mulf %4, %4 : vector<256x8xf32>
    %cst_10 = arith.constant dense<0.000000e+00> : vector<8xf32>
    %12 = vector.multi_reduction <add>, %11, %cst_10 [0] : vector<256x8xf32> to vector<8xf32>
    %13 = vector.shape_cast %12 : vector<8xf32> to vector<1x8xf32>
    %cst_11 = arith.constant 3.906250e-03 : f32
    %14 = vector.broadcast %cst_11 : f32 to vector<1x8xf32>
    %15 = arith.mulf %13, %14 : vector<1x8xf32>
    %16 = arith.mulf %10, %10 : vector<1x8xf32>
    %17 = arith.subf %15, %16 : vector<1x8xf32>
    %cst_12 = arith.constant 0.000000e+00 : f32
    %18 = vector.broadcast %cst_12 : f32 to vector<1x8xf32>
    %19 = arith.maximumf %17, %18 : vector<1x8xf32>
    %cst_13 = arith.constant 9.99999974E-6 : f32
    %20 = vector.broadcast %cst_13 : f32 to vector<1x8xf32>
    %21 = arith.addf %19, %20 : vector<1x8xf32>
    %22 = math.rsqrt %21 : vector<1x8xf32>
    %23 = arith.mulf %5, %22 : vector<1x8xf32>
    %24 = arith.mulf %10, %23 : vector<1x8xf32>
    %25 = arith.subf %6, %24 : vector<1x8xf32>
    %26 = vector.broadcast %23 : vector<1x8xf32> to vector<256x8xf32>
    %27 = arith.mulf %4, %26 : vector<256x8xf32>
    %28 = vector.broadcast %25 : vector<1x8xf32> to vector<256x8xf32>
    %29 = arith.addf %27, %28 : vector<256x8xf32>
    %cst_14 = arith.constant 0.000000e+00 : f32
    %30 = vector.broadcast %cst_14 : f32 to vector<256x8xf32>
    %31 = arith.maximumf %29, %30 : vector<256x8xf32>
    %32 = vector.shape_cast %31 : vector<256x8xf32> to vector<16x16x8xf32>
    %cst_15 = arith.constant 0.000000e+00 : f32
    %33 = vector.broadcast %cst_15 : f32 to vector<18x6x8xf32>
    %c0_16 = arith.constant 0 : index
    %c18 = arith.constant 18 : index
    %c0_17 = arith.constant 0 : index
    %34 = vector.load %arg9[%c0_16, %c18, %c0_17] : memref<18x24x8xf32, #tpu.memory_space<vmem>>, vector<18x6x8xf32>
    tpu.vector_store %arg9[%c0_16, %c18, %c0_17], %33 {strides = array<i32>} : memref<18x24x8xf32, #tpu.memory_space<vmem>>, vector<18x6x8xf32>,
    %c1 = arith.constant 1 : index
    %c1_18 = arith.constant 1 : index
    %c0_19 = arith.constant 0 : index
    %35 = vector.load %arg9[%c1, %c1_18, %c0_19] : memref<18x24x8xf32, #tpu.memory_space<vmem>>, vector<16x16x8xf32>
    tpu.vector_store %arg9[%c1, %c1_18, %c0_19], %32 {strides = array<i32>} : memref<18x24x8xf32, #tpu.memory_space<vmem>>, vector<16x16x8xf32>,
    %36 = vector.extract_strided_slice %32 {offsets = [0, 1, 0], sizes = [16, 1, 8], strides = [1, 1, 1]} : vector<16x16x8xf32> to vector<16x1x8xf32>
    %c1_20 = arith.constant 1 : index
    %c0_21 = arith.constant 0 : index
    %c0_22 = arith.constant 0 : index
    %37 = vector.load %arg9[%c1_20, %c0_21, %c0_22] : memref<18x24x8xf32, #tpu.memory_space<vmem>>, vector<16x1x8xf32>
    tpu.vector_store %arg9[%c1_20, %c0_21, %c0_22], %36 {strides = array<i32>} : memref<18x24x8xf32, #tpu.memory_space<vmem>>, vector<16x1x8xf32>,
    %38 = vector.extract_strided_slice %32 {offsets = [0, 14, 0], sizes = [16, 1, 8], strides = [1, 1, 1]} : vector<16x16x8xf32> to vector<16x1x8xf32>
    %c1_23 = arith.constant 1 : index
    %c17 = arith.constant 17 : index
    %c0_24 = arith.constant 0 : index
    %39 = vector.load %arg9[%c1_23, %c17, %c0_24] : memref<18x24x8xf32, #tpu.memory_space<vmem>>, vector<16x1x8xf32>
    tpu.vector_store %arg9[%c1_23, %c17, %c0_24], %38 {strides = array<i32>} : memref<18x24x8xf32, #tpu.memory_space<vmem>>, vector<16x1x8xf32>,
    %c2 = arith.constant 2 : index
    %c0_25 = arith.constant 0 : index
    %c0_26 = arith.constant 0 : index
    %40 = vector.load %arg9[%c2, %c0_25, %c0_26] : memref<18x24x8xf32, #tpu.memory_space<vmem>>, vector<1x24x8xf32>
    %c0_27 = arith.constant 0 : index
    %c0_28 = arith.constant 0 : index
    %c0_29 = arith.constant 0 : index
    %41 = vector.load %arg9[%c0_27, %c0_28, %c0_29] : memref<18x24x8xf32, #tpu.memory_space<vmem>>, vector<1x24x8xf32>
    tpu.vector_store %arg9[%c0_27, %c0_28, %c0_29], %40 {strides = array<i32>} : memref<18x24x8xf32, #tpu.memory_space<vmem>>, vector<1x24x8xf32>,
    %c15 = arith.constant 15 : index
    %c0_30 = arith.constant 0 : index
    %c0_31 = arith.constant 0 : index
    %42 = vector.load %arg9[%c15, %c0_30, %c0_31] : memref<18x24x8xf32, #tpu.memory_space<vmem>>, vector<1x24x8xf32>
    %c17_32 = arith.constant 17 : index
    %c0_33 = arith.constant 0 : index
    %c0_34 = arith.constant 0 : index
    %43 = vector.load %arg9[%c17_32, %c0_33, %c0_34] : memref<18x24x8xf32, #tpu.memory_space<vmem>>, vector<1x24x8xf32>
    tpu.vector_store %arg9[%c17_32, %c0_33, %c0_34], %42 {strides = array<i32>} : memref<18x24x8xf32, #tpu.memory_space<vmem>>, vector<1x24x8xf32>,
    %c0_35 = arith.constant 0 : index
    %c0_36 = arith.constant 0 : index
    %c0_37 = arith.constant 0 : index
    %44 = vector.load %arg9[%c0_35, %c0_36, %c0_37] : memref<18x24x8xf32, #tpu.memory_space<vmem>>, vector<18x24x8xf32>
    %45 = vector.shape_cast %44 : vector<18x24x8xf32> to vector<432x8xf32>
    %c0_38 = arith.constant 0 : index
    %c0_39 = arith.constant 0 : index
    %46 = vector.load %arg5[%c0_38, %c0_39] : memref<8x36xf32, #tpu.memory_space<vmem>>, vector<8x36xf32>
    %cst_40 = arith.constant dense<0.000000e+00> : vector<432x36xf32>
    %47 = tpu.matmul %45, %46, %cst_40 {dimension_numbers = #tpu.dot_dimension_numbers<[1], [0], [0], [1], [0, 0, 1, 1], [], []>} : vector<432x8xf32>, vector<8x36xf32>, vector<432x36xf32> -> vector<432x36xf32>
    %c0_41 = arith.constant 0 : index
    %c0_42 = arith.constant 0 : index
    %48 = vector.load %arg10[%c0_41, %c0_42] : memref<440x36xf32, #tpu.memory_space<vmem>>, vector<432x36xf32>
    tpu.vector_store %arg10[%c0_41, %c0_42], %47 {strides = array<i32>} : memref<440x36xf32, #tpu.memory_space<vmem>>, vector<432x36xf32>,
    %cst_43 = arith.constant 0.000000e+00 : f32
    %49 = vector.broadcast %cst_43 : f32 to vector<8x36xf32>
    %c432 = arith.constant 432 : index
    %c0_44 = arith.constant 0 : index
    %50 = vector.load %arg10[%c432, %c0_44] : memref<440x36xf32, #tpu.memory_space<vmem>>, vector<8x36xf32>
    tpu.vector_store %arg10[%c432, %c0_44], %49 {strides = array<i32>} : memref<440x36xf32, #tpu.memory_space<vmem>>, vector<8x36xf32>,
    %cst_45 = arith.constant 0.000000e+00 : f32
    %51 = vector.broadcast %cst_45 : f32 to vector<384x4xf32>
    %c0_46 = arith.constant 0 : index
    %c0_47 = arith.constant 0 : index
    %52 = vector.load %arg10[%c0_46, %c0_47] : memref<440x36xf32, #tpu.memory_space<vmem>>, vector<384x4xf32>
    %53 = arith.addf %51, %52 : vector<384x4xf32>
    %c1_48 = arith.constant 1 : index
    %c4 = arith.constant 4 : index
    %54 = vector.load %arg10[%c1_48, %c4] : memref<440x36xf32, #tpu.memory_space<vmem>>, vector<384x4xf32>
    %55 = arith.addf %53, %54 : vector<384x4xf32>
    %c2_49 = arith.constant 2 : index
    %c8 = arith.constant 8 : index
    %56 = vector.load %arg10[%c2_49, %c8] : memref<440x36xf32, #tpu.memory_space<vmem>>, vector<384x4xf32>
    %57 = arith.addf %55, %56 : vector<384x4xf32>
    %c24 = arith.constant 24 : index
    %c12 = arith.constant 12 : index
    %58 = vector.load %arg10[%c24, %c12] : memref<440x36xf32, #tpu.memory_space<vmem>>, vector<384x4xf32>
    %59 = arith.addf %57, %58 : vector<384x4xf32>
    %c25 = arith.constant 25 : index
    %c16 = arith.constant 16 : index
    %60 = vector.load %arg10[%c25, %c16] : memref<440x36xf32, #tpu.memory_space<vmem>>, vector<384x4xf32>
    %61 = arith.addf %59, %60 : vector<384x4xf32>
    %c26 = arith.constant 26 : index
    %c20 = arith.constant 20 : index
    %62 = vector.load %arg10[%c26, %c20] : memref<440x36xf32, #tpu.memory_space<vmem>>, vector<384x4xf32>
    %63 = arith.addf %61, %62 : vector<384x4xf32>
    %c48 = arith.constant 48 : index
    %c24_50 = arith.constant 24 : index
    %64 = vector.load %arg10[%c48, %c24_50] : memref<440x36xf32, #tpu.memory_space<vmem>>, vector<384x4xf32>
    %65 = arith.addf %63, %64 : vector<384x4xf32>
    %c49 = arith.constant 49 : index
    %c28 = arith.constant 28 : index
    %66 = vector.load %arg10[%c49, %c28] : memref<440x36xf32, #tpu.memory_space<vmem>>, vector<384x4xf32>
    %67 = arith.addf %65, %66 : vector<384x4xf32>
    %c50 = arith.constant 50 : index
    %c32 = arith.constant 32 : index
    %68 = vector.load %arg10[%c50, %c32] : memref<440x36xf32, #tpu.memory_space<vmem>>, vector<384x4xf32>
    %69 = arith.addf %67, %68 : vector<384x4xf32>
    %70 = vector.shape_cast %69 : vector<384x4xf32> to vector<16x24x4xf32>
    %71 = vector.extract_strided_slice %70 {offsets = [0, 0, 0], sizes = [16, 16, 4], strides = [1, 1, 1]} : vector<16x24x4xf32> to vector<16x16x4xf32>
    %72 = vector.shape_cast %71 : vector<16x16x4xf32> to vector<256x4xf32>
    %c0_51 = arith.constant 0 : index
    %c0_52 = arith.constant 0 : index
    %73 = vector.load %arg6[%c0_51, %c0_52] : memref<1x4xf32, #tpu.memory_space<vmem>>, vector<1x4xf32>
    %c0_53 = arith.constant 0 : index
    %c0_54 = arith.constant 0 : index
    %74 = vector.load %arg7[%c0_53, %c0_54] : memref<1x4xf32, #tpu.memory_space<vmem>>, vector<1x4xf32>
    %cst_55 = arith.constant dense<0.000000e+00> : vector<4xf32>
    %75 = vector.multi_reduction <add>, %72, %cst_55 [0] : vector<256x4xf32> to vector<4xf32>
    %76 = vector.shape_cast %75 : vector<4xf32> to vector<1x4xf32>
    %cst_56 = arith.constant 3.906250e-03 : f32
    %77 = vector.broadcast %cst_56 : f32 to vector<1x4xf32>
    %78 = arith.mulf %76, %77 : vector<1x4xf32>
    %79 = arith.mulf %72, %72 : vector<256x4xf32>
    %cst_57 = arith.constant dense<0.000000e+00> : vector<4xf32>
    %80 = vector.multi_reduction <add>, %79, %cst_57 [0] : vector<256x4xf32> to vector<4xf32>
    %81 = vector.shape_cast %80 : vector<4xf32> to vector<1x4xf32>
    %cst_58 = arith.constant 3.906250e-03 : f32
    %82 = vector.broadcast %cst_58 : f32 to vector<1x4xf32>
    %83 = arith.mulf %81, %82 : vector<1x4xf32>
    %84 = arith.mulf %78, %78 : vector<1x4xf32>
    %85 = arith.subf %83, %84 : vector<1x4xf32>
    %cst_59 = arith.constant 0.000000e+00 : f32
    %86 = vector.broadcast %cst_59 : f32 to vector<1x4xf32>
    %87 = arith.maximumf %85, %86 : vector<1x4xf32>
    %cst_60 = arith.constant 9.99999974E-6 : f32
    %88 = vector.broadcast %cst_60 : f32 to vector<1x4xf32>
    %89 = arith.addf %87, %88 : vector<1x4xf32>
    %90 = math.rsqrt %89 : vector<1x4xf32>
    %91 = arith.mulf %73, %90 : vector<1x4xf32>
    %92 = arith.mulf %78, %91 : vector<1x4xf32>
    %93 = arith.subf %74, %92 : vector<1x4xf32>
    %94 = vector.broadcast %91 : vector<1x4xf32> to vector<256x4xf32>
    %95 = arith.mulf %72, %94 : vector<256x4xf32>
    %96 = vector.broadcast %93 : vector<1x4xf32> to vector<256x4xf32>
    %97 = arith.addf %95, %96 : vector<256x4xf32>
    %cst_61 = arith.constant 0.000000e+00 : f32
    %98 = vector.broadcast %cst_61 : f32 to vector<256x4xf32>
    %99 = arith.maximumf %97, %98 : vector<256x4xf32>
    %100 = tpu.transpose %99, [1, 0] : vector<256x4xf32> -> vector<4x256xf32>
    %c0_62 = arith.constant 0 : index
    %c0_63 = arith.constant 0 : index
    %c0_64 = arith.constant 0 : index
    %101 = vector.load %arg8[%c0_62, %c0_63, %c0_64] : memref<1x4x256xf32, #tpu.memory_space<vmem>>, vector<1x4x256xf32>
    %102 = vector.shape_cast %101 : vector<1x4x256xf32> to vector<4x256xf32>
    %103 = vector.shape_cast %100 : vector<4x256xf32> to vector<1x4x256xf32>
    tpu.vector_store %arg8[%c0_62, %c0_63, %c0_64], %103 {strides = array<i32>} : memref<1x4x256xf32, #tpu.memory_space<vmem>>, vector<1x4x256xf32>,
    return
  }
  func.func @transform_0(%arg0: i32) -> (i32, i32, i32) {
    %c0_i32 = arith.constant 0 : i32
    %c0_i32_0 = arith.constant 0 : i32
    %c0_i32_1 = arith.constant 0 : i32
    return %arg0, %c0_i32, %c0_i32_0 : i32, i32, i32
  }
  func.func @transform_1(%arg0: i32) -> (i32, i32) {
    %c0_i32 = arith.constant 0 : i32
    %c0_i32_0 = arith.constant 0 : i32
    %c0_i32_1 = arith.constant 0 : i32
    return %c0_i32, %c0_i32_0 : i32, i32
  }
  func.func @transform_2(%arg0: i32) -> (i32, i32) {
    %c0_i32 = arith.constant 0 : i32
    %c0_i32_0 = arith.constant 0 : i32
    %c0_i32_1 = arith.constant 0 : i32
    return %c0_i32, %c0_i32_0 : i32, i32
  }
  func.func @transform_3(%arg0: i32) -> (i32, i32) {
    %c0_i32 = arith.constant 0 : i32
    %c0_i32_0 = arith.constant 0 : i32
    %c0_i32_1 = arith.constant 0 : i32
    return %c0_i32, %c0_i32_0 : i32, i32
  }
  func.func @transform_4(%arg0: i32) -> (i32, i32) {
    %c0_i32 = arith.constant 0 : i32
    %c0_i32_0 = arith.constant 0 : i32
    %c0_i32_1 = arith.constant 0 : i32
    return %c0_i32, %c0_i32_0 : i32, i32
  }
  func.func @transform_5(%arg0: i32) -> (i32, i32) {
    %c0_i32 = arith.constant 0 : i32
    %c0_i32_0 = arith.constant 0 : i32
    %c0_i32_1 = arith.constant 0 : i32
    return %c0_i32, %c0_i32_0 : i32, i32
  }
  func.func @transform_6(%arg0: i32) -> (i32, i32) {
    %c0_i32 = arith.constant 0 : i32
    %c0_i32_0 = arith.constant 0 : i32
    %c0_i32_1 = arith.constant 0 : i32
    return %c0_i32, %c0_i32_0 : i32, i32
  }
  func.func @transform_7(%arg0: i32) -> (i32, i32, i32) {
    %c0_i32 = arith.constant 0 : i32
    %c0_i32_0 = arith.constant 0 : i32
    %c0_i32_1 = arith.constant 0 : i32
    return %arg0, %c0_i32, %c0_i32_0 : i32, i32, i32
  }
}

</mosaic_0001>

<bundles_post_ra>
// kernel: dense_layer_forward.1
= control target key start
LH: loop header
LB: loop body
LE: loop exit
PB: predicated region body
PF: predicated region fallthrough
CT: control target
= control target key end

     0   :  { %s3778_s24 = smov 0   ;;  %s5906_s0 = inlined_call_operand.vmem [shape: f32[2,4,256], index: 0, kind: input, shape index: {}]   ;;  %s5907_s1 = inlined_call_operand.vmem [shape: f32[4,8], index: 1, kind: input, shape index: {}]   ;;  %s5908_s2 = inlined_call_operand.vmem [shape: f32[1,8], index: 2, kind: input, shape index: {}]   ;;  %s5909_s3 = inlined_call_operand.vmem [shape: f32[1,8], index: 3, kind: input, shape index: {}]   ;;  %s5910_s4 = inlined_call_operand.vmem [shape: f32[8,36], index: 4, kind: input, shape index: {}]   ;;  %s5911_s5 = inlined_call_operand.vmem [shape: f32[1,4], index: 5, kind: input, shape index: {}]   ;;  %s5912_s6 = inlined_call_operand.vmem [shape: f32[1,4], index: 6, kind: input, shape index: {}]   ;;  %s5913_s7 = inlined_call_operand.vmem [shape: f32[2,4,256], index: 7, kind: output, shape index: {}]  }
   0x1 LB: > { %s3358_s25 = sadd.s32 4294967295, %s3727_s24   ;;  %p3362_p0 = scmp.ge.s32.totalorder %s3727_s24, 1  ;;  %s3727_s24 = sphi %s3778_s24, %s17_s24  }
   0x2   : > { %p237_p1 = scmp.lt.s32.totalorder %s3727_s24, 3 }
   0x4   : > { %p238_p2 = pnand %p3362_p0, %p237_p1 }
   0x6   : > { %241 = sbr.rel (%p238_p2) target bundleno = 1670 (0x686), region = 48 }
   0xd   : > { %p269_p3 = scmp.lt.s32.totalorder %s3358_s25, 1  ;;  %v347_v1 = vld [vmem:[%s5907_s1] sm:$0xf]  ;;  %vm445_vm0 = vcmask 1043456   ;;  %vm348_vm1 = vcmask 31744   ;;  %vm676_vm2 = vcmask 64512  }
   0xe   : > { %3546 = vmatprep.subr.msk.mxu0 %vm445_vm0, %v347_v1  ;;  %vm965_vm3 = vcmask 62464   ;;  %vm1618_vm4 = vcmask 293888   ;;  %vm1017_vm5 = vcmask 58369   ;;  %vm1034_vm6 = vcmask 63494   ;;  %s3730_s15 = smov 124   ;;  %s3731_s16 = smov 116  }
   0xf   : > { %s6256_s25 = smov (!%p269_p3, %s3358_s25), 1  ;;  %3547 = vmatpush3.msk.msra.mxu0 %vm445_vm0, %v347_v1  ;;  %s3732_s17 = smov 120  }
  0x10   : > { %s3456_s26 = sshll.u32 %s6256_s25, 3  ;;  %s3733_s18 = smov 112  }
  0x11   : > { %s273_s29 = scalar_lea.vmem %s5906_s0, %s3456_s26  ;;  %s3734_s19 = smov 96  }
  0x12   : > { %v279_v0 = vld [vmem:[%s273_s29] sm:$0xff]  ;;  %s3735_s20 = smov 108   ;;  %s3736_s21 = smov 104  }
  0x13   : > { %283 = vxpose.xlu0.b32.start.end [1/1] (short) %v279_v0, 128  ;;  %v281_v2 = vcombine.high %v279_v0, %v279_v0  ;;  %s3737_s22 = smov 100   ;;  %s278_s9 = scalar_lea.vmem %s5913_s7, %s3456_s26 }
  0x50   : > { %315 = vxpose.xlu0.b32.start.end [1/1] (short) %v281_v2, 128 }
  0x93   : > { %v299_v3 = vpop.trf.xlu0 }
  0x94   : > { %3548 = vmatprep.mubr.msk.f32.mxu0 %vm348_vm1, %v299_v3 }
  0x97   : > { %v300_v4 = vpop.trf.xlu0 }
  0x98   : > { %3549 = vmatmul.mubr.msk.f32.vlgmr.msra.gmra.mrb[0].mxu0 %vm348_vm1, %v300_v4 }
  0x9b   : > { %v301_v5 = vpop.trf.xlu0 }
  0x9c   : > { %3551 = vmatprep.mubr.msk.f32.mxu0 %vm348_vm1, %v301_v5 }
  0x9f   : > { %v302_v6 = vpop.trf.xlu0 }
  0xa0   : > { %3552 = vmatmul.mubr.msk.f32.gmra.mrb[2].mxu0 %vm348_vm1, %v302_v6 }
  0xa3   : > { %v303_v7 = vpop.trf.xlu0 }
  0xa4   : > { %3554 = vmatprep.mubr.msk.f32.mxu0 %vm348_vm1, %v303_v7 }
  0xa7   : > { %v304_v8 = vpop.trf.xlu0 }
  0xa8   : > { %3555 = vmatmul.mubr.msk.f32.gmra.mrb[4].mxu0 %vm348_vm1, %v304_v8 }
  0xab   : > { %v305_v9 = vpop.trf.xlu0 }
  0xac   : > { %3557 = vmatprep.mubr.msk.f32.mxu0 %vm348_vm1, %v305_v9 }
  0xaf   : > { %v306_v10 = vpop.trf.xlu0 }
  0xb0   : > { %3558 = vmatmul.mubr.msk.f32.gmra.mrb[6].mxu0 %vm348_vm1, %v306_v10 }
  0xb3   : > { %v307_v11 = vpop.trf.xlu0 }
  0xb4   : > { %3560 = vmatprep.mubr.msk.f32.mxu0 %vm348_vm1, %v307_v11 }
  0xb7   : > { %v308_v12 = vpop.trf.xlu0 }
  0xb8   : > { %3561 = vmatmul.mubr.msk.f32.gmra.mrb[8].mxu0 %vm348_vm1, %v308_v12 }
  0xbb   : > { %v309_v13 = vpop.trf.xlu0 }
  0xbc   : > { %3563 = vmatprep.mubr.msk.f32.mxu0 %vm348_vm1, %v309_v13 }
  0xbf   : > { %v310_v14 = vpop.trf.xlu0 }
  0xc0   : > { %3564 = vmatmul.mubr.msk.f32.gmra.mrb[10].mxu0 %vm348_vm1, %v310_v14 }
  0xc3   : > { %v311_v15 = vpop.trf.xlu0 }
  0xc4   : > { %3566 = vmatprep.mubr.msk.f32.mxu0 %vm348_vm1, %v311_v15 }
  0xc7   : > { %v312_v16 = vpop.trf.xlu0 }
  0xc8   : > { %3567 = vmatmul.mubr.msk.f32.gmra.mrb[12].mxu0 %vm348_vm1, %v312_v16 }
  0xcb   : > { %v313_v17 = vpop.trf.xlu0 }
  0xcc   : > { %3569 = vmatprep.mubr.msk.f32.mxu0 %vm348_vm1, %v313_v17 }
  0xcf   : > { %v314_v18 = vpop.trf.xlu0 }
  0xd0   : > { %3570 = vmatmul.mubr.msk.f32.gmra.mrb[14].mxu0 %vm348_vm1, %v314_v18 }
  0xd3   : > { %v331_v19 = vpop.trf.xlu0 }
  0xd4   : > { %3572 = vmatprep.mubr.msk.f32.mxu0 %vm348_vm1, %v331_v19 }
  0xd7   : > { %v332_v20 = vpop.trf.xlu0 }
  0xd8   : > { %3573 = vmatmul.mubr.msk.f32.gmra.mrb[16].mxu0 %vm348_vm1, %v332_v20 }
  0xdb   : > { %v333_v21 = vpop.trf.xlu0 }
  0xdc   : > { %3575 = vmatprep.mubr.msk.f32.mxu0 %vm348_vm1, %v333_v21 }
  0xdf   : > { %v334_v22 = vpop.trf.xlu0 }
  0xe0   : > { %3576 = vmatmul.mubr.msk.f32.gmra.mrb[18].mxu0 %vm348_vm1, %v334_v22 }
  0xe3   : > { %v335_v23 = vpop.trf.xlu0 }
  0xe4   : > { %3578 = vmatprep.mubr.msk.f32.mxu0 %vm348_vm1, %v335_v23 }
  0xe7   : > { %v336_v24 = vpop.trf.xlu0 }
  0xe8   : > { %3579 = vmatmul.mubr.msk.f32.gmra.mrb[20].mxu0 %vm348_vm1, %v336_v24 }
  0xeb   : > { %v337_v25 = vpop.trf.xlu0 }
  0xec   : > { %3581 = vmatprep.mubr.msk.f32.mxu0 %vm348_vm1, %v337_v25 }
  0xef   : > { %v338_v26 = vpop.trf.xlu0 }
  0xf0   : > { %3582 = vmatmul.mubr.msk.f32.gmra.mrb[22].mxu0 %vm348_vm1, %v338_v26 }
  0xf3   : > { %v339_v27 = vpop.trf.xlu0 }
  0xf4   : > { %3584 = vmatprep.mubr.msk.f32.mxu0 %vm348_vm1, %v339_v27 }
  0xf7   : > { %v340_v28 = vpop.trf.xlu0 }
  0xf8   : > { %3585 = vmatmul.mubr.msk.f32.gmra.mrb[24].mxu0 %vm348_vm1, %v340_v28 }
  0xfb   : > { %v341_v29 = vpop.trf.xlu0 }
  0xfc   : > { %3587 = vmatprep.mubr.msk.f32.mxu0 %vm348_vm1, %v341_v29 }
  0xff   : > { %v342_v30 = vpop.trf.xlu0 }
 0x100   : > { %3588 = vmatmul.mubr.msk.f32.gmra.mrb[26].mxu0 %vm348_vm1, %v342_v30 }
 0x103   : > { %v343_v31 = vpop.trf.xlu0 }
 0x104   : > { %3590 = vmatprep.mubr.msk.f32.mxu0 %vm348_vm1, %v343_v31 }
 0x107   : > { %v344_v32 = vpop.trf.xlu0 }
 0x108   : > { %3591 = vmatmul.mubr.msk.f32.gmra.mrb[28].mxu0 %vm348_vm1, %v344_v32 }
 0x10b   : > { %v345_v33 = vpop.trf.xlu0 }
 0x10c   : > { %3593 = vmatprep.mubr.msk.f32.mxu0 %vm348_vm1, %v345_v33 }
 0x10f   : > { %v346_v34 = vpop.trf.xlu0 }
 0x110   : > { %3594 = vmatmul.mubr.msk.f32.gmra.mrb[30].mxu0 %vm348_vm1, %v346_v34 }
 0x16b   : > { %v3829_v35 = vpop.f32.mrb[0].mxu0 }
 0x16c   : > { %v678_v36 = vsel %vm676_vm2, %v3829_v35, 0.0  ;;  %v748_v37 = vmul.f32 %v3829_v35, %v3829_v35  ;;  %v3835_v38 = vpop.f32.mrb[1].mxu0 }
 0x16d   : > { %v677_v39 = vsel %vm676_vm2, %v3835_v38, 0.0  ;;  %v747_v40 = vmul.f32 %v3835_v38, %v3835_v38 }
 0x16e   : > { %v780_v41 = vsel %vm676_vm2, %v748_v37, 0.0  ;;  %v679_v42 = vadd.f32 %v678_v36, %v677_v39 }
 0x16f   : > { %v779_v43 = vsel %vm676_vm2, %v747_v40, 0.0 }
 0x170   : > { %v781_v44 = vadd.f32 %v780_v41, %v779_v43 }
 0x173   : > { %v3843_v45 = vpop.f32.mrb[2].mxu0 }
 0x174   : > { %v3845_v46 = vpop.f32.mrb[3].mxu0  ;;  %v750_v47 = vmul.f32 %v3843_v45, %v3843_v45  ;;  %v682_v51 = vsel %vm676_vm2, %v3843_v45, 0.0 }
 0x175   : > { %v680_v48 = vsel %vm676_vm2, %v3845_v46, 0.0  ;;  %v749_v49 = vmul.f32 %v3845_v46, %v3845_v46 }
 0x176   : > { %v681_v50 = vadd.f32 %v680_v48, %v679_v42  ;;  %v784_v55 = vsel %vm676_vm2, %v750_v47, 0.0 }
 0x177   : > { %v782_v52 = vsel %vm676_vm2, %v749_v49, 0.0 }
 0x178   : > { %v783_v53 = vadd.f32 %v782_v52, %v781_v44  ;;  %v683_v54 = vadd.f32 %v682_v51, %v681_v50 }
 0x17a   : > { %v785_v56 = vadd.f32 %v784_v55, %v783_v53 }
 0x17b   : > { %v3857_v57 = vpop.f32.mrb[4].mxu0 }
 0x17c   : > { %v3859_v58 = vpop.f32.mrb[5].mxu0  ;;  %v752_v59 = vmul.f32 %v3857_v57, %v3857_v57  ;;  %v686_v63 = vsel %vm676_vm2, %v3857_v57, 0.0 }
 0x17d   : > { %v684_v60 = vsel %vm676_vm2, %v3859_v58, 0.0  ;;  %v751_v61 = vmul.f32 %v3859_v58, %v3859_v58 }
 0x17e   : > { %v685_v62 = vadd.f32 %v684_v60, %v683_v54  ;;  %v788_v3 = vsel %vm676_vm2, %v752_v59, 0.0 }
 0x17f   : > { %v786_v0 = vsel %vm676_vm2, %v751_v61, 0.0 }
 0x180   : > { %v787_v1 = vadd.f32 %v786_v0, %v785_v56  ;;  %v687_v2 = vadd.f32 %v686_v63, %v685_v62 }
 0x182   : > { %v789_v4 = vadd.f32 %v788_v3, %v787_v1 }
 0x183   : > { %v3871_v5 = vpop.f32.mrb[6].mxu0 }
 0x184   : > { %v3873_v6 = vpop.f32.mrb[7].mxu0  ;;  %v754_v7 = vmul.f32 %v3871_v5, %v3871_v5  ;;  %v690_v11 = vsel %vm676_vm2, %v3871_v5, 0.0 }
 0x185   : > { %v688_v8 = vsel %vm676_vm2, %v3873_v6, 0.0  ;;  %v753_v9 = vmul.f32 %v3873_v6, %v3873_v6 }
 0x186   : > { %v689_v10 = vadd.f32 %v688_v8, %v687_v2  ;;  %v792_v15 = vsel %vm676_vm2, %v754_v7, 0.0  ;;  %v1120_v8 = vld [vmem:[%s5910_s4] sm:$0xff] }
 0x187   : > { %v790_v12 = vsel %vm676_vm2, %v753_v9, 0.0  ;;  %v3729_v9 = vmov 0.0   ;;  %3596 = vmatprep.subr.mxu0 %v1120_v8  ;;  %3679 = vmatprep.subr.mxu1 %v1120_v8 }
 0x188   : > { %v791_v13 = vadd.f32 %v790_v12, %v789_v4  ;;  %v691_v14 = vadd.f32 %v690_v11, %v689_v10  ;;  %969 = vst.msk [vmem:[#allocation2 + $0x5a] sm:$0x3f] %vm965_vm3, %v3729_v9  ;;  %966 = vst.msk [vmem:[#allocation2 + $0x12] sm:$0x3f] %vm965_vm3, %v3729_v9  ;;  %3597 = vmatpush3.msra.mxu0 %v1120_v8  ;;  %3680 = vmatpush3.msra.mxu1 %v1120_v8 }
 0x189   : > { %967 = vst.msk [vmem:[#allocation2 + $0x2a] sm:$0x3f] %vm965_vm3, %v3729_v9  ;;  %968 = vst.msk [vmem:[#allocation2 + $0x42] sm:$0x3f] %vm965_vm3, %v3729_v9 }
 0x18a   : > { %v793_v16 = vadd.f32 %v792_v15, %v791_v13  ;;  %970 = vst.msk [vmem:[#allocation2 + $0x72] sm:$0x3f] %vm965_vm3, %v3729_v9  ;;  %971 = vst.msk [vmem:[#allocation2 + $0x8a] sm:$0x3f] %vm965_vm3, %v3729_v9 }
 0x18b   : > { %v3885_v17 = vpop.f32.mrb[8].mxu0  ;;  %972 = vst.msk [vmem:[#allocation2 + $0xa2] sm:$0x3f] %vm965_vm3, %v3729_v9  ;;  %973 = vst.msk [vmem:[#allocation2 + $0xba] sm:$0x3f] %vm965_vm3, %v3729_v9 }
 0x18c   : > { %v3887_v18 = vpop.f32.mrb[9].mxu0  ;;  %v756_v19 = vmul.f32 %v3885_v17, %v3885_v17  ;;  %v694_v23 = vsel %vm676_vm2, %v3885_v17, 0.0  ;;  %974 = vst.msk [vmem:[#allocation2 + $0xd2] sm:$0x3f] %vm965_vm3, %v3729_v9  ;;  %975 = vst.msk [vmem:[#allocation2 + $0xea] sm:$0x3f] %vm965_vm3, %v3729_v9 }
 0x18d   : > { %v692_v20 = vsel %vm676_vm2, %v3887_v18, 0.0  ;;  %v755_v21 = vmul.f32 %v3887_v18, %v3887_v18  ;;  %976 = vst.msk [vmem:[#allocation2 + $0x102] sm:$0x3f] %vm965_vm3, %v3729_v9  ;;  %977 = vst.msk [vmem:[#allocation2 + $0x11a] sm:$0x3f] %vm965_vm3, %v3729_v9 }
 0x18e   : > { %v693_v22 = vadd.f32 %v692_v20, %v691_v14  ;;  %v796_v27 = vsel %vm676_vm2, %v756_v19, 0.0  ;;  %978 = vst.msk [vmem:[#allocation2 + $0x132] sm:$0x3f] %vm965_vm3, %v3729_v9  ;;  %979 = vst.msk [vmem:[#allocation2 + $0x14a] sm:$0x3f] %vm965_vm3, %v3729_v9 }
 0x18f   : > { %v794_v24 = vsel %vm676_vm2, %v755_v21, 0.0  ;;  %980 = vst.msk [vmem:[#allocation2 + $0x162] sm:$0x3f] %vm965_vm3, %v3729_v9  ;;  %981 = vst.msk [vmem:[#allocation2 + $0x17a] sm:$0x3f] %vm965_vm3, %v3729_v9 }
 0x190   : > { %v795_v25 = vadd.f32 %v794_v24, %v793_v16  ;;  %v695_v26 = vadd.f32 %v694_v23, %v693_v22  ;;  %982 = vst.msk [vmem:[#allocation2 + $0x192] sm:$0x3f] %vm965_vm3, %v3729_v9  ;;  %983 = vst.msk [vmem:[#allocation2 + $0x1aa] sm:$0x3f] %vm965_vm3, %v3729_v9 }
 0x192   : > { %v797_v28 = vadd.f32 %v796_v27, %v795_v25 }
 0x193   : > { %v3899_v29 = vpop.f32.mrb[10].mxu0 }
 0x194   : > { %v3901_v30 = vpop.f32.mrb[11].mxu0  ;;  %v758_v31 = vmul.f32 %v3899_v29, %v3899_v29  ;;  %v698_v36 = vsel %vm676_vm2, %v3899_v29, 0.0 }
 0x195   : > { %v696_v32 = vsel %vm676_vm2, %v3901_v30, 0.0  ;;  %v757_v33 = vmul.f32 %v3901_v30, %v3901_v30 }
 0x196   : > { %v697_v34 = vadd.f32 %v696_v32, %v695_v26  ;;  %v800_v41 = vsel %vm676_vm2, %v758_v31, 0.0 }
 0x197   : > { %v798_v37 = vsel %vm676_vm2, %v757_v33, 0.0 }
 0x198   : > { %v799_v39 = vadd.f32 %v798_v37, %v797_v28  ;;  %v699_v40 = vadd.f32 %v698_v36, %v697_v34 }
 0x19a   : > { %v801_v42 = vadd.f32 %v800_v41, %v799_v39 }
 0x19b   : > { %v3913_v43 = vpop.f32.mrb[12].mxu0 }
 0x19c   : > { %v3915_v44 = vpop.f32.mrb[13].mxu0  ;;  %v760_v47 = vmul.f32 %v3913_v43, %v3913_v43  ;;  %v702_v51 = vsel %vm676_vm2, %v3913_v43, 0.0 }
 0x19d   : > { %v700_v48 = vsel %vm676_vm2, %v3915_v44, 0.0  ;;  %v759_v49 = vmul.f32 %v3915_v44, %v3915_v44 }
 0x19e   : > { %v701_v50 = vadd.f32 %v700_v48, %v699_v40  ;;  %v804_v55 = vsel %vm676_vm2, %v760_v47, 0.0 }
 0x19f   : > { %v802_v52 = vsel %vm676_vm2, %v759_v49, 0.0 }
 0x1a0   : > { %v803_v53 = vadd.f32 %v802_v52, %v801_v42  ;;  %v703_v54 = vadd.f32 %v702_v51, %v701_v50 }
 0x1a2   : > { %v805_v56 = vadd.f32 %v804_v55, %v803_v53 }
 0x1a3   : > { %v3927_v59 = vpop.f32.mrb[14].mxu0 }
 0x1a4   : > { %v3929_v60 = vpop.f32.mrb[15].mxu0  ;;  %v762_v61 = vmul.f32 %v3927_v59, %v3927_v59  ;;  %v706_v1 = vsel %vm676_vm2, %v3927_v59, 0.0 }
 0x1a5   : > { %v704_v62 = vsel %vm676_vm2, %v3929_v60, 0.0  ;;  %v761_v63 = vmul.f32 %v3929_v60, %v3929_v60 }
 0x1a6   : > { %v705_v0 = vadd.f32 %v704_v62, %v703_v54  ;;  %v808_v7 = vsel %vm676_vm2, %v762_v61, 0.0 }
 0x1a7   : > { %v806_v2 = vsel %vm676_vm2, %v761_v63, 0.0 }
 0x1a8   : > { %v807_v3 = vadd.f32 %v806_v2, %v805_v56  ;;  %v707_v4 = vadd.f32 %v706_v1, %v705_v0 }
 0x1aa   : > { %v809_v10 = vadd.f32 %v808_v7, %v807_v3 }
 0x1ab   : > { %v3962_v11 = vpop.f32.mrb[16].mxu0 }
 0x1ac   : > { %v3964_v12 = vpop.f32.mrb[17].mxu0  ;;  %v764_v13 = vmul.f32 %v3962_v11, %v3962_v11  ;;  %v710_v19 = vsel %vm676_vm2, %v3962_v11, 0.0 }
 0x1ad   : > { %v708_v14 = vsel %vm676_vm2, %v3964_v12, 0.0  ;;  %v763_v15 = vmul.f32 %v3964_v12, %v3964_v12 }
 0x1ae   : > { %v709_v16 = vadd.f32 %v708_v14, %v707_v4  ;;  %v812_v23 = vsel %vm676_vm2, %v764_v13, 0.0 }
 0x1af   : > { %v810_v20 = vsel %vm676_vm2, %v763_v15, 0.0 }
 0x1b0   : > { %v811_v21 = vadd.f32 %v810_v20, %v809_v10  ;;  %v711_v22 = vadd.f32 %v710_v19, %v709_v16 }
 0x1b2   : > { %v813_v24 = vadd.f32 %v812_v23, %v811_v21 }
 0x1b3   : > { %v3976_v25 = vpop.f32.mrb[18].mxu0 }
 0x1b4   : > { %v3978_v26 = vpop.f32.mrb[19].mxu0  ;;  %v766_v27 = vmul.f32 %v3976_v25, %v3976_v25  ;;  %v714_v33 = vsel %vm676_vm2, %v3976_v25, 0.0 }
 0x1b5   : > { %v712_v28 = vsel %vm676_vm2, %v3978_v26, 0.0  ;;  %v765_v31 = vmul.f32 %v3978_v26, %v3978_v26 }
 0x1b6   : > { %v713_v32 = vadd.f32 %v712_v28, %v711_v22  ;;  %v816_v39 = vsel %vm676_vm2, %v766_v27, 0.0 }
 0x1b7   : > { %v814_v34 = vsel %vm676_vm2, %v765_v31, 0.0 }
 0x1b8   : > { %v815_v36 = vadd.f32 %v814_v34, %v813_v24  ;;  %v715_v37 = vadd.f32 %v714_v33, %v713_v32 }
 0x1ba   : > { %v817_v40 = vadd.f32 %v816_v39, %v815_v36 }
 0x1bb   : > { %v3990_v41 = vpop.f32.mrb[20].mxu0 }
 0x1bc   : > { %v3992_v42 = vpop.f32.mrb[21].mxu0  ;;  %v768_v47 = vmul.f32 %v3990_v41, %v3990_v41  ;;  %v718_v51 = vsel %vm676_vm2, %v3990_v41, 0.0 }
 0x1bd   : > { %v716_v48 = vsel %vm676_vm2, %v3992_v42, 0.0  ;;  %v767_v49 = vmul.f32 %v3992_v42, %v3992_v42 }
 0x1be   : > { %v717_v50 = vadd.f32 %v716_v48, %v715_v37  ;;  %v820_v55 = vsel %vm676_vm2, %v768_v47, 0.0 }
 0x1bf   : > { %v818_v52 = vsel %vm676_vm2, %v767_v49, 0.0 }
 0x1c0   : > { %v819_v53 = vadd.f32 %v818_v52, %v817_v40  ;;  %v719_v54 = vadd.f32 %v718_v51, %v717_v50 }
 0x1c2   : > { %v821_v56 = vadd.f32 %v820_v55, %v819_v53 }
 0x1c3   : > { %v4004_v61 = vpop.f32.mrb[22].mxu0 }
 0x1c4   : > { %v4006_v62 = vpop.f32.mrb[23].mxu0  ;;  %v770_v63 = vmul.f32 %v4004_v61, %v4004_v61  ;;  %v722_v3 = vsel %vm676_vm2, %v4004_v61, 0.0 }
 0x1c5   : > { %v720_v0 = vsel %vm676_vm2, %v4006_v62, 0.0  ;;  %v769_v1 = vmul.f32 %v4006_v62, %v4006_v62 }
 0x1c6   : > { %v721_v2 = vadd.f32 %v720_v0, %v719_v54  ;;  %v824_v9 = vsel %vm676_vm2, %v770_v63, 0.0 }
 0x1c7   : > { %v822_v4 = vsel %vm676_vm2, %v769_v1, 0.0 }
 0x1c8   : > { %v823_v7 = vadd.f32 %v822_v4, %v821_v56  ;;  %v723_v8 = vadd.f32 %v722_v3, %v721_v2 }
 0x1ca   : > { %v825_v10 = vadd.f32 %v824_v9, %v823_v7 }
 0x1cb   : > { %v4018_v13 = vpop.f32.mrb[24].mxu0 }
 0x1cc   : > { %v4020_v14 = vpop.f32.mrb[25].mxu0  ;;  %v772_v15 = vmul.f32 %v4018_v13, %v4018_v13  ;;  %v726_v21 = vsel %vm676_vm2, %v4018_v13, 0.0 }
 0x1cd   : > { %v724_v16 = vsel %vm676_vm2, %v4020_v14, 0.0  ;;  %v771_v19 = vmul.f32 %v4020_v14, %v4020_v14 }
 0x1ce   : > { %v725_v20 = vadd.f32 %v724_v16, %v723_v8  ;;  %v828_v27 = vsel %vm676_vm2, %v772_v15, 0.0 }
 0x1cf   : > { %v826_v22 = vsel %vm676_vm2, %v771_v19, 0.0 }
 0x1d0   : > { %v827_v23 = vadd.f32 %v826_v22, %v825_v10  ;;  %v727_v24 = vadd.f32 %v726_v21, %v725_v20 }
 0x1d2   : > { %v829_v28 = vadd.f32 %v828_v27, %v827_v23 }
 0x1d3   : > { %v4032_v31 = vpop.f32.mrb[26].mxu0 }
 0x1d4   : > { %v4034_v32 = vpop.f32.mrb[27].mxu0  ;;  %v774_v33 = vmul.f32 %v4032_v31, %v4032_v31  ;;  %v730_v39 = vsel %vm676_vm2, %v4032_v31, 0.0 }
 0x1d5   : > { %v728_v34 = vsel %vm676_vm2, %v4034_v32, 0.0  ;;  %v773_v36 = vmul.f32 %v4034_v32, %v4034_v32 }
 0x1d6   : > { %v729_v37 = vadd.f32 %v728_v34, %v727_v24  ;;  %v832_v49 = vsel %vm676_vm2, %v774_v33, 0.0 }
 0x1d7   : > { %v830_v40 = vsel %vm676_vm2, %v773_v36, 0.0 }
 0x1d8   : > { %v831_v47 = vadd.f32 %v830_v40, %v829_v28  ;;  %v731_v48 = vadd.f32 %v730_v39, %v729_v37 }
 0x1da   : > { %v833_v50 = vadd.f32 %v832_v49, %v831_v47 }
 0x1db   : > { %v4046_v51 = vpop.f32.mrb[28].mxu0 }
 0x1dc   : > { %v4048_v52 = vpop.f32.mrb[29].mxu0  ;;  %v776_v53 = vmul.f32 %v4046_v51, %v4046_v51  ;;  %v734_v63 = vsel %vm676_vm2, %v4046_v51, 0.0 }
 0x1dd   : > { %v732_v54 = vsel %vm676_vm2, %v4048_v52, 0.0  ;;  %v775_v55 = vmul.f32 %v4048_v52, %v4048_v52 }
 0x1de   : > { %v733_v56 = vadd.f32 %v732_v54, %v731_v48  ;;  %v836_v3 = vsel %vm676_vm2, %v776_v53, 0.0 }
 0x1df   : > { %v834_v0 = vsel %vm676_vm2, %v775_v55, 0.0 }
 0x1e0   : > { %v835_v1 = vadd.f32 %v834_v0, %v833_v50  ;;  %v735_v2 = vadd.f32 %v734_v63, %v733_v56 }
 0x1e2   : > { %v837_v4 = vadd.f32 %v836_v3, %v835_v1  ;;  %v858_v1 = vlaneseq  ;;  %v674_v3 = vld [vmem:[%s5908_s2] sm:$0x1] }
 0x1e3   : > { %v4060_v7 = vpop.f32.mrb[30].mxu0 }
 0x1e4   : > { %v665_v8 = vpop.f32.mrb[31].mxu0  ;;  %v778_v9 = vmul.f32 %v4060_v7, %v4060_v7  ;;  %v738_v19 = vsel %vm676_vm2, %v4060_v7, 0.0 }
 0x1e5   : > { %v736_v10 = vsel %vm676_vm2, %v665_v8, 0.0  ;;  %v777_v15 = vmul.f32 %v665_v8, %v665_v8 }
 0x1e6   : > { %v737_v16 = vadd.f32 %v736_v10, %v735_v2  ;;  %v840_v23 = vsel %vm676_vm2, %v778_v9, 0.0  ;;  %v859_v2 = vshrl.u32 %v858_v1, 7 }
 0x1e7   : > { %v838_v20 = vsel %vm676_vm2, %v777_v15, 0.0  ;;  %v675_v15 = vld [vmem:[%s5909_s3] sm:$0x1] }
 0x1e8   : > { %v739_v21 = vadd.f32 %v738_v19, %v737_v16  ;;  %v839_v22 = vadd.f32 %v838_v20, %v837_v4  ;;  %v4072_v4 = vsub.s32 0, %v859_v2 }
 0x1ea   : > { %v740_v24 = vrot.slane %v739_v21, 4  ;;  %v841_v27 = vadd.f32 %v840_v23, %v839_v22  ;;  %5933 = vst [vmem:[#allocation4_spill] sm:$0xff] %v4072_v4 }
 0x1ec   : > { %v741_v28 = vadd.f32 %v740_v24, %v739_v21  ;;  %v842_v33 = vrot.slane %v841_v27, 4 }
 0x1ee   : > { %v742_v34 = vrot.slane %v741_v28, 2  ;;  %v843_v36 = vadd.f32 %v842_v33, %v841_v27 }
 0x1f0   : > { %v743_v37 = vadd.f32 %v742_v34, %v741_v28  ;;  %v844_v39 = vrot.slane %v843_v36, 2 }
 0x1f2   : > { %v744_v40 = vrot.slane %v743_v37, 1  ;;  %v845_v47 = vadd.f32 %v844_v39, %v843_v36 }
 0x1f4   : > { %v745_v48 = vadd.f32 %v744_v40, %v743_v37  ;;  %v846_v49 = vrot.slane %v845_v47, 1 }
 0x1f6   : > { %v746_v50 = vmul.f32 0.00390625, %v745_v48  ;;  %v847_v53 = vadd.f32 %v846_v49, %v845_v47 }
 0x1f8   : > { %v848_v54 = vmul.f32 0.00390625, %v847_v53  ;;  %v849_v55 = vmul.f32 %v746_v50, %v746_v50 }
 0x1fa   : > { %v850_v56 = vsub.f32 %v848_v54, %v849_v55 }
 0x1fc   : > { %v851_v63 = vmax.f32 %v850_v56, 0.0 }
 0x1fe   : > { %v852_v0 = vadd.f32 1e-05, %v851_v63 }
 0x200   : > { %3699 = vrsqrt.f32 %v852_v0 }
 0x20a   : > { %v3700_v9 = vpop.eup %3699 }
 0x20b   : > { %v854_v10 = vmul.f32 %v3700_v9, %v674_v3 }
 0x20d   : > { %v855_v16 = vmul.f32 %v854_v10, %v746_v50  ;;  %v861_v19 = vrot.slane %v854_v10, %v4072_v4 }
 0x20f   : > { %v856_v20 = vsub.f32 %v675_v15, %v855_v16  ;;  %v893_v21 = vmul.f32 %v861_v19, %v665_v8  ;;  %v863_v22 = vmul.f32 %v861_v19, %v3835_v38  ;;  %v864_v23 = vmul.f32 %v3829_v35, %v861_v19 }
 0x210   : > { %v865_v24 = vmul.f32 %v861_v19, %v3845_v46  ;;  %v866_v27 = vmul.f32 %v3843_v45, %v861_v19  ;;  %v867_v28 = vmul.f32 %v861_v19, %v3859_v58  ;;  %v868_v33 = vmul.f32 %v3857_v57, %v861_v19 }
 0x211   : > { %v899_v34 = vrot.slane %v856_v20, %v4072_v4  ;;  %v869_v36 = vmul.f32 %v861_v19, %v3873_v6  ;;  %v870_v37 = vmul.f32 %v3871_v5, %v861_v19  ;;  %v871_v8 = vmul.f32 %v861_v19, %v3887_v18 }
 0x212   : > { %v872_v38 = vmul.f32 %v3885_v17, %v861_v19  ;;  %v873_v35 = vmul.f32 %v861_v19, %v3901_v30  ;;  %v874_v46 = vmul.f32 %v3899_v29, %v861_v19  ;;  %v875_v45 = vmul.f32 %v861_v19, %v3915_v44 }
 0x213   : > { %v931_v39 = vadd.f32 %v899_v34, %v893_v21  ;;  %v876_v58 = vmul.f32 %v3913_v43, %v861_v19  ;;  %v877_v57 = vmul.f32 %v861_v19, %v3929_v60  ;;  %v878_v40 = vmul.f32 %v3927_v59, %v861_v19 }
 0x214   : > { %v879_v6 = vmul.f32 %v861_v19, %v3964_v12  ;;  %v880_v5 = vmul.f32 %v3962_v11, %v861_v19  ;;  %v881_v18 = vmul.f32 %v861_v19, %v3978_v26  ;;  %v882_v17 = vmul.f32 %v3976_v25, %v861_v19 }
 0x215   : > { %v963_v30 = vmax.f32 %v931_v39, 0.0  ;;  %v883_v29 = vmul.f32 %v861_v19, %v3992_v42  ;;  %v884_v44 = vmul.f32 %v3990_v41, %v861_v19  ;;  %v885_v47 = vmul.f32 %v861_v19, %v4006_v62 }
 0x216   : > { %v886_v43 = vmul.f32 %v4004_v61, %v861_v19  ;;  %v887_v60 = vmul.f32 %v861_v19, %v4020_v14  ;;  %v888_v59 = vmul.f32 %v4018_v13, %v861_v19  ;;  %v889_v12 = vmul.f32 %v861_v19, %v4034_v32 }
 0x217   : > { %1015 = vst.msk [vmem:[#allocation2 + $0x181] sm:$0xff] %vm676_vm2, %v963_v30  ;;  %v890_v11 = vmul.f32 %v4032_v31, %v861_v19  ;;  %v891_v25 = vmul.f32 %v861_v19, %v4048_v52  ;;  %v892_v26 = vmul.f32 %v4046_v51, %v861_v19  ;;  %v894_v41 = vmul.f32 %v4060_v7, %v861_v19 }
 0x218   : > { %1033 = vst.msk [vmem:[#allocation2 + $0x17f] sm:$0x2] %vm1017_vm5, %v963_v30  ;;  %v901_v42 = vadd.f32 %v899_v34, %v863_v22  ;;  %v902_v61 = vadd.f32 %v899_v34, %v864_v23  ;;  %v903_v62 = vadd.f32 %v899_v34, %v865_v24  ;;  %v904_v14 = vadd.f32 %v899_v34, %v866_v27 }
 0x219   : > { %v905_v13 = vadd.f32 %v899_v34, %v867_v28  ;;  %v906_v48 = vadd.f32 %v899_v34, %v868_v33  ;;  %v907_v32 = vadd.f32 %v899_v34, %v869_v36  ;;  %v908_v49 = vadd.f32 %v899_v34, %v870_v37 }
 0x21a   : > { %v909_v50 = vadd.f32 %v899_v34, %v871_v8  ;;  %v4112_v53 = vadd.f32 %v899_v34, %v872_v38  ;;  %v4114_v54 = vadd.f32 %v899_v34, %v873_v35  ;;  %v4116_v31 = vadd.f32 %v899_v34, %v874_v46 }
 0x21b   : > { %v4118_v52 = vadd.f32 %v899_v34, %v875_v45  ;;  %v4120_v51 = vadd.f32 %v899_v34, %v876_v58  ;;  %v4122_v7 = vadd.f32 %v899_v34, %v877_v57  ;;  %v4124_v55 = vadd.f32 %v899_v34, %v878_v40 }
 0x21c   : > { %v4126_v56 = vadd.f32 %v899_v34, %v879_v6  ;;  %v4128_v63 = vadd.f32 %v899_v34, %v880_v5  ;;  %v4130_v0 = vadd.f32 %v899_v34, %v881_v18  ;;  %v4132_v1 = vadd.f32 %v899_v34, %v882_v17 }
 0x21d   : > { %v4134_v2 = vadd.f32 %v899_v34, %v883_v29  ;;  %v4136_v3 = vadd.f32 %v899_v34, %v884_v44  ;;  %v4138_v9 = vadd.f32 %v899_v34, %v885_v47  ;;  %v4140_v10 = vadd.f32 %v899_v34, %v886_v43 }
 0x21e   : > { %v4142_v15 = vadd.f32 %v899_v34, %v887_v60  ;;  %v4144_v16 = vadd.f32 %v899_v34, %v888_v59  ;;  %v4146_v19 = vadd.f32 %v899_v34, %v889_v12  ;;  %v4148_v20 = vadd.f32 %v899_v34, %v890_v11 }
 0x21f   : > { %v4150_v21 = vadd.f32 %v899_v34, %v891_v25  ;;  %v4152_v22 = vadd.f32 %v899_v34, %v892_v26  ;;  %v4154_v23 = vadd.f32 %v899_v34, %v894_v41  ;;  %v933_v24 = vmax.f32 %v901_v42, 0.0 }
 0x220   : > { %v934_v27 = vmax.f32 %v902_v61, 0.0  ;;  %v935_v28 = vmax.f32 %v903_v62, 0.0  ;;  %v936_v33 = vmax.f32 %v904_v14, 0.0  ;;  %v937_v36 = vmax.f32 %v905_v13, 0.0 }
 0x221   : > { %v938_v37 = vmax.f32 %v906_v48, 0.0  ;;  %v939_v8 = vmax.f32 %v907_v32, 0.0  ;;  %v940_v38 = vmax.f32 %v908_v49, 0.0  ;;  %v941_v35 = vmax.f32 %v909_v50, 0.0  ;;  %985 = vst.msk [vmem:[#allocation2 + $0x19] sm:$0xff] %vm676_vm2, %v933_v24 }
 0x222   : > { %1018 = vst.msk [vmem:[#allocation2 + $0x17] sm:$0x2] %vm1017_vm5, %v933_v24  ;;  %v942_v46 = vmax.f32 %v4112_v53, 0.0  ;;  %v943_v45 = vmax.f32 %v4114_v54, 0.0  ;;  %v944_v34 = vmax.f32 %v4116_v31, 0.0  ;;  %v945_v39 = vmax.f32 %v4118_v52, 0.0 }
 0x223   : > { %986 = vst.msk [vmem:[#allocation2 + $0x21] sm:$0xff] %vm676_vm2, %v934_v27  ;;  %987 = vst.msk [vmem:[#allocation2 + $0x31] sm:$0xff] %vm676_vm2, %v935_v28  ;;  %v946_v58 = vmax.f32 %v4120_v51, 0.0  ;;  %v947_v57 = vmax.f32 %v4122_v7, 0.0  ;;  %v948_v40 = vmax.f32 %v4124_v55, 0.0  ;;  %v949_v6 = vmax.f32 %v4126_v56, 0.0 }
 0x224   : > { %988 = vst.msk [vmem:[#allocation2 + $0x39] sm:$0xff] %vm676_vm2, %v936_v33  ;;  %989 = vst.msk [vmem:[#allocation2 + $0x49] sm:$0xff] %vm676_vm2, %v937_v36  ;;  %v950_v5 = vmax.f32 %v4128_v63, 0.0  ;;  %v951_v18 = vmax.f32 %v4130_v0, 0.0  ;;  %v952_v17 = vmax.f32 %v4132_v1, 0.0  ;;  %v953_v30 = vmax.f32 %v4134_v2, 0.0 }
 0x225   : > { %1019 = vst.msk [vmem:[#allocation2 + $0x2f] sm:$0x2] %vm1017_vm5, %v935_v28  ;;  %1020 = vst.msk [vmem:[#allocation2 + $0x47] sm:$0x2] %vm1017_vm5, %v937_v36  ;;  %v954_v29 = vmax.f32 %v4136_v3, 0.0  ;;  %v955_v44 = vmax.f32 %v4138_v9, 0.0 }
 0x226   : > { %1035 = vst.msk [vmem:[#allocation2 + $0x23] sm:$0x40] %vm1034_vm6, %v934_v27  ;;  %1036 = vst.msk [vmem:[#allocation2 + $0x3b] sm:$0x40] %vm1034_vm6, %v936_v33  ;;  %v956_v47 = vmax.f32 %v4140_v10, 0.0  ;;  %v957_v43 = vmax.f32 %v4142_v15, 0.0 }
 0x227   : > { %990 = vst.msk [vmem:[#allocation2 + $0x51] sm:$0xff] %vm676_vm2, %v938_v37  ;;  %991 = vst.msk [vmem:[#allocation2 + $0x61] sm:$0xff] %vm676_vm2, %v939_v8  ;;  %v958_v60 = vmax.f32 %v4144_v16, 0.0  ;;  %v959_v59 = vmax.f32 %v4146_v19, 0.0  ;;  %v960_v12 = vmax.f32 %v4148_v20, 0.0  ;;  %v961_v11 = vmax.f32 %v4150_v21, 0.0 }
 0x228   : > { %992 = vst.msk [vmem:[#allocation2 + $0x69] sm:$0xff] %vm676_vm2, %v940_v38  ;;  %993 = vst.msk [vmem:[#allocation2 + $0x79] sm:$0xff] %vm676_vm2, %v941_v35  ;;  %v962_v25 = vmax.f32 %v4152_v22, 0.0  ;;  %v964_v26 = vmax.f32 %v4154_v23, 0.0 }
 0x229   : > { %1021 = vst.msk [vmem:[#allocation2 + $0x5f] sm:$0x2] %vm1017_vm5, %v939_v8  ;;  %1022 = vst.msk [vmem:[#allocation2 + $0x77] sm:$0x2] %vm1017_vm5, %v941_v35  ;;  %v1069_v52 = vld [vmem:[#allocation2 + $0x18] sm:$0xff] }
 0x22a   : > { %1037 = vst.msk [vmem:[#allocation2 + $0x53] sm:$0x40] %vm1034_vm6, %v938_v37  ;;  %1038 = vst.msk [vmem:[#allocation2 + $0x6b] sm:$0x40] %vm1034_vm6, %v940_v38  ;;  %v1070_v7 = vld [vmem:[#allocation2 + $0x20] sm:$0xff] }
 0x22b   : > { %994 = vst.msk [vmem:[#allocation2 + $0x81] sm:$0xff] %vm676_vm2, %v942_v46  ;;  %995 = vst.msk [vmem:[#allocation2 + $0x91] sm:$0xff] %vm676_vm2, %v943_v45  ;;  %v1053_v41 = vld [vmem:[#allocation2 + $0x38] sm:$0xff] }
 0x22c   : > { %996 = vst.msk [vmem:[#allocation2 + $0x99] sm:$0xff] %vm676_vm2, %v944_v34  ;;  %997 = vst.msk [vmem:[#allocation2 + $0xa9] sm:$0xff] %vm676_vm2, %v945_v39  ;;  %v1052_v42 = vld [vmem:[#allocation2 + $0x30] sm:$0xff]  ;;  %v1075_v15 = vld [vmem:[#allocation2 + $0x48] sm:$0xff] }
 0x22d   : > { %1023 = vst.msk [vmem:[#allocation2 + $0x8f] sm:$0x2] %vm1017_vm5, %v943_v45  ;;  %1024 = vst.msk [vmem:[#allocation2 + $0xa7] sm:$0x2] %vm1017_vm5, %v945_v39  ;;  %v1054_v61 = vld [vmem:[#allocation2 + $0x40] sm:$0xff]  ;;  %v1071_v1 = vld [vmem:[#allocation2 + $0x28] sm:$0xff] }
 0x22e   : > { %1039 = vst.msk [vmem:[#allocation2 + $0x83] sm:$0x40] %vm1034_vm6, %v942_v46  ;;  %1040 = vst.msk [vmem:[#allocation2 + $0x9b] sm:$0x40] %vm1034_vm6, %v944_v34  ;;  %v1076_v62 = vld [vmem:[#allocation2 + $0x50] sm:$0xff] }
 0x22f   : > { %998 = vst.msk [vmem:[#allocation2 + $0xb1] sm:$0xff] %vm676_vm2, %v946_v58  ;;  %999 = vst.msk [vmem:[#allocation2 + $0xc1] sm:$0xff] %vm676_vm2, %v947_v57  ;;  %3613 = vmatprep.mubr.msk.f32.mxu1 %vm676_vm2, %v1076_v62  ;;  %v1079_v48 = vld [vmem:[#allocation2 + $0x68] sm:$0xff] }
 0x230   : > { %1000 = vst.msk [vmem:[#allocation2 + $0xc9] sm:$0xff] %vm676_vm2, %v948_v40  ;;  %1001 = vst.msk [vmem:[#allocation2 + $0xd9] sm:$0xff] %vm676_vm2, %v949_v6  ;;  %v1078_v13 = vld [vmem:[#allocation2 + $0x60] sm:$0xff]  ;;  %v1081_v53 = vld [vmem:[#allocation2 + $0x78] sm:$0xff] }
 0x231   : > { %1025 = vst.msk [vmem:[#allocation2 + $0xbf] sm:$0x2] %vm1017_vm5, %v947_v57  ;;  %1026 = vst.msk [vmem:[#allocation2 + $0xd7] sm:$0x2] %vm1017_vm5, %v949_v6  ;;  %v1077_v14 = vld [vmem:[#allocation2 + $0x58] sm:$0xff]  ;;  %v1080_v32 = vld [vmem:[#allocation2 + $0x70] sm:$0xff] }
 0x232   : > { %1041 = vst.msk [vmem:[#allocation2 + $0xb3] sm:$0x40] %vm1034_vm6, %v946_v58  ;;  %1042 = vst.msk [vmem:[#allocation2 + $0xcb] sm:$0x40] %vm1034_vm6, %v948_v40  ;;  %3614 = vmatmul.mubr.msk.f32.vlgmr.msra.gmra.mrb[0].mxu1 %vm676_vm2, %v1077_v14  ;;  %v1082_v31 = vld [vmem:[#allocation2 + $0x80] sm:$0xff] }
 0x233   : > { %1002 = vst.msk [vmem:[#allocation2 + $0xe1] sm:$0xff] %vm676_vm2, %v950_v5  ;;  %1003 = vst.msk [vmem:[#allocation2 + $0xf1] sm:$0xff] %vm676_vm2, %v951_v18  ;;  %3616 = vmatprep.mubr.msk.f32.mxu1 %vm676_vm2, %v1078_v13  ;;  %v1085_v2 = vld [vmem:[#allocation2 + $0x98] sm:$0xff]  ;;  %v1114_v6 = vld [vmem:[#allocation2 + $0x180] sm:$0xff] }
 0x234   : > { %1004 = vst.msk [vmem:[#allocation2 + $0xf9] sm:$0xff] %vm676_vm2, %v952_v17  ;;  %1005 = vst.msk [vmem:[#allocation2 + $0x109] sm:$0xff] %vm676_vm2, %v953_v30  ;;  %v1084_v56 = vld [vmem:[#allocation2 + $0x90] sm:$0xff]  ;;  %v1087_v9 = vld [vmem:[#allocation2 + $0xa8] sm:$0xff] }
 0x235   : > { %1027 = vst.msk [vmem:[#allocation2 + $0xef] sm:$0x2] %vm1017_vm5, %v951_v18  ;;  %1028 = vst.msk [vmem:[#allocation2 + $0x107] sm:$0x2] %vm1017_vm5, %v953_v30  ;;  %v1083_v51 = vld [vmem:[#allocation2 + $0x88] sm:$0xff]  ;;  %v1086_v3 = vld [vmem:[#allocation2 + $0xa0] sm:$0xff] }
 0x236   : > { %1043 = vst.msk [vmem:[#allocation2 + $0xe3] sm:$0x40] %vm1034_vm6, %v950_v5  ;;  %1044 = vst.msk [vmem:[#allocation2 + $0xfb] sm:$0x40] %vm1034_vm6, %v952_v17  ;;  %3617 = vmatmul.mubr.msk.f32.gmra.mrb[2].mxu1 %vm676_vm2, %v1079_v48  ;;  %v1088_v10 = vld [vmem:[#allocation2 + $0xb0] sm:$0xff] }
 0x237   : > { %1006 = vst.msk [vmem:[#allocation2 + $0x111] sm:$0xff] %vm676_vm2, %v954_v29  ;;  %1007 = vst.msk [vmem:[#allocation2 + $0x121] sm:$0xff] %vm676_vm2, %v955_v44  ;;  %3619 = vmatprep.mubr.msk.f32.mxu1 %vm676_vm2, %v1080_v32  ;;  %v1091_v20 = vld [vmem:[#allocation2 + $0xc8] sm:$0xff] }
 0x238   : > { %1008 = vst.msk [vmem:[#allocation2 + $0x129] sm:$0xff] %vm676_vm2, %v956_v47  ;;  %1009 = vst.msk [vmem:[#allocation2 + $0x139] sm:$0xff] %vm676_vm2, %v957_v43  ;;  %v1090_v19 = vld [vmem:[#allocation2 + $0xc0] sm:$0xff]  ;;  %v1093_v22 = vld [vmem:[#allocation2 + $0xd8] sm:$0xff] }
 0x239   : > { %1029 = vst.msk [vmem:[#allocation2 + $0x11f] sm:$0x2] %vm1017_vm5, %v955_v44  ;;  %1030 = vst.msk [vmem:[#allocation2 + $0x137] sm:$0x2] %vm1017_vm5, %v957_v43  ;;  %v1089_v16 = vld [vmem:[#allocation2 + $0xb8] sm:$0xff]  ;;  %v1092_v21 = vld [vmem:[#allocation2 + $0xd0] sm:$0xff] }
 0x23a   : > { %1045 = vst.msk [vmem:[#allocation2 + $0x113] sm:$0x40] %vm1034_vm6, %v954_v29  ;;  %1046 = vst.msk [vmem:[#allocation2 + $0x12b] sm:$0x40] %vm1034_vm6, %v956_v47  ;;  %3620 = vmatmul.mubr.msk.f32.gmra.mrb[4].mxu1 %vm676_vm2, %v1081_v53  ;;  %v1094_v23 = vld [vmem:[#allocation2 + $0xe0] sm:$0xff] }
 0x23b   : > { %1010 = vst.msk [vmem:[#allocation2 + $0x141] sm:$0xff] %vm676_vm2, %v958_v60  ;;  %1011 = vst.msk [vmem:[#allocation2 + $0x151] sm:$0xff] %vm676_vm2, %v959_v59  ;;  %3622 = vmatprep.mubr.msk.f32.mxu1 %vm676_vm2, %v1082_v31  ;;  %v1097_v28 = vld [vmem:[#allocation2 + $0xf8] sm:$0xff] }
 0x23c   : > { %1012 = vst.msk [vmem:[#allocation2 + $0x159] sm:$0xff] %vm676_vm2, %v960_v12  ;;  %1013 = vst.msk [vmem:[#allocation2 + $0x169] sm:$0xff] %vm676_vm2, %v961_v11  ;;  %v1096_v27 = vld [vmem:[#allocation2 + $0xf0] sm:$0xff]  ;;  %v1099_v36 = vld [vmem:[#allocation2 + $0x108] sm:$0xff] }
 0x23d   : > { %1031 = vst.msk [vmem:[#allocation2 + $0x14f] sm:$0x2] %vm1017_vm5, %v959_v59  ;;  %1032 = vst.msk [vmem:[#allocation2 + $0x167] sm:$0x2] %vm1017_vm5, %v961_v11  ;;  %v1095_v24 = vld [vmem:[#allocation2 + $0xe8] sm:$0xff]  ;;  %v1098_v33 = vld [vmem:[#allocation2 + $0x100] sm:$0xff] }
 0x23e   : > { %1047 = vst.msk [vmem:[#allocation2 + $0x143] sm:$0x40] %vm1034_vm6, %v958_v60  ;;  %1048 = vst.msk [vmem:[#allocation2 + $0x15b] sm:$0x40] %vm1034_vm6, %v960_v12  ;;  %3623 = vmatmul.mubr.msk.f32.gmra.mrb[6].mxu1 %vm676_vm2, %v1083_v51  ;;  %v1100_v37 = vld [vmem:[#allocation2 + $0x110] sm:$0xff] }
 0x23f   : > { %1014 = vst.msk [vmem:[#allocation2 + $0x171] sm:$0xff] %vm676_vm2, %v962_v25  ;;  %1016 = vst.msk [vmem:[#allocation2 + $0x189] sm:$0xff] %vm676_vm2, %v964_v26  ;;  %3625 = vmatprep.mubr.msk.f32.mxu1 %vm676_vm2, %v1084_v56  ;;  %v1103_v35 = vld [vmem:[#allocation2 + $0x128] sm:$0xff] }
 0x240   : > { %1049 = vst.msk [vmem:[#allocation2 + $0x173] sm:$0x40] %vm1034_vm6, %v962_v25  ;;  %1050 = vst.msk [vmem:[#allocation2 + $0x18b] sm:$0x40] %vm1034_vm6, %v964_v26  ;;  %v1102_v38 = vld [vmem:[#allocation2 + $0x120] sm:$0xff]  ;;  %v1105_v45 = vld [vmem:[#allocation2 + $0x138] sm:$0xff] }
 0x241   : > { %1056 = vst.msk [vmem:[#allocation2 + $0x8] sm:$0xff] %vm676_vm2, %v1053_v41  ;;  %1055 = vst.msk [vmem:[#allocation2] sm:$0xff] %vm676_vm2, %v1052_v42  ;;  %v1101_v8 = vld [vmem:[#allocation2 + $0x118] sm:$0xff]  ;;  %v1104_v46 = vld [vmem:[#allocation2 + $0x130] sm:$0xff] }
 0x242   : > { %1057 = vst.msk [vmem:[#allocation2 + $0x10] sm:$0xff] %vm676_vm2, %v1054_v61  ;;  %3626 = vmatmul.mubr.msk.f32.gmra.mrb[8].mxu1 %vm676_vm2, %v1085_v2  ;;  %v1106_v34 = vld [vmem:[#allocation2 + $0x140] sm:$0xff] }
 0x243   : > { %3628 = vmatprep.mubr.msk.f32.mxu1 %vm676_vm2, %v1086_v3  ;;  %v1109_v57 = vld [vmem:[#allocation2 + $0x158] sm:$0xff] }
 0x244   : > { %v4254_v55 = vld [vmem:[#allocation2 + $0x168] sm:$0xff]  ;;  %v1108_v58 = vld [vmem:[#allocation2 + $0x150] sm:$0xff] }
 0x245   : > { %1063 = vst.msk [vmem:[#allocation2 + $0x198] sm:$0xff] %vm676_vm2, %v4254_v55  ;;  %v1107_v39 = vld [vmem:[#allocation2 + $0x148] sm:$0xff]  ;;  %v1110_v40 = vld [vmem:[#allocation2 + $0x160] sm:$0xff] }
 0x246   : > { %v4258_v63 = vld [vmem:[#allocation2 + $0x170] sm:$0xff]  ;;  %3629 = vmatmul.mubr.msk.f32.gmra.mrb[10].mxu1 %vm676_vm2, %v1087_v9  ;;  %v1115_v5 = vld [vmem:[#allocation2 + $0x188] sm:$0xff] }
 0x247   : > { %v4260_v0 = vld [vmem:[#allocation2 + $0x178] sm:$0xff]  ;;  %1064 = vst.msk [vmem:[#allocation2 + $0x1a0] sm:$0xff] %vm676_vm2, %v4258_v63  ;;  %3631 = vmatprep.mubr.msk.f32.mxu1 %vm676_vm2, %v1088_v10  ;;  %v1116_v18 = vld [vmem:[#allocation2 + $0x190] sm:$0xff] }
 0x248   : > { %v1066_v49 = vld [vmem:[#allocation2] sm:$0xff]  ;;  %v1067_v50 = vld [vmem:[#allocation2 + $0x8] sm:$0xff]  ;;  %1065 = vst.msk [vmem:[#allocation2 + $0x1a8] sm:$0xff] %vm676_vm2, %v4260_v0 }
 0x249   : > { %3598 = vmatprep.mubr.msk.f32.mxu0 %vm676_vm2, %v1066_v49  ;;  %v1068_v54 = vld [vmem:[#allocation2 + $0x10] sm:$0xff] }
 0x24a   : > { %3599 = vmatmul.mubr.msk.f32.vlgmr.msra.gmra.mrb[32].mxu0 %vm676_vm2, %v1067_v50  ;;  %3632 = vmatmul.mubr.msk.f32.gmra.mrb[12].mxu1 %vm676_vm2, %v1089_v16 }
 0x24b   : > { %3601 = vmatprep.mubr.msk.f32.mxu0 %vm676_vm2, %v1068_v54  ;;  %3634 = vmatprep.mubr.msk.f32.mxu1 %vm676_vm2, %v1090_v19 }
 0x24c   : > { %v1117_v17 = vld [vmem:[#allocation2 + $0x198] sm:$0xff] }
 0x24e   : > { %3602 = vmatmul.mubr.msk.f32.gmra.mrb[34].mxu0 %vm676_vm2, %v1069_v52  ;;  %3635 = vmatmul.mubr.msk.f32.gmra.mrb[14].mxu1 %vm676_vm2, %v1091_v20  ;;  %v1118_v30 = vld [vmem:[#allocation2 + $0x1a0] sm:$0xff] }
 0x24f   : > { %3604 = vmatprep.mubr.msk.f32.mxu0 %vm676_vm2, %v1070_v7  ;;  %3637 = vmatprep.mubr.msk.f32.mxu1 %vm676_vm2, %v1092_v21  ;;  %v1119_v29 = vld [vmem:[#allocation2 + $0x1a8] sm:$0xff] }
 0x252   : > { %3605 = vmatmul.mubr.msk.f32.gmra.mrb[36].mxu0 %vm676_vm2, %v1071_v1  ;;  %3638 = vmatmul.mubr.msk.f32.gmra.mrb[16].mxu1 %vm676_vm2, %v1093_v22 }
 0x253   : > { %3607 = vmatprep.mubr.msk.f32.mxu0 %vm676_vm2, %v1052_v42  ;;  %3640 = vmatprep.mubr.msk.f32.mxu1 %vm676_vm2, %v1094_v23 }
 0x256   : > { %3608 = vmatmul.mubr.msk.f32.gmra.mrb[38].mxu0 %vm676_vm2, %v1053_v41  ;;  %3641 = vmatmul.mubr.msk.f32.gmra.mrb[18].mxu1 %vm676_vm2, %v1095_v24 }
 0x257   : > { %3610 = vmatprep.mubr.msk.f32.mxu0 %vm676_vm2, %v1054_v61  ;;  %3643 = vmatprep.mubr.msk.f32.mxu1 %vm676_vm2, %v1096_v27 }
 0x25a   : > { %3611 = vmatmul.mubr.msk.f32.gmra.mrb[40].mxu0 %vm676_vm2, %v1075_v15  ;;  %3644 = vmatmul.mubr.msk.f32.gmra.mrb[20].mxu1 %vm676_vm2, %v1097_v28 }
 0x25b   : > { %3646 = vmatprep.mubr.msk.f32.mxu1 %vm676_vm2, %v1098_v33 }
 0x25e   : > { %3647 = vmatmul.mubr.msk.f32.gmra.mrb[22].mxu1 %vm676_vm2, %v1099_v36 }
 0x25f   : > { %3649 = vmatprep.mubr.msk.f32.mxu1 %vm676_vm2, %v1100_v37 }
 0x262   : > { %3650 = vmatmul.mubr.msk.f32.gmra.mrb[24].mxu1 %vm676_vm2, %v1101_v8 }
 0x263   : > { %3652 = vmatprep.mubr.msk.f32.mxu1 %vm676_vm2, %v1102_v38 }
 0x266   : > { %3653 = vmatmul.mubr.msk.f32.gmra.mrb[26].mxu1 %vm676_vm2, %v1103_v35 }
 0x267   : > { %3655 = vmatprep.mubr.msk.f32.mxu1 %vm676_vm2, %v1104_v46 }
 0x26a   : > { %3656 = vmatmul.mubr.msk.f32.gmra.mrb[28].mxu1 %vm676_vm2, %v1105_v45 }
 0x26b   : > { %3658 = vmatprep.mubr.msk.f32.mxu1 %vm676_vm2, %v1106_v34 }
 0x26e   : > { %3659 = vmatmul.mubr.msk.f32.gmra.mrb[30].mxu1 %vm676_vm2, %v1107_v39 }
 0x26f   : > { %3661 = vmatprep.mubr.msk.f32.mxu1 %vm676_vm2, %v1108_v58 }
 0x272   : > { %3662 = vmatmul.mubr.msk.f32.gmra.mrb[32].mxu1 %vm676_vm2, %v1109_v57 }
 0x273   : > { %3664 = vmatprep.mubr.msk.f32.mxu1 %vm676_vm2, %v1110_v40 }
 0x276   : > { %3665 = vmatmul.mubr.msk.f32.gmra.mrb[34].mxu1 %vm676_vm2, %v4254_v55 }
 0x277   : > { %3667 = vmatprep.mubr.msk.f32.mxu1 %vm676_vm2, %v4258_v63 }
 0x27a   : > { %3668 = vmatmul.mubr.msk.f32.gmra.mrb[36].mxu1 %vm676_vm2, %v4260_v0 }
 0x27b   : > { %3670 = vmatprep.mubr.msk.f32.mxu1 %vm676_vm2, %v1114_v6 }
 0x27e   : > { %3671 = vmatmul.mubr.msk.f32.gmra.mrb[38].mxu1 %vm676_vm2, %v1115_v5 }
 0x27f   : > { %3673 = vmatprep.mubr.msk.f32.mxu1 %vm676_vm2, %v1116_v18 }
 0x282   : > { %3674 = vmatmul.mubr.msk.f32.gmra.mrb[40].mxu1 %vm676_vm2, %v1117_v17 }
 0x283   : > { %3676 = vmatprep.mubr.msk.f32.mxu1 %vm676_vm2, %v1118_v30 }
 0x286   : > { %3677 = vmatmul.mubr.msk.f32.gmra.mrb[42].mxu1 %vm676_vm2, %v1119_v29 }
 0x305   : > { %v3615_v44 = vpop.f32.mrb[0].mxu1 }
 0x306   : > { %1630 = vst.msk [vmem:[#allocation3 + $0x58] sm:$0xff] %vm1618_vm4, %v3615_v44  ;;  %v1399_v47 = vpop.f32.mrb[1].mxu1 }
 0x307   : > { %1629 = vst.msk [vmem:[#allocation3 + $0x50] sm:$0xff] %vm1618_vm4, %v1399_v47 }
 0x309   : > { %v3618_v43 = vpop.f32.mrb[2].mxu1 }
 0x30a   : > { %1632 = vst.msk [vmem:[#allocation3 + $0x68] sm:$0xff] %vm1618_vm4, %v3618_v43  ;;  %v1409_v60 = vpop.f32.mrb[3].mxu1 }
 0x30b   : > { %1631 = vst.msk [vmem:[#allocation3 + $0x60] sm:$0xff] %vm1618_vm4, %v1409_v60 }
 0x30d   : > { %v3621_v12 = vpop.f32.mrb[4].mxu1 }
 0x30e   : > { %1634 = vst.msk [vmem:[#allocation3 + $0x78] sm:$0xff] %vm1618_vm4, %v3621_v12  ;;  %v1419_v25 = vpop.f32.mrb[5].mxu1  ;;  %v1745_v26 = vld [vmem:[#allocation3 + $0x51] sm:$0xff] }
 0x30f   : > { %v1681_v41 = vld [vmem:[#allocation3 + $0x50] sm:$0xff]  ;;  %1633 = vst.msk [vmem:[#allocation3 + $0x70] sm:$0xff] %vm1618_vm4, %v1419_v25  ;;  %1816 = vrot.lane.b32.xlu1 %v1745_v26, %s3730_s15 }
 0x310   : > { %2166 = vrot.lane.b32.xlu0 %v1681_v41, %s3731_s16  ;;  %v1937_v13 = vld [vmem:[#allocation3 + $0x52] sm:$0xff] }
 0x311   : > { %v3624_v61 = vpop.f32.mrb[6].mxu1  ;;  %v1683_v3 = vld [vmem:[#allocation3 + $0x68] sm:$0xff] }
 0x312   : > { %1636 = vst.msk [vmem:[#allocation3 + $0x88] sm:$0xff] %vm1618_vm4, %v3624_v61  ;;  %v1429_v14 = vpop.f32.mrb[7].mxu1  ;;  %v1746_v51 = vld [vmem:[#allocation3 + $0x61] sm:$0xff] }
 0x313   : > { %1635 = vst.msk [vmem:[#allocation3 + $0x80] sm:$0xff] %vm1618_vm4, %v1429_v14  ;;  %2008 = vrot.lane.b32.xlu1 %v1937_v13, %s3732_s17  ;;  %v1938_v0 = vld [vmem:[#allocation3 + $0x62] sm:$0xff] }
 0x314   : > { %2298 = vrot.lane.b32.xlu0 %v1745_v26, %s3733_s18  ;;  %v1682_v9 = vld [vmem:[#allocation3 + $0x60] sm:$0xff] }
 0x315   : > { %v3627_v32 = vpop.f32.mrb[8].mxu1  ;;  %v1684_v36 = vld [vmem:[#allocation3 + $0x78] sm:$0xff] }
 0x316   : > { %1638 = vst.msk [vmem:[#allocation3 + $0x98] sm:$0xff] %vm1618_vm4, %v3627_v32  ;;  %v1439_v50 = vpop.f32.mrb[9].mxu1  ;;  %v1747_v22 = vld [vmem:[#allocation3 + $0x69] sm:$0xff] }
 0x317   : > { %1637 = vst.msk [vmem:[#allocation3 + $0x90] sm:$0xff] %vm1618_vm4, %v1439_v50  ;;  %2822 = vrot.lane.b32.xlu1 %v1937_v13, %s3734_s19  ;;  %v1939_v27 = vld [vmem:[#allocation3 + $0x6a] sm:$0xff] }
 0x318   : > { %2430 = vrot.lane.b32.xlu0 %v1937_v13, %s3735_s20 }
 0x319   : > { %v3630_v54 = vpop.f32.mrb[10].mxu1 }
 0x31a   : > { %1640 = vst.msk [vmem:[#allocation3 + $0xa8] sm:$0xff] %vm1618_vm4, %v3630_v54  ;;  %v1449_v52 = vpop.f32.mrb[11].mxu1  ;;  %v4371_v38 = vld [vmem:[#allocation3 + $0x82] sm:$0xff]  ;;  %v1748_v44 = vld [vmem:[#allocation3 + $0x79] sm:$0xff] }
 0x31b   : > { %1639 = vst.msk [vmem:[#allocation3 + $0xa0] sm:$0xff] %vm1618_vm4, %v1449_v52  ;;  %1818 = vrot.lane.b32.xlu1 %v1746_v51, %s3730_s15  ;;  %v1685_v45 = vld [vmem:[#allocation3 + $0x80] sm:$0xff] }
 0x31c   : > { %2558 = vrot.lane.b32.xlu0 %v1681_v41, %s3736_s21  ;;  %v1749_v57 = vld [vmem:[#allocation3 + $0x81] sm:$0xff] }
 0x31d   : > { %v3600_v59 = vpop.f32.mrb[32].mxu0  ;;  %v3633_v55 = vpop.f32.mrb[12].mxu1  ;;  %v1940_v14 = vld [vmem:[#allocation3 + $0x7a] sm:$0xff] }
 0x31e   : > { %1620 = vst.msk [vmem:[#allocation3 + $0x8] sm:$0xff] %vm1618_vm4, %v3600_v59  ;;  %v1349_v11 = vpop.f32.mrb[33].mxu0  ;;  %1642 = vst.msk [vmem:[#allocation3 + $0xb8] sm:$0xff] %vm1618_vm4, %v3633_v55  ;;  %v1459_v63 = vpop.f32.mrb[13].mxu1 }
 0x31f   : > { %1619 = vst.msk [vmem:[#allocation3] sm:$0xff] %vm1618_vm4, %v1349_v11  ;;  %1641 = vst.msk [vmem:[#allocation3 + $0xb0] sm:$0xff] %vm1618_vm4, %v1459_v63  ;;  %2010 = vrot.lane.b32.xlu1 %v1938_v0, %s3732_s17  ;;  %v1687_v11 = vld [vmem:[#allocation3 + $0x98] sm:$0xff] }
 0x320   : > { %2690 = vrot.lane.b32.xlu0 %v1745_v26, %s3737_s22 }
 0x321   : > { %v3603_v42 = vpop.f32.mrb[34].mxu0  ;;  %v3636_v1 = vpop.f32.mrb[14].mxu1 }
 0x322   : > { %1622 = vst.msk [vmem:[#allocation3 + $0x18] sm:$0xff] %vm1618_vm4, %v3603_v42  ;;  %v1359_v62 = vpop.f32.mrb[35].mxu0  ;;  %1644 = vst.msk [vmem:[#allocation3 + $0xc8] sm:$0xff] %vm1618_vm4, %v3636_v1  ;;  %v1469_v2 = vpop.f32.mrb[15].mxu1 }
 0x323   : > { %1621 = vst.msk [vmem:[#allocation3 + $0x10] sm:$0xff] %vm1618_vm4, %v1359_v62  ;;  %1643 = vst.msk [vmem:[#allocation3 + $0xc0] sm:$0xff] %vm1618_vm4, %v1469_v2  ;;  %2168 = vrot.lane.b32.xlu1 %v1682_v9, %s3731_s16 }
 0x324   : > { %2170 = vrot.lane.b32.xlu0 %v1683_v3, %s3731_s16 }
 0x325   : > { %v3606_v48 = vpop.f32.mrb[36].mxu0  ;;  %v3639_v10 = vpop.f32.mrb[16].mxu1 }
 0x326   : > { %1624 = vst.msk [vmem:[#allocation3 + $0x28] sm:$0xff] %vm1618_vm4, %v3606_v48  ;;  %v1369_v49 = vpop.f32.mrb[37].mxu0  ;;  %1646 = vst.msk [vmem:[#allocation3 + $0xd8] sm:$0xff] %vm1618_vm4, %v3639_v10  ;;  %v1479_v15 = vpop.f32.mrb[17].mxu1  ;;  %v1738_v34 = vld [vmem:[#allocation3 + $0x1] sm:$0xff]  ;;  %v1750_v48 = vld [vmem:[#allocation3 + $0x91] sm:$0xff] }
 0x327   : > { %1623 = vst.msk [vmem:[#allocation3 + $0x20] sm:$0xff] %vm1618_vm4, %v1369_v49  ;;  %1645 = vst.msk [vmem:[#allocation3 + $0xd0] sm:$0xff] %vm1618_vm4, %v1479_v15  ;;  %2300 = vrot.lane.b32.xlu1 %v1746_v51, %s3733_s18  ;;  %v1930_v5 = vld [vmem:[#allocation3 + $0x2] sm:$0xff]  ;;  %v4422_v49 = vld [vmem:[#allocation3 + $0x9a] sm:$0xff] }
 0x328   : > { %2562 = vrot.lane.b32.xlu0 %v1683_v3, %s3736_s21  ;;  %v1942_v3 = vld [vmem:[#allocation3 + $0x92] sm:$0xff] }
 0x329   : > { %v3609_v53 = vpop.f32.mrb[38].mxu0  ;;  %v3642_v16 = vpop.f32.mrb[18].mxu1  ;;  %v1676_v60 = vld [vmem:[#allocation3 + $0x18] sm:$0xff] }
 0x32a   : > { %1626 = vst.msk [vmem:[#allocation3 + $0x38] sm:$0xff] %vm1618_vm4, %v3609_v53  ;;  %v1379_v31 = vpop.f32.mrb[39].mxu0  ;;  %1648 = vst.msk [vmem:[#allocation3 + $0xe8] sm:$0xff] %vm1618_vm4, %v3642_v16  ;;  %v1489_v19 = vpop.f32.mrb[19].mxu1  ;;  %v1739_v25 = vld [vmem:[#allocation3 + $0x9] sm:$0xff]  ;;  %v4428_v53 = vld [vmem:[#allocation3 + $0x99] sm:$0xff] }
 0x32b   : > { %1625 = vst.msk [vmem:[#allocation3 + $0x30] sm:$0xff] %vm1618_vm4, %v1379_v31  ;;  %1647 = vst.msk [vmem:[#allocation3 + $0xe0] sm:$0xff] %vm1618_vm4, %v1489_v19  ;;  %2432 = vrot.lane.b32.xlu1 %v1938_v0, %s3735_s20  ;;  %v1931_v61 = vld [vmem:[#allocation3 + $0xa] sm:$0xff] }
 0x32c   : > { %2692 = vrot.lane.b32.xlu0 %v1746_v51, %s3737_s22  ;;  %v1686_v16 = vld [vmem:[#allocation3 + $0x90] sm:$0xff] }
 0x32d   : > { %v3612_v7 = vpop.f32.mrb[40].mxu0  ;;  %v3645_v20 = vpop.f32.mrb[20].mxu1 }
 0x32e   : > { %1628 = vst.msk [vmem:[#allocation3 + $0x48] sm:$0xff] %vm1618_vm4, %v3612_v7  ;;  %v1389_v56 = vpop.f32.mrb[41].mxu0  ;;  %1650 = vst.msk [vmem:[#allocation3 + $0xf8] sm:$0xff] %vm1618_vm4, %v3645_v20  ;;  %v1499_v21 = vpop.f32.mrb[21].mxu1  ;;  %v1677_v42 = vld [vmem:[#allocation3 + $0x20] sm:$0xff] }
 0x32f   : > { %1627 = vst.msk [vmem:[#allocation3 + $0x40] sm:$0xff] %vm1618_vm4, %v1389_v56  ;;  %1649 = vst.msk [vmem:[#allocation3 + $0xf0] sm:$0xff] %vm1618_vm4, %v1499_v21  ;;  %2560 = vrot.lane.b32.xlu1 %v1682_v9, %s3736_s21  ;;  %v1741_v62 = vld [vmem:[#allocation3 + $0x21] sm:$0xff]  ;;  %v1740_v50 = vld [vmem:[#allocation3 + $0x19] sm:$0xff] }
 0x330   : > { %2302 = vrot.lane.b32.xlu0 %v1747_v22, %s3733_s18  ;;  %v1933_v13 = vld [vmem:[#allocation3 + $0x22] sm:$0xff]  ;;  %v1932_v55 = vld [vmem:[#allocation3 + $0x1a] sm:$0xff]  ;;  %v1689_v9 = vld [vmem:[#allocation3 + $0xb0] sm:$0xff] }
 0x331   : > { %v3648_v23 = vpop.f32.mrb[22].mxu1  ;;  %v1679_v32 = vld [vmem:[#allocation3 + $0x38] sm:$0xff] }
 0x332   : > { %1652 = vst.msk [vmem:[#allocation3 + $0x108] sm:$0xff] %vm1618_vm4, %v3648_v23  ;;  %v1509_v24 = vpop.f32.mrb[23].mxu1  ;;  %v4440_v52 = vld [vmem:[#allocation3 + $0x32] sm:$0xff] }
 0x333   : > { %1651 = vst.msk [vmem:[#allocation3 + $0x100] sm:$0xff] %vm1618_vm4, %v1509_v24  ;;  %2824 = vrot.lane.b32.xlu1 %v1938_v0, %s3734_s19  ;;  %v4456_v0 = vld [vmem:[#allocation3 + $0xb2] sm:$0xff] }
 0x334   : > { %2434 = vrot.lane.b32.xlu0 %v1939_v27, %s3735_s20 }
 0x335   : > { %v3651_v28 = vpop.f32.mrb[24].mxu1  ;;  %v4631_v4 = vld [vmem:[#allocation3 + $0x48] sm:$0xff] }
 0x336   : > { %1654 = vst.msk [vmem:[#allocation3 + $0x118] sm:$0xff] %vm1618_vm4, %v3651_v28  ;;  %v1519_v33 = vpop.f32.mrb[25].mxu1  ;;  %v4471_v19 = vld [vmem:[#allocation3 + $0x39] sm:$0xff]  ;;  %5975 = vst [vmem:[#allocation46_spill] sm:$0xff] %v4631_v4 }
 0x337   : > { %1653 = vst.msk [vmem:[#allocation3 + $0x110] sm:$0xff] %vm1618_vm4, %v1519_v33  ;;  %2172 = vrot.lane.b32.xlu1 %v1684_v36, %s3731_s16 }
 0x338   : > { %2694 = vrot.lane.b32.xlu0 %v1747_v22, %s3737_s22 }
 0x339   : > { %v3654_v37 = vpop.f32.mrb[26].mxu1 }
 0x33a   : > { %1656 = vst.msk [vmem:[#allocation3 + $0x128] sm:$0xff] %vm1618_vm4, %v3654_v37  ;;  %v1529_v8 = vpop.f32.mrb[27].mxu1 }
 0x33b   : > { %1655 = vst.msk [vmem:[#allocation3 + $0x120] sm:$0xff] %vm1618_vm4, %v1529_v8  ;;  %2564 = vrot.lane.b32.xlu1 %v1684_v36, %s3736_s21 }
 0x33c   : > { %2016 = vrot.lane.b32.xlu0 %v4371_v38, %s3732_s17 }
 0x33d   : > { %v3657_v35 = vpop.f32.mrb[28].mxu1 }
 0x33e   : > { %1658 = vst.msk [vmem:[#allocation3 + $0x138] sm:$0xff] %vm1618_vm4, %v3657_v35  ;;  %v1539_v46 = vpop.f32.mrb[29].mxu1 }
 0x33f   : > { %1657 = vst.msk [vmem:[#allocation3 + $0x130] sm:$0xff] %vm1618_vm4, %v1539_v46  ;;  %1802 = vrot.lane.b32.xlu1 %v1738_v34, %s3730_s15 }
 0x340   : > { %2174 = vrot.lane.b32.xlu0 %v1685_v45, %s3731_s16 }
 0x341   : > { %v3660_v39 = vpop.f32.mrb[30].mxu1 }
 0x342   : > { %1660 = vst.msk [vmem:[#allocation3 + $0x148] sm:$0xff] %vm1618_vm4, %v3660_v39  ;;  %v1549_v58 = vpop.f32.mrb[31].mxu1 }
 0x343   : > { %1659 = vst.msk [vmem:[#allocation3 + $0x140] sm:$0xff] %vm1618_vm4, %v1549_v58  ;;  %1820 = vrot.lane.b32.xlu1 %v1747_v22, %s3730_s15  ;;  %v4480_v22 = vld [vmem:[#allocation3 + $0xb1] sm:$0xff]  ;;  %v1688_v58 = vld [vmem:[#allocation3 + $0xa8] sm:$0xff] }
 0x344   : > { %2306 = vrot.lane.b32.xlu0 %v1749_v57, %s3733_s18 }
 0x345   : > { %v3663_v40 = vpop.f32.mrb[32].mxu1 }
 0x346   : > { %1662 = vst.msk [vmem:[#allocation3 + $0x158] sm:$0xff] %vm1618_vm4, %v3663_v40  ;;  %v1559_v6 = vpop.f32.mrb[33].mxu1 }
 0x347   : > { %1661 = vst.msk [vmem:[#allocation3 + $0x150] sm:$0xff] %vm1618_vm4, %v1559_v6  ;;  %1994 = vrot.lane.b32.xlu1 %v1930_v5, %s3732_s17  ;;  %v1691_v6 = vld [vmem:[#allocation3 + $0xc8] sm:$0xff] }
 0x348   : > { %2438 = vrot.lane.b32.xlu0 %v4371_v38, %s3735_s20 }
 0x349   : > { %v3666_v18 = vpop.f32.mrb[34].mxu1 }
 0x34a   : > { %1664 = vst.msk [vmem:[#allocation3 + $0x168] sm:$0xff] %vm1618_vm4, %v3666_v18  ;;  %v1569_v17 = vpop.f32.mrb[35].mxu1 }
 0x34b   : > { %1663 = vst.msk [vmem:[#allocation3 + $0x160] sm:$0xff] %vm1618_vm4, %v1569_v17  ;;  %2012 = vrot.lane.b32.xlu1 %v1939_v27, %s3732_s17  ;;  %v1742_v17 = vld [vmem:[#allocation3 + $0x31] sm:$0xff] }
 0x34c   : > { %2566 = vrot.lane.b32.xlu0 %v1685_v45, %s3736_s21  ;;  %v4518_v45 = vld [vmem:[#allocation3 + $0xa9] sm:$0xff] }
 0x34d   : > { %v3669_v30 = vpop.f32.mrb[36].mxu1 }
 0x34e   : > { %1666 = vst.msk [vmem:[#allocation3 + $0x178] sm:$0xff] %vm1618_vm4, %v3669_v30  ;;  %v1579_v29 = vpop.f32.mrb[37].mxu1 }
 0x34f   : > { %1665 = vst.msk [vmem:[#allocation3 + $0x170] sm:$0xff] %vm1618_vm4, %v1579_v29  ;;  %2826 = vrot.lane.b32.xlu1 %v1939_v27, %s3734_s19  ;;  %v4489_v27 = vld [vmem:[#allocation3 + $0x3a] sm:$0xff] }
 0x350   : > { %2696 = vrot.lane.b32.xlu0 %v1748_v44, %s3737_s22 }
 0x351   : > { %v3672_v47 = vpop.f32.mrb[38].mxu1 }
 0x352   : > { %1668 = vst.msk [vmem:[#allocation3 + $0x188] sm:$0xff] %vm1618_vm4, %v3672_v47  ;;  %v1589_v43 = vpop.f32.mrb[39].mxu1 }
 0x353   : > { %1667 = vst.msk [vmem:[#allocation3 + $0x180] sm:$0xff] %vm1618_vm4, %v1589_v43  ;;  %2156 = vrot.lane.b32.xlu1 %v1676_v60, %s3731_s16  ;;  %v1755_v60 = vld [vmem:[#allocation3 + $0xc9] sm:$0xff] }
 0x354   : > { %2698 = vrot.lane.b32.xlu0 %v1749_v57, %s3737_s22 }
 0x355   : > { %v3675_v59 = vpop.f32.mrb[40].mxu1 }
 0x356   : > { %1670 = vst.msk [vmem:[#allocation3 + $0x198] sm:$0xff] %vm1618_vm4, %v3675_v59  ;;  %v1599_v12 = vpop.f32.mrb[41].mxu1 }
 0x357   : > { %1669 = vst.msk [vmem:[#allocation3 + $0x190] sm:$0xff] %vm1618_vm4, %v1599_v12  ;;  %1804 = vrot.lane.b32.xlu1 %v1739_v25, %s3730_s15  ;;  %v4565_v25 = vld [vmem:[#allocation3 + $0xca] sm:$0xff] }
 0x358   : > { %2178 = vrot.lane.b32.xlu0 %v1687_v11, %s3731_s16 }
 0x359   : > { %v3678_v26 = vpop.f32.mrb[42].mxu1 }
 0x35a   : > { %1672 = vst.msk [vmem:[#allocation3 + $0x1a8] sm:$0xff] %vm1618_vm4, %v3678_v26  ;;  %v1609_v41 = vpop.f32.mrb[43].mxu1 }
 0x35b   : > { %1671 = vst.msk [vmem:[#allocation3 + $0x1a0] sm:$0xff] %vm1618_vm4, %v1609_v41  ;;  %1822 = vrot.lane.b32.xlu1 %v1748_v44, %s3730_s15 }
 0x35c   : > { %2570 = vrot.lane.b32.xlu0 %v1687_v11, %s3736_s21  ;;  %v4563_v11 = vld [vmem:[#allocation3 + $0x30] sm:$0xff] }
 0x35f   : > { %1824 = vrot.lane.b32.xlu1 %v1749_v57, %s3730_s15 }
 0x360   : > { %2158 = vrot.lane.b32.xlu0 %v1677_v42, %s3731_s16 }
 0x363   : > { %1996 = vrot.lane.b32.xlu1 %v1931_v61, %s3732_s17 }
 0x364   : > { %2290 = vrot.lane.b32.xlu0 %v1741_v62, %s3733_s18 }
 0x367   : > { %2014 = vrot.lane.b32.xlu1 %v1940_v14, %s3732_s17 }
 0x368   : > { %2422 = vrot.lane.b32.xlu0 %v1933_v13, %s3735_s20 }
 0x36b   : > { %2304 = vrot.lane.b32.xlu1 %v1748_v44, %s3733_s18  ;;  %v4546_v44 = vld [vmem:[#allocation3 + $0xc1] sm:$0xff] }
 0x36c   : > { %2700 = vrot.lane.b32.xlu0 %v1750_v48, %s3737_s22 }
 0x36f   : > { %2436 = vrot.lane.b32.xlu1 %v1940_v14, %s3735_s20 }
 0x370   : > { %2162 = vrot.lane.b32.xlu0 %v1679_v32, %s3731_s16 }
 0x373   : > { %2828 = vrot.lane.b32.xlu1 %v1940_v14, %s3734_s19 }
 0x374   : > { %2554 = vrot.lane.b32.xlu0 %v1679_v32, %s3736_s21  ;;  %v4596_v32 = vld [vmem:[#allocation3 + $0xe2] sm:$0xff] }
 0x377   : > { %2830 = vrot.lane.b32.xlu1 %v4371_v38, %s3734_s19 }
 0x378   : > { %2020 = vrot.lane.b32.xlu0 %v4422_v49, %s3732_s17 }
 0x37b   : > { %1806 = vrot.lane.b32.xlu1 %v1740_v50, %s3730_s15 }
 0x37c   : > { %2310 = vrot.lane.b32.xlu0 %v4428_v53, %s3733_s18 }
 0x37f   : > { %1808 = vrot.lane.b32.xlu1 %v1741_v62, %s3730_s15 }
 0x380   : > { %2442 = vrot.lane.b32.xlu0 %v4422_v49, %s3735_s20 }
 0x381   : > { %v4436_v54 = vpop.permute.xlu1 %1816 }
 0x382   : > { %5934 = vst [vmem:[#allocation5_spill] sm:$0xff] %v4436_v54  ;;  %v4438_v31 = vpop.permute.xlu0 %2166 }
 0x383   : > { %5935 = vst [vmem:[#allocation6_spill] sm:$0xff] %v4438_v31  ;;  %1826 = vrot.lane.b32.xlu1 %v1750_v48, %s3730_s15 }
 0x384   : > { %2816 = vrot.lane.b32.xlu0 %v4440_v52, %s3734_s19 }
 0x385   : > { %v4445_v51 = vpop.permute.xlu1 %2008 }
 0x386   : > { %5936 = vst [vmem:[#allocation7_spill] sm:$0xff] %v4445_v51  ;;  %v4447_v7 = vpop.permute.xlu0 %2298  ;;  %v4835_v51 = vld [vmem:[#allocation3 + $0x129] sm:$0xff] }
 0x387   : > { %5937 = vst [vmem:[#allocation8_spill] sm:$0xff] %v4447_v7  ;;  %1998 = vrot.lane.b32.xlu1 %v1932_v55, %s3732_s17  ;;  %v4889_v7 = vld [vmem:[#allocation3 + $0x139] sm:$0xff] }
 0x388   : > { %2702 = vrot.lane.b32.xlu0 %v4428_v53, %s3737_s22 }
 0x389   : > { %v4452_v56 = vpop.permute.xlu1 %2822 }
 0x38a   : > { %5938 = vst [vmem:[#allocation9_spill] sm:$0xff] %v4452_v56  ;;  %v4454_v63 = vpop.permute.xlu0 %2430  ;;  %v4818_v56 = vld [vmem:[#allocation3 + $0x138] sm:$0xff] }
 0x38b   : > { %5939 = vst [vmem:[#allocation10_spill] sm:$0xff] %v4454_v63  ;;  %2000 = vrot.lane.b32.xlu1 %v1933_v13, %s3732_s17  ;;  %v4837_v63 = vld [vmem:[#allocation3 + $0xd8] sm:$0xff] }
 0x38c   : > { %2024 = vrot.lane.b32.xlu0 %v4456_v0, %s3732_s17  ;;  %6009 = vst [vmem:[#allocation80_spill] sm:$0xff] %v4837_v63 }
 0x38d   : > { %v4463_v2 = vpop.permute.xlu1 %1818 }
 0x38e   : > { %v4461_v1 = vpop.permute.xlu0 %2558  ;;  %5941 = vst [vmem:[#allocation12_spill] sm:$0xff] %v4463_v2 }
 0x38f   : > { %5940 = vst [vmem:[#allocation11_spill] sm:$0xff] %v4461_v1  ;;  %2018 = vrot.lane.b32.xlu1 %v1942_v3, %s3732_s17 }
 0x390   : > { %2182 = vrot.lane.b32.xlu0 %v1689_v9, %s3731_s16 }
 0x391   : > { %v4469_v15 = vpop.permute.xlu1 %2010 }
 0x392   : > { %v4467_v10 = vpop.permute.xlu0 %2690  ;;  %5943 = vst [vmem:[#allocation14_spill] sm:$0xff] %v4469_v15  ;;  %v4799_v15 = vld [vmem:[#allocation3 + $0x121] sm:$0xff] }
 0x393   : > { %5942 = vst [vmem:[#allocation13_spill] sm:$0xff] %v4467_v10  ;;  %2176 = vrot.lane.b32.xlu1 %v1686_v16, %s3731_s16  ;;  %v4863_v10 = vld [vmem:[#allocation3 + $0x140] sm:$0xff] }
 0x394   : > { %2294 = vrot.lane.b32.xlu0 %v4471_v19, %s3733_s18 }
 0x395   : > { %v4478_v21 = vpop.permute.xlu1 %2168 }
 0x396   : > { %v4476_v20 = vpop.permute.xlu0 %2170  ;;  %5945 = vst [vmem:[#allocation16_spill] sm:$0xff] %v4478_v21 }
 0x397   : > { %5944 = vst [vmem:[#allocation15_spill] sm:$0xff] %v4476_v20  ;;  %2288 = vrot.lane.b32.xlu1 %v1740_v50, %s3733_s18  ;;  %v4791_v20 = vld [vmem:[#allocation3 + $0xc0] sm:$0xff] }
 0x398   : > { %2314 = vrot.lane.b32.xlu0 %v4480_v22, %s3733_s18  ;;  %6000 = vst [vmem:[#allocation71_spill] sm:$0xff] %v4791_v20 }
 0x399   : > { %v4487_v24 = vpop.permute.xlu1 %2300 }
 0x39a   : > { %v4485_v23 = vpop.permute.xlu0 %2562  ;;  %5947 = vst [vmem:[#allocation18_spill] sm:$0xff] %v4487_v24 }
 0x39b   : > { %5946 = vst [vmem:[#allocation17_spill] sm:$0xff] %v4485_v23  ;;  %2308 = vrot.lane.b32.xlu1 %v1750_v48, %s3733_s18 }
 0x39c   : > { %2426 = vrot.lane.b32.xlu0 %v4489_v27, %s3735_s20 }
 0x39d   : > { %v4496_v33 = vpop.permute.xlu1 %2432 }
 0x39e   : > { %v4494_v28 = vpop.permute.xlu0 %2692  ;;  %5949 = vst [vmem:[#allocation20_spill] sm:$0xff] %v4496_v33 }
 0x39f   : > { %5948 = vst [vmem:[#allocation19_spill] sm:$0xff] %v4494_v28  ;;  %2420 = vrot.lane.b32.xlu1 %v1932_v55, %s3735_s20  ;;  %v4809_v28 = vld [vmem:[#allocation3 + $0x122] sm:$0xff] }
 0x3a0   : > { %2446 = vrot.lane.b32.xlu0 %v4456_v0, %s3735_s20 }
 0x3a1   : > { %v4501_v36 = vpop.permute.xlu1 %2560 }
 0x3a2   : > { %5950 = vst [vmem:[#allocation21_spill] sm:$0xff] %v4501_v36  ;;  %v4503_v37 = vpop.permute.xlu0 %2302  ;;  %v4853_v36 = vld [vmem:[#allocation3 + $0x142] sm:$0xff] }
 0x3a3   : > { %5951 = vst [vmem:[#allocation22_spill] sm:$0xff] %v4503_v37  ;;  %2440 = vrot.lane.b32.xlu1 %v1942_v3, %s3735_s20 }
 0x3a4   : > { %2574 = vrot.lane.b32.xlu0 %v1689_v9, %s3736_s21  ;;  %v1744_v9 = vld [vmem:[#allocation3 + $0x49] sm:$0xff] }
 0x3a5   : > { %v4507_v8 = vpop.permute.xlu1 %2824 }
 0x3a6   : > { %5952 = vst [vmem:[#allocation23_spill] sm:$0xff] %v4507_v8  ;;  %v4509_v38 = vpop.permute.xlu0 %2434 }
 0x3a7   : > { %5953 = vst [vmem:[#allocation24_spill] sm:$0xff] %v4509_v38  ;;  %2568 = vrot.lane.b32.xlu1 %v1686_v16, %s3736_s21  ;;  %v4615_v16 = vld [vmem:[#allocation3 + $0xe1] sm:$0xff] }
 0x3a8   : > { %2686 = vrot.lane.b32.xlu0 %v4471_v19, %s3737_s22 }
 0x3a9   : > { %v4514_v35 = vpop.permute.xlu1 %2172 }
 0x3aa   : > { %5954 = vst [vmem:[#allocation25_spill] sm:$0xff] %v4514_v35  ;;  %v4516_v46 = vpop.permute.xlu0 %2694  ;;  %v4762_v35 = vld [vmem:[#allocation3 + $0x109] sm:$0xff] }
 0x3ab   : > { %5955 = vst [vmem:[#allocation26_spill] sm:$0xff] %v4516_v46  ;;  %2832 = vrot.lane.b32.xlu1 %v1942_v3, %s3734_s19  ;;  %v4745_v46 = vld [vmem:[#allocation3 + $0x111] sm:$0xff] }
 0x3ac   : > { %2704 = vrot.lane.b32.xlu0 %v4518_v45, %s3737_s22 }
 0x3ad   : > { %v4523_v34 = vpop.permute.xlu1 %2564 }
 0x3ae   : > { %5956 = vst [vmem:[#allocation27_spill] sm:$0xff] %v4523_v34  ;;  %v4525_v39 = vpop.permute.xlu0 %2016 }
 0x3af   : > { %5957 = vst [vmem:[#allocation28_spill] sm:$0xff] %v4525_v39  ;;  %2180 = vrot.lane.b32.xlu1 %v1688_v58, %s3731_s16  ;;  %v4650_v39 = vld [vmem:[#allocation3 + $0xda] sm:$0xff] }
 0x3b0   : > { %2706 = vrot.lane.b32.xlu0 %v4480_v22, %s3737_s22 }
 0x3b1   : > { %v4532_v40 = vpop.permute.xlu1 %1802 }
 0x3b2   : > { %v4530_v57 = vpop.permute.xlu0 %2174 }
 0x3b3   : > { %5958 = vst [vmem:[#allocation29_spill] sm:$0xff] %v4530_v57  ;;  %2572 = vrot.lane.b32.xlu1 %v1688_v58, %s3736_s21  ;;  %v1944_v57 = vld [vmem:[#allocation3 + $0xaa] sm:$0xff] }
 0x3b4   : > { %2186 = vrot.lane.b32.xlu0 %v1691_v6, %s3731_s16 }
 0x3b5   : > { %v4538_v18 = vpop.permute.xlu1 %1820 }
 0x3b6   : > { %v4536_v5 = vpop.permute.xlu0 %2306  ;;  %5960 = vst [vmem:[#allocation31_spill] sm:$0xff] %v4538_v18  ;;  %v4826_v18 = vld [vmem:[#allocation3 + $0x12a] sm:$0xff] }
 0x3b7   : > { %5959 = vst [vmem:[#allocation30_spill] sm:$0xff] %v4536_v5  ;;  %1810 = vrot.lane.b32.xlu1 %v1742_v17, %s3730_s15  ;;  %v4676_v5 = vld [vmem:[#allocation3 + $0xf1] sm:$0xff] }
 0x3b8   : > { %2578 = vrot.lane.b32.xlu0 %v1691_v6, %s3736_s21 }
 0x3b9   : > { %v4544_v29 = vpop.permute.xlu1 %1994 }
 0x3ba   : > { %v4542_v30 = vpop.permute.xlu0 %2438 }
 0x3bb   : > { %5961 = vst [vmem:[#allocation32_spill] sm:$0xff] %v4542_v30  ;;  %1828 = vrot.lane.b32.xlu1 %v4428_v53, %s3730_s15 }
 0x3bc   : > { %2708 = vrot.lane.b32.xlu0 %v4546_v44, %s3737_s22 }
 0x3bd   : > { %v4554_v43 = vpop.permute.xlu1 %2012 }
 0x3be   : > { %v4552_v47 = vpop.permute.xlu0 %2566  ;;  %5963 = vst [vmem:[#allocation34_spill] sm:$0xff] %v4554_v43  ;;  %v1946_v43 = vld [vmem:[#allocation3 + $0xc2] sm:$0xff] }
 0x3bf   : > { %5962 = vst [vmem:[#allocation33_spill] sm:$0xff] %v4552_v47  ;;  %2002 = vrot.lane.b32.xlu1 %v4440_v52, %s3732_s17 }
 0x3c0   : > { %1836 = vrot.lane.b32.xlu0 %v1755_v60, %s3730_s15 }
 0x3c1   : > { %v4561_v12 = vpop.permute.xlu1 %2826 }
 0x3c2   : > { %v4559_v59 = vpop.permute.xlu0 %2696  ;;  %5965 = vst [vmem:[#allocation36_spill] sm:$0xff] %v4561_v12  ;;  %v4685_v12 = vld [vmem:[#allocation3 + $0xf2] sm:$0xff] }
 0x3c3   : > { %5964 = vst [vmem:[#allocation35_spill] sm:$0xff] %v4559_v59  ;;  %2160 = vrot.lane.b32.xlu1 %v4563_v11, %s3731_s16  ;;  %v4703_v59 = vld [vmem:[#allocation3 + $0xfa] sm:$0xff] }
 0x3c4   : > { %2028 = vrot.lane.b32.xlu0 %v4565_v25, %s3732_s17 }
 0x3c5   : > { %v4573_v41 = vpop.permute.xlu1 %2156 }
 0x3c6   : > { %v4571_v26 = vpop.permute.xlu0 %2698 }
 0x3c7   : > { %5966 = vst [vmem:[#allocation37_spill] sm:$0xff] %v4571_v26  ;;  %2292 = vrot.lane.b32.xlu1 %v1742_v17, %s3733_s18 }
 0x3c8   : > { %2318 = vrot.lane.b32.xlu0 %v1755_v60, %s3733_s18 }
 0x3c9   : > { %v4579_v61 = vpop.permute.xlu1 %1804 }
 0x3ca   : > { %v4577_v42 = vpop.permute.xlu0 %2178 }
 0x3cb   : > { %5967 = vst [vmem:[#allocation38_spill] sm:$0xff] %v4577_v42  ;;  %2424 = vrot.lane.b32.xlu1 %v4440_v52, %s3735_s20  ;;  %v4605_v52 = vld [vmem:[#allocation3 + $0xe0] sm:$0xff] }
 0x3cc   : > { %2450 = vrot.lane.b32.xlu0 %v4565_v25, %s3735_s20 }
 0x3cd   : > { %v4587_v14 = vpop.permute.xlu1 %1822 }
 0x3ce   : > { %v4585_v62 = vpop.permute.xlu0 %2570  ;;  %5969 = vst [vmem:[#allocation40_spill] sm:$0xff] %v4587_v14  ;;  %v4659_v14 = vld [vmem:[#allocation3 + $0xf8] sm:$0xff] }
 0x3cf   : > { %5968 = vst [vmem:[#allocation39_spill] sm:$0xff] %v4585_v62  ;;  %2552 = vrot.lane.b32.xlu1 %v4563_v11, %s3736_s21 }
 0x3d0   : > { %2710 = vrot.lane.b32.xlu0 %v1755_v60, %s3737_s22 }
 0x3d1   : > { %v4592_v13 = vpop.permute.xlu1 %1824 }
 0x3d2   : > { %5970 = vst [vmem:[#allocation41_spill] sm:$0xff] %v4592_v13  ;;  %v4594_v48 = vpop.permute.xlu0 %2158 }
 0x3d3   : > { %2684 = vrot.lane.b32.xlu1 %v1742_v17, %s3737_s22 }
 0x3d4   : > { %2032 = vrot.lane.b32.xlu0 %v4596_v32, %s3732_s17 }
 0x3d5   : > { %v4601_v50 = vpop.permute.xlu1 %1996 }
 0x3d6   : > { %v4603_v53 = vpop.permute.xlu0 %2290 }
 0x3d7   : > { %2834 = vrot.lane.b32.xlu1 %v4422_v49, %s3734_s19  ;;  %v1936_v49 = vld [vmem:[#allocation3 + $0x4a] sm:$0xff] }
 0x3d8   : > { %2190 = vrot.lane.b32.xlu0 %v4605_v52, %s3731_s16 }
 0x3d9   : > { %v4611_v55 = vpop.permute.xlu1 %2014 }
 0x3da   : > { %5971 = vst [vmem:[#allocation42_spill] sm:$0xff] %v4611_v55  ;;  %v4613_v3 = vpop.permute.xlu0 %2422 }
 0x3db   : > { %1814 = vrot.lane.b32.xlu1 %v1744_v9, %s3730_s15 }
 0x3dc   : > { %2322 = vrot.lane.b32.xlu0 %v4615_v16, %s3733_s18 }
 0x3dd   : > { %v4620_v58 = vpop.permute.xlu1 %2304 }
 0x3de   : > { %5972 = vst [vmem:[#allocation43_spill] sm:$0xff] %v4620_v58  ;;  %v4622_v6 = vpop.permute.xlu0 %2700 }
 0x3df   : > { %5973 = vst [vmem:[#allocation44_spill] sm:$0xff] %v4622_v6  ;;  %2006 = vrot.lane.b32.xlu1 %v1936_v49, %s3732_s17  ;;  %v4641_v6 = vld [vmem:[#allocation3 + $0xd9] sm:$0xff] }
 0x3e0   : > { %2454 = vrot.lane.b32.xlu0 %v4596_v32, %s3735_s20 }
 0x3e1   : > { %v4627_v17 = vpop.permute.xlu1 %2436 }
 0x3e2   : > { %5974 = vst [vmem:[#allocation45_spill] sm:$0xff] %v4627_v17  ;;  %v4629_v60 = vpop.permute.xlu0 %2162 }
 0x3e3   : > { %2164 = vrot.lane.b32.xlu1 %v4631_v4, %s3731_s16 }
 0x3e4   : > { %2582 = vrot.lane.b32.xlu0 %v4605_v52, %s3736_s21 }
 0x3e5   : > { %v4637_v42 = vpop.permute.xlu1 %2828 }
 0x3e6   : > { %5976 = vst [vmem:[#allocation47_spill] sm:$0xff] %v4637_v42  ;;  %v4639_v62 = vpop.permute.xlu0 %2554 }
 0x3e7   : > { %5977 = vst [vmem:[#allocation48_spill] sm:$0xff] %v4639_v62  ;;  %2296 = vrot.lane.b32.xlu1 %v1744_v9, %s3733_s18  ;;  %v5063_v62 = vld [vmem:[#allocation3 + $0x182] sm:$0xff] }
 0x3e8   : > { %2712 = vrot.lane.b32.xlu0 %v4641_v6, %s3737_s22 }
 0x3e9   : > { %v4646_v55 = vpop.permute.xlu1 %2830 }
 0x3ea   : > { %5978 = vst [vmem:[#allocation49_spill] sm:$0xff] %v4646_v55  ;;  %v4648_v30 = vpop.permute.xlu0 %2020 }
 0x3eb   : > { %5979 = vst [vmem:[#allocation50_spill] sm:$0xff] %v4648_v30  ;;  %2428 = vrot.lane.b32.xlu1 %v1936_v49, %s3735_s20  ;;  %v4667_v30 = vld [vmem:[#allocation3 + $0xf0] sm:$0xff] }
 0x3ec   : > { %2844 = vrot.lane.b32.xlu0 %v4650_v39, %s3734_s19 }
 0x3ed   : > { %v4655_v26 = vpop.permute.xlu1 %1806 }
 0x3ee   : > { %v4657_v42 = vpop.permute.xlu0 %2310 }
 0x3ef   : > { %5980 = vst [vmem:[#allocation51_spill] sm:$0xff] %v4657_v42  ;;  %2556 = vrot.lane.b32.xlu1 %v4631_v4, %s3736_s21 }
 0x3f0   : > { %2194 = vrot.lane.b32.xlu0 %v4659_v14, %s3731_s16 }
 0x3f1   : > { %v4665_v55 = vpop.permute.xlu1 %1808 }
 0x3f2   : > { %v4669_v47 = vpop.permute.xlu0 %2442 }
 0x3f3   : > { %5981 = vst [vmem:[#allocation52_spill] sm:$0xff] %v4669_v47  ;;  %2688 = vrot.lane.b32.xlu1 %v1744_v9, %s3737_s22  ;;  %v4693_v47 = vld [vmem:[#allocation3 + $0x108] sm:$0xff] }
 0x3f4   : > { %2584 = vrot.lane.b32.xlu0 %v4667_v30, %s3736_s21 }
 0x3f5   : > { %v4674_v42 = vpop.permute.xlu1 %1826 }
 0x3f6   : > { %5982 = vst [vmem:[#allocation53_spill] sm:$0xff] %v4674_v42  ;;  %v4681_v13 = vpop.permute.xlu0 %2816 }
 0x3f7   : > { %2820 = vrot.lane.b32.xlu1 %v1936_v49, %s3734_s19  ;;  %5983 = vst [vmem:[#allocation54_spill] sm:$0xff] %v4681_v13 }
 0x3f8   : > { %2716 = vrot.lane.b32.xlu0 %v4676_v5, %s3737_s22 }
 0x3f9   : > { %v4683_v38 = vpop.permute.xlu1 %1998 }
 0x3fa   : > { %v4695_v49 = vpop.permute.xlu0 %2702 }
 0x3fb   : > { %1812 = vrot.lane.b32.xlu1 %v4471_v19, %s3730_s15  ;;  %5984 = vst [vmem:[#allocation55_spill] sm:$0xff] %v4695_v49  ;;  %v4713_v49 = vld [vmem:[#allocation3 + $0xf9] sm:$0xff] }
 0x3fc   : > { %2848 = vrot.lane.b32.xlu0 %v4685_v12, %s3734_s19 }
 0x3fd   : > { %v4691_v9 = vpop.permute.xlu1 %2000 }
 0x3fe   : > { %v4709_v19 = vpop.permute.xlu0 %2024 }
 0x3ff   : > { %1830 = vrot.lane.b32.xlu1 %v4518_v45, %s3730_s15  ;;  %5986 = vst [vmem:[#allocation57_spill] sm:$0xff] %v4709_v19  ;;  %v4728_v19 = vld [vmem:[#allocation3 + $0x112] sm:$0xff] }
 0x400   : > { %2588 = vrot.lane.b32.xlu0 %v4693_v47, %s3736_s21 }
 0x401   : > { %v4701_v42 = vpop.permute.xlu1 %2018 }
 0x402   : > { %5985 = vst [vmem:[#allocation56_spill] sm:$0xff] %v4701_v42  ;;  %v4721_v37 = vpop.permute.xlu0 %2182 }
 0x403   : > { %1832 = vrot.lane.b32.xlu1 %v4480_v22, %s3730_s15  ;;  %5988 = vst [vmem:[#allocation59_spill] sm:$0xff] %v4721_v37  ;;  %v4738_v37 = vld [vmem:[#allocation3 + $0x110] sm:$0xff] }
 0x404   : > { %2036 = vrot.lane.b32.xlu0 %v4703_v59, %s3732_s17 }
 0x405   : > { %v4711_v17 = vpop.permute.xlu1 %2176 }
 0x406   : > { %5987 = vst [vmem:[#allocation58_spill] sm:$0xff] %v4711_v17  ;;  %v4734_v17 = vpop.permute.xlu0 %2294 }
 0x407   : > { %2004 = vrot.lane.b32.xlu1 %v4489_v27, %s3732_s17  ;;  %5990 = vst [vmem:[#allocation61_spill] sm:$0xff] %v4734_v17 }
 0x408   : > { %2326 = vrot.lane.b32.xlu0 %v4713_v49, %s3733_s18 }
 0x409   : > { %v4719_v42 = vpop.permute.xlu1 %2288 }
 0x40a   : > { %v4747_v8 = vpop.permute.xlu0 %2314 }
 0x40b   : > { %2022 = vrot.lane.b32.xlu1 %v1944_v57, %s3732_s17  ;;  %5992 = vst [vmem:[#allocation63_spill] sm:$0xff] %v4747_v8  ;;  %v4770_v8 = vld [vmem:[#allocation3 + $0x10a] sm:$0xff] }
 0x40c   : > { %2458 = vrot.lane.b32.xlu0 %v4703_v59, %s3735_s20 }
 0x40d   : > { %v4726_v22 = vpop.permute.xlu1 %2308 }
 0x40e   : > { %5989 = vst [vmem:[#allocation60_spill] sm:$0xff] %v4726_v22  ;;  %v4758_v34 = vpop.permute.xlu0 %2426 }
 0x40f   : > { %2312 = vrot.lane.b32.xlu1 %v4518_v45, %s3733_s18  ;;  %5994 = vst [vmem:[#allocation65_spill] sm:$0xff] %v4758_v34 }
 0x410   : > { %2040 = vrot.lane.b32.xlu0 %v4728_v19, %s3732_s17 }
 0x411   : > { %v4736_v58 = vpop.permute.xlu1 %2420 }
 0x413   : > { %2444 = vrot.lane.b32.xlu1 %v1944_v57, %s3735_s20 }
 0x414   : > { %2198 = vrot.lane.b32.xlu0 %v4738_v37, %s3731_s16 }
 0x415   : > { %v4743_v22 = vpop.permute.xlu1 %2440 }
 0x416   : > { %5991 = vst [vmem:[#allocation62_spill] sm:$0xff] %v4743_v22 }
 0x417   : > { %2818 = vrot.lane.b32.xlu1 %v4489_v27, %s3734_s19 }
 0x418   : > { %2330 = vrot.lane.b32.xlu0 %v4745_v46, %s3733_s18 }
 0x419   : > { %v4753_v45 = vpop.permute.xlu1 %2568 }
 0x41a   : > { %5993 = vst [vmem:[#allocation64_spill] sm:$0xff] %v4753_v45  ;;  %v4772_v45 = vpop.permute.xlu0 %2446 }
 0x41b   : > { %2836 = vrot.lane.b32.xlu1 %v1944_v57, %s3734_s19  ;;  %5997 = vst [vmem:[#allocation68_spill] sm:$0xff] %v4772_v45  ;;  %v4789_v45 = vld [vmem:[#allocation3 + $0x120] sm:$0xff] }
 0x41c   : > { %2462 = vrot.lane.b32.xlu0 %v4728_v19, %s3735_s20 }
 0x41d   : > { %v4760_v22 = vpop.permute.xlu1 %2832 }
 0x41e   : > { %5995 = vst [vmem:[#allocation66_spill] sm:$0xff] %v4760_v22  ;;  %v4780_v22 = vld [vmem:[#allocation3 + $0x128] sm:$0xff] }
 0x41f   : > { %2838 = vrot.lane.b32.xlu1 %v4456_v0, %s3734_s19  ;;  %v4785_v0 = vpop.permute.xlu0 %2574 }
 0x420   : > { %2720 = vrot.lane.b32.xlu0 %v4762_v35, %s3737_s22  ;;  %5999 = vst [vmem:[#allocation70_spill] sm:$0xff] %v4785_v0 }
 0x421   : > { %v4768_v27 = vpop.permute.xlu1 %2180 }
 0x422   : > { %5996 = vst [vmem:[#allocation67_spill] sm:$0xff] %v4768_v27 }
 0x423   : > { %1834 = vrot.lane.b32.xlu1 %v4546_v44, %s3730_s15  ;;  %v4801_v23 = vpop.permute.xlu0 %2686 }
 0x424   : > { %2852 = vrot.lane.b32.xlu0 %v4770_v8, %s3734_s19  ;;  %6002 = vst [vmem:[#allocation73_spill] sm:$0xff] %v4801_v23 }
 0x425   : > { %v4778_v57 = vpop.permute.xlu1 %2572 }
 0x426   : > { %5998 = vst [vmem:[#allocation69_spill] sm:$0xff] %v4778_v57 }
 0x427   : > { %2026 = vrot.lane.b32.xlu1 %v1946_v43, %s3732_s17 }
 0x428   : > { %2202 = vrot.lane.b32.xlu0 %v4780_v22, %s3731_s16 }
 0x429   : > { %v4787_v27 = vpop.permute.xlu1 %1810 }
 0x42b   : > { %2184 = vrot.lane.b32.xlu1 %v4791_v20, %s3731_s16 }
 0x42c   : > { %2592 = vrot.lane.b32.xlu0 %v4789_v45, %s3736_s21 }
 0x42d   : > { %v4797_v57 = vpop.permute.xlu1 %1828 }
 0x42e   : > { %6001 = vst [vmem:[#allocation72_spill] sm:$0xff] %v4797_v57  ;;  %v4814_v57 = vpop.permute.xlu0 %2704 }
 0x42f   : > { %2316 = vrot.lane.b32.xlu1 %v4546_v44, %s3733_s18  ;;  %6004 = vst [vmem:[#allocation75_spill] sm:$0xff] %v4814_v57 }
 0x430   : > { %2724 = vrot.lane.b32.xlu0 %v4799_v15, %s3737_s22 }
 0x431   : > { %v4807_v0 = vpop.permute.xlu1 %2002 }
 0x432   : > { %6003 = vst [vmem:[#allocation74_spill] sm:$0xff] %v4807_v0  ;;  %v4828_v2 = vpop.permute.xlu0 %2706 }
 0x433   : > { %2448 = vrot.lane.b32.xlu1 %v1946_v43, %s3735_s20  ;;  %6007 = vst [vmem:[#allocation78_spill] sm:$0xff] %v4828_v2 }
 0x434   : > { %2856 = vrot.lane.b32.xlu0 %v4809_v28, %s3734_s19 }
 0x435   : > { %v4816_v33 = vpop.permute.xlu1 %2160 }
 0x436   : > { %6005 = vst [vmem:[#allocation76_spill] sm:$0xff] %v4816_v33 }
 0x437   : > { %2576 = vrot.lane.b32.xlu1 %v4791_v20, %s3736_s21  ;;  %v4843_v20 = vpop.permute.xlu0 %2186 }
 0x438   : > { %2596 = vrot.lane.b32.xlu0 %v4818_v56, %s3736_s21  ;;  %6010 = vst [vmem:[#allocation81_spill] sm:$0xff] %v4843_v20 }
 0x439   : > { %v4824_v44 = vpop.permute.xlu1 %2292 }
 0x43a   : > { %6006 = vst [vmem:[#allocation77_spill] sm:$0xff] %v4824_v44  ;;  %v4963_v44 = vld [vmem:[#allocation3 + $0x159] sm:$0xff] }
 0x43b   : > { %2840 = vrot.lane.b32.xlu1 %v1946_v43, %s3734_s19  ;;  %v4855_v24 = vpop.permute.xlu0 %2578 }
 0x43c   : > { %2044 = vrot.lane.b32.xlu0 %v4826_v18, %s3732_s17  ;;  %6013 = vst [vmem:[#allocation84_spill] sm:$0xff] %v4855_v24  ;;  %v4873_v24 = vld [vmem:[#allocation3 + $0x141] sm:$0xff] }
 0x43d   : > { %v4833_v57 = vpop.permute.xlu1 %2424 }
 0x43e   : > { %6008 = vst [vmem:[#allocation79_spill] sm:$0xff] %v4833_v57  ;;  %v4907_v57 = vld [vmem:[#allocation3 + $0x158] sm:$0xff] }
 0x43f   : > { %2188 = vrot.lane.b32.xlu1 %v4837_v63, %s3731_s16 }
 0x440   : > { %2334 = vrot.lane.b32.xlu0 %v4835_v51, %s3733_s18 }
 0x441   : > { %v4845_v2 = vpop.permute.xlu1 %2552 }
 0x442   : > { %6011 = vst [vmem:[#allocation82_spill] sm:$0xff] %v4845_v2 }
 0x443   : > { %2580 = vrot.lane.b32.xlu1 %v4837_v63, %s3736_s21  ;;  %v4869_v63 = vpop.permute.xlu0 %2708 }
 0x444   : > { %2466 = vrot.lane.b32.xlu0 %v4826_v18, %s3735_s20  ;;  %6015 = vst [vmem:[#allocation86_spill] sm:$0xff] %v4869_v63 }
 0x445   : > { %v4851_v43 = vpop.permute.xlu1 %2684 }
 0x446   : > { %6012 = vst [vmem:[#allocation83_spill] sm:$0xff] %v4851_v43 }
 0x447   : > { %2842 = vrot.lane.b32.xlu1 %v4565_v25, %s3734_s19 }
 0x448   : > { %2048 = vrot.lane.b32.xlu0 %v4853_v36, %s3732_s17 }
 0x449   : > { %v4861_v20 = vpop.permute.xlu1 %2834 }
 0x44a   : > { %6014 = vst [vmem:[#allocation85_spill] sm:$0xff] %v4861_v20  ;;  %v4881_v20 = vpop.permute.xlu0 %1836 }
 0x44b   : > { %1838 = vrot.lane.b32.xlu1 %v4641_v6, %s3730_s15  ;;  %6018 = vst [vmem:[#allocation89_spill] sm:$0xff] %v4881_v20  ;;  %v4899_v20 = vld [vmem:[#allocation3 + $0x13a] sm:$0xff] }
 0x44c   : > { %2206 = vrot.lane.b32.xlu0 %v4863_v10, %s3731_s16 }
 0x44d   : > { %v4871_v54 = vpop.permute.xlu1 %1814 }
 0x44e   : > { %6016 = vst [vmem:[#allocation87_spill] sm:$0xff] %v4871_v54  ;;  %v4895_v21 = vpop.permute.xlu0 %2028 }
 0x44f   : > { %1840 = vrot.lane.b32.xlu1 %v4615_v16, %s3730_s15  ;;  %6020 = vst [vmem:[#allocation91_spill] sm:$0xff] %v4895_v21  ;;  %v4917_v21 = vld [vmem:[#allocation3 + $0x150] sm:$0xff] }
 0x450   : > { %2338 = vrot.lane.b32.xlu0 %v4873_v24, %s3733_s18 }
 0x451   : > { %v4879_v25 = vpop.permute.xlu1 %2006 }
 0x452   : > { %6017 = vst [vmem:[#allocation88_spill] sm:$0xff] %v4879_v25  ;;  %v4909_v31 = vpop.permute.xlu0 %2318  ;;  %v4981_v25 = vld [vmem:[#allocation3 + $0x172] sm:$0xff] }
 0x453   : > { %2030 = vrot.lane.b32.xlu1 %v4650_v39, %s3732_s17  ;;  %6023 = vst [vmem:[#allocation94_spill] sm:$0xff] %v4909_v31  ;;  %v4927_v31 = vld [vmem:[#allocation3 + $0x151] sm:$0xff] }
 0x454   : > { %2470 = vrot.lane.b32.xlu0 %v4853_v36, %s3735_s20 }
 0x455   : > { %v4887_v63 = vpop.permute.xlu1 %2164 }
 0x456   : > { %6019 = vst [vmem:[#allocation90_spill] sm:$0xff] %v4887_v63 }
 0x457   : > { %2320 = vrot.lane.b32.xlu1 %v4641_v6, %s3733_s18 }
 0x458   : > { %2728 = vrot.lane.b32.xlu0 %v4889_v7, %s3737_s22 }
 0x459   : > { %v4897_v13 = vpop.permute.xlu1 %2296 }
 0x45a   : > { %6021 = vst [vmem:[#allocation92_spill] sm:$0xff] %v4897_v13 }
 0x45b   : > { %2452 = vrot.lane.b32.xlu1 %v4650_v39, %s3735_s20  ;;  %v4923_v39 = vpop.permute.xlu0 %2450 }
 0x45c   : > { %2860 = vrot.lane.b32.xlu0 %v4899_v20, %s3734_s19  ;;  %6025 = vst [vmem:[#allocation96_spill] sm:$0xff] %v4923_v39  ;;  %v4945_v39 = vld [vmem:[#allocation3 + $0x168] sm:$0xff] }
 0x45d   : > { %v4905_v1 = vpop.permute.xlu1 %2428 }
 0x45e   : > { %6022 = vst [vmem:[#allocation93_spill] sm:$0xff] %v4905_v1 }
 0x45f   : > { %2714 = vrot.lane.b32.xlu1 %v4615_v16, %s3737_s22  ;;  %v4937_v13 = vpop.permute.xlu0 %2710 }
 0x460   : > { %2210 = vrot.lane.b32.xlu0 %v4907_v57, %s3731_s16  ;;  %6028 = vst [vmem:[#allocation99_spill] sm:$0xff] %v4937_v13  ;;  %v4955_v13 = vld [vmem:[#allocation3 + $0x15a] sm:$0xff] }
 0x461   : > { %v4915_v6 = vpop.permute.xlu1 %2556 }
 0x462   : > { %6024 = vst [vmem:[#allocation95_spill] sm:$0xff] %v4915_v6  ;;  %v4935_v6 = vld [vmem:[#allocation3 + $0x152] sm:$0xff] }
 0x463   : > { %2846 = vrot.lane.b32.xlu1 %v4596_v32, %s3734_s19 }
 0x464   : > { %2600 = vrot.lane.b32.xlu0 %v4917_v21, %s3736_s21 }
 0x465   : > { %v4925_v1 = vpop.permute.xlu1 %2688 }
 0x466   : > { %6026 = vst [vmem:[#allocation97_spill] sm:$0xff] %v4925_v1 }
 0x467   : > { %2586 = vrot.lane.b32.xlu1 %v4659_v14, %s3736_s21 }
 0x468   : > { %2732 = vrot.lane.b32.xlu0 %v4927_v31, %s3737_s22 }
 0x469   : > { %v4933_v16 = vpop.permute.xlu1 %2820 }
 0x46a   : > { %6027 = vst [vmem:[#allocation98_spill] sm:$0xff] %v4933_v16  ;;  %v4951_v16 = vpop.permute.xlu0 %2032 }
 0x46b   : > { %1842 = vrot.lane.b32.xlu1 %v4676_v5, %s3730_s15 }
 0x46c   : > { %2864 = vrot.lane.b32.xlu0 %v4935_v6, %s3734_s19 }
 0x46d   : > { %v4943_v32 = vpop.permute.xlu1 %1812 }
 0x46e   : > { %v4965_v23 = vpop.permute.xlu0 %2190 }
 0x46f   : > { %2034 = vrot.lane.b32.xlu1 %v4685_v12, %s3732_s17  ;;  %6031 = vst [vmem:[#allocation102_spill] sm:$0xff] %v4965_v23  ;;  %v4989_v23 = vld [vmem:[#allocation3 + $0x170] sm:$0xff] }
 0x470   : > { %2604 = vrot.lane.b32.xlu0 %v4945_v39, %s3736_s21 }
 0x471   : > { %v4953_v1 = vpop.permute.xlu1 %1830 }
 0x472   : > { %6029 = vst [vmem:[#allocation100_spill] sm:$0xff] %v4953_v1 }
 0x473   : > { %2192 = vrot.lane.b32.xlu1 %v4667_v30, %s3731_s16  ;;  %v4977_v30 = vpop.permute.xlu0 %2322 }
 0x474   : > { %2052 = vrot.lane.b32.xlu0 %v4955_v13, %s3732_s17  ;;  %6033 = vst [vmem:[#allocation104_spill] sm:$0xff] %v4977_v30  ;;  %v4999_v30 = vld [vmem:[#allocation3 + $0x171] sm:$0xff] }
 0x475   : > { %v4961_v63 = vpop.permute.xlu1 %1832 }
 0x476   : > { %6030 = vst [vmem:[#allocation101_spill] sm:$0xff] %v4961_v63 }
 0x477   : > { %2324 = vrot.lane.b32.xlu1 %v4676_v5, %s3733_s18  ;;  %v4991_v43 = vpop.permute.xlu0 %2454 }
 0x478   : > { %2342 = vrot.lane.b32.xlu0 %v4963_v44, %s3733_s18  ;;  %6036 = vst [vmem:[#allocation107_spill] sm:$0xff] %v4991_v43 }
 0x479   : > { %v4971_v1 = vpop.permute.xlu1 %2004 }
 0x47a   : > { %6032 = vst [vmem:[#allocation103_spill] sm:$0xff] %v4971_v1 }
 0x47b   : > { %2456 = vrot.lane.b32.xlu1 %v4685_v12, %s3735_s20 }
 0x47c   : > { %2474 = vrot.lane.b32.xlu0 %v4955_v13, %s3735_s20 }
 0x47d   : > { %v4979_v63 = vpop.permute.xlu1 %2022 }
 0x47e   : > { %6034 = vst [vmem:[#allocation105_spill] sm:$0xff] %v4979_v63  ;;  %v5005_v63 = vpop.permute.xlu0 %2582 }
 0x47f   : > { %2196 = vrot.lane.b32.xlu1 %v4693_v47, %s3731_s16  ;;  %6038 = vst [vmem:[#allocation109_spill] sm:$0xff] %v5005_v63  ;;  %v5025_v63 = vld [vmem:[#allocation3 + $0x16a] sm:$0xff] }
 0x480   : > { %2056 = vrot.lane.b32.xlu0 %v4981_v25, %s3732_s17 }
 0x481   : > { %v4987_v5 = vpop.permute.xlu1 %2312 }
 0x482   : > { %6035 = vst [vmem:[#allocation106_spill] sm:$0xff] %v4987_v5  ;;  %v5017_v34 = vpop.permute.xlu0 %2712 }
 0x483   : > { %1844 = vrot.lane.b32.xlu1 %v4713_v49, %s3730_s15  ;;  %6041 = vst [vmem:[#allocation112_spill] sm:$0xff] %v5017_v34  ;;  %v5035_v34 = vld [vmem:[#allocation3 + $0x188] sm:$0xff] }
 0x484   : > { %2214 = vrot.lane.b32.xlu0 %v4989_v23, %s3731_s16 }
 0x485   : > { %v4997_v12 = vpop.permute.xlu1 %2444 }
 0x486   : > { %6037 = vst [vmem:[#allocation108_spill] sm:$0xff] %v4997_v12  ;;  %v5015_v12 = vld [vmem:[#allocation3 + $0x169] sm:$0xff] }
 0x487   : > { %2718 = vrot.lane.b32.xlu1 %v4713_v49, %s3737_s22 }
 0x488   : > { %2346 = vrot.lane.b32.xlu0 %v4999_v30, %s3733_s18 }
 0x489   : > { %v5007_v5 = vpop.permute.xlu1 %2818 }
 0x48a   : > { %6039 = vst [vmem:[#allocation110_spill] sm:$0xff] %v5007_v5  ;;  %v5043_v5 = vld [vmem:[#allocation3 + $0x180] sm:$0xff] }
 0x48b   : > { %2850 = vrot.lane.b32.xlu1 %v4703_v59, %s3734_s19  ;;  %v5031_v59 = vpop.permute.xlu0 %2844 }
 0x48c   : > { %2478 = vrot.lane.b32.xlu0 %v4981_v25, %s3735_s20  ;;  %6043 = vst [vmem:[#allocation114_spill] sm:$0xff] %v5031_v59 }
 0x48d   : > { %v5013_v43 = vpop.permute.xlu1 %2836 }
 0x48e   : > { %6040 = vst [vmem:[#allocation111_spill] sm:$0xff] %v5013_v43 }
 0x48f   : > { %1846 = vrot.lane.b32.xlu1 %v4762_v35, %s3730_s15  ;;  %v5045_v33 = vpop.permute.xlu0 %2194 }
 0x490   : > { %2736 = vrot.lane.b32.xlu0 %v5015_v12, %s3737_s22 }
 0x491   : > { %v5023_v49 = vpop.permute.xlu1 %2838 }
 0x492   : > { %6042 = vst [vmem:[#allocation113_spill] sm:$0xff] %v5023_v49 }
 0x493   : > { %1848 = vrot.lane.b32.xlu1 %v4745_v46, %s3730_s15 }
 0x494   : > { %2868 = vrot.lane.b32.xlu0 %v5025_v63, %s3734_s19 }
 0x495   : > { %v5033_v43 = vpop.permute.xlu1 %1834 }
 0x496   : > { %6044 = vst [vmem:[#allocation115_spill] sm:$0xff] %v5033_v43  ;;  %v5053_v43 = vld [vmem:[#allocation3 + $0x181] sm:$0xff] }
 0x497   : > { %2038 = vrot.lane.b32.xlu1 %v4770_v8, %s3732_s17 }
 0x498   : > { %2218 = vrot.lane.b32.xlu0 %v5035_v34, %s3731_s16 }
 0x499   : > { %v5041_v49 = vpop.permute.xlu1 %2026 }
 0x49a   : > { %6045 = vst [vmem:[#allocation116_spill] sm:$0xff] %v5041_v49  ;;  %v5059_v49 = vpop.permute.xlu0 %2584 }
 0x49b   : > { %2328 = vrot.lane.b32.xlu1 %v4762_v35, %s3733_s18  ;;  %6047 = vst [vmem:[#allocation118_spill] sm:$0xff] %v5059_v49  ;;  %v5078_v49 = vld [vmem:[#allocation3 + $0x189] sm:$0xff] }
 0x49c   : > { %2608 = vrot.lane.b32.xlu0 %v5043_v5, %s3736_s21 }
 0x49d   : > { %v5051_v59 = vpop.permute.xlu1 %2184 }
 0x49e   : > { %6046 = vst [vmem:[#allocation117_spill] sm:$0xff] %v5051_v59  ;;  %v2548_v59 = vld [vmem:[#allocation3 + $0x198] sm:$0xff]  ;;  %v5071_v54 = vpop.permute.xlu0 %2716 }
 0x49f   : > { %2460 = vrot.lane.b32.xlu1 %v4770_v8, %s3735_s20  ;;  %6050 = vst [vmem:[#allocation121_spill] sm:$0xff] %v5071_v54  ;;  %v5088_v54 = vld [vmem:[#allocation3 + $0x18a] sm:$0xff] }
 0x4a0   : > { %2740 = vrot.lane.b32.xlu0 %v5053_v43, %s3737_s22 }
 0x4a1   : > { %v5061_v0 = vpop.permute.xlu1 %2316 }
 0x4a2   : > { %6048 = vst [vmem:[#allocation119_spill] sm:$0xff] %v5061_v0  ;;  %v5084_v0 = vpop.permute.xlu0 %2848 }
 0x4a3   : > { %2590 = vrot.lane.b32.xlu1 %v4738_v37, %s3736_s21  ;;  %6052 = vst [vmem:[#allocation123_spill] sm:$0xff] %v5084_v0  ;;  %v2681_v0 = vld [vmem:[#allocation3 + $0x1a1] sm:$0xff] }
 0x4a4   : > { %2872 = vrot.lane.b32.xlu0 %v5063_v62, %s3734_s19 }
 0x4a5   : > { %v5069_v35 = vpop.permute.xlu1 %2448 }
 0x4a6   : > { %6049 = vst [vmem:[#allocation120_spill] sm:$0xff] %v5069_v35 }
 0x4a7   : > { %2722 = vrot.lane.b32.xlu1 %v4745_v46, %s3737_s22 }
 0x4a8   : > { %2612 = vrot.lane.b32.xlu0 %v2548_v59, %s3736_s21  ;;  %v2680_v59 = vld [vmem:[#allocation3 + $0x199] sm:$0xff] }
 0x4a9   : > { %v5076_v8 = vpop.permute.xlu1 %2576 }
 0x4aa   : > { %6051 = vst [vmem:[#allocation122_spill] sm:$0xff] %v5076_v8  ;;  %v5096_v8 = vpop.permute.xlu0 %2588 }
 0x4ab   : > { %2854 = vrot.lane.b32.xlu1 %v4728_v19, %s3734_s19  ;;  %6055 = vst [vmem:[#allocation126_spill] sm:$0xff] %v5096_v8 }
 0x4ac   : > { %2350 = vrot.lane.b32.xlu0 %v5078_v49, %s3733_s18 }
 0x4ad   : > { %v5086_v35 = vpop.permute.xlu1 %2840 }
 0x4ae   : > { %6053 = vst [vmem:[#allocation124_spill] sm:$0xff] %v5086_v35  ;;  %v5106_v35 = vpop.permute.xlu0 %2036 }
 0x4af   : > { %2594 = vrot.lane.b32.xlu1 %v4780_v22, %s3736_s21 }
 0x4b0   : > { %2482 = vrot.lane.b32.xlu0 %v5088_v54, %s3735_s20 }
 0x4b1   : > { %v5094_v46 = vpop.permute.xlu1 %2188 }
 0x4b2   : > { %6054 = vst [vmem:[#allocation125_spill] sm:$0xff] %v5094_v46  ;;  %v2813_v46 = vld [vmem:[#allocation3 + $0x1a2] sm:$0xff]  ;;  %v2327_v8 = vpop.permute.xlu0 %2326 }
 0x4b3   : > { %1850 = vrot.lane.b32.xlu1 %v4799_v15, %s3730_s15 }
 0x4b4   : > { %2744 = vrot.lane.b32.xlu0 %v2680_v59, %s3737_s22 }
 0x4b5   : > { %v5101_v19 = vpop.permute.xlu1 %2580 }
 0x4b6   : > { %6056 = vst [vmem:[#allocation127_spill] sm:$0xff] %v5101_v19  ;;  %v2459_v19 = vpop.permute.xlu0 %2458 }
 0x4b7   : > { %2042 = vrot.lane.b32.xlu1 %v4809_v28, %s3732_s17 }
 0x4b8   : > { %2746 = vrot.lane.b32.xlu0 %v2681_v0, %s3737_s22 }
 0x4b9   : > { %v5108_v4 = vpop.permute.xlu1 %2842 }
 0x4ba   : > { %6057 = vst [vmem:[#allocation128_spill] sm:$0xff] %v5108_v4  ;;  %v5125_v4 = vpop.permute.xlu0 %2040 }
 0x4bb   : > { %2200 = vrot.lane.b32.xlu1 %v4789_v45, %s3731_s16 }
 0x4bc   : > { %2878 = vrot.lane.b32.xlu0 %v2813_v46, %s3734_s19 }
 0x4bd   : > { %v5113_v59 = vpop.permute.xlu1 %1838 }
 0x4be   : > { %6058 = vst [vmem:[#allocation129_spill] sm:$0xff] %v5113_v59 }
 0x4bf   : > { %2332 = vrot.lane.b32.xlu1 %v4799_v15, %s3733_s18  ;;  %v5133_v15 = vpop.permute.xlu0 %2198 }
 0x4c1   : > { %v1841_v0 = vpop.permute.xlu1 %1840 }
 0x4c3   : > { %2464 = vrot.lane.b32.xlu1 %v4809_v28, %s3735_s20 }
 0x4c5   : > { %v5119_v2 = vpop.permute.xlu1 %2030 }
 0x4c6   : > { %6059 = vst [vmem:[#allocation130_spill] sm:$0xff] %v5119_v2 }
 0x4c7   : > { %2204 = vrot.lane.b32.xlu1 %v4818_v56, %s3731_s16 }
 0x4c9   : > { %v5123_v46 = vpop.permute.xlu1 %2320 }
 0x4ca   : > { %6060 = vst [vmem:[#allocation131_spill] sm:$0xff] %v5123_v46  ;;  %v5141_v46 = vpop.permute.xlu0 %2330 }
 0x4cb   : > { %1852 = vrot.lane.b32.xlu1 %v4835_v51, %s3730_s15 }
 0x4cd   : > { %v5129_v59 = vpop.permute.xlu1 %2452 }
 0x4ce   : > { %6061 = vst [vmem:[#allocation132_spill] sm:$0xff] %v5129_v59 }
 0x4cf   : > { %2726 = vrot.lane.b32.xlu1 %v4835_v51, %s3737_s22  ;;  %v5149_v51 = vpop.permute.xlu0 %2462 }
 0x4d1   : > { %v5135_v28 = vpop.permute.xlu1 %2714 }
 0x4d2   : > { %6062 = vst [vmem:[#allocation133_spill] sm:$0xff] %v5135_v28 }
 0x4d3   : > { %2858 = vrot.lane.b32.xlu1 %v4826_v18, %s3734_s19 }
 0x4d5   : > { %v5139_v2 = vpop.permute.xlu1 %2846 }
 0x4d6   : > { %6063 = vst [vmem:[#allocation134_spill] sm:$0xff] %v5139_v2  ;;  %v5157_v2 = vpop.permute.xlu0 %2720 }
 0x4d7   : > { %1854 = vrot.lane.b32.xlu1 %v4889_v7, %s3730_s15  ;;  %6067 = vst [vmem:[#allocation138_spill] sm:$0xff] %v5157_v2 }
 0x4d9   : > { %v5145_v17 = vpop.permute.xlu1 %2586 }
 0x4da   : > { %6064 = vst [vmem:[#allocation135_spill] sm:$0xff] %v5145_v17  ;;  %v5165_v17 = vpop.permute.xlu0 %2852 }
 0x4db   : > { %1856 = vrot.lane.b32.xlu1 %v4873_v24, %s3730_s15  ;;  %6068 = vst [vmem:[#allocation139_spill] sm:$0xff] %v5165_v17 }
 0x4dd   : > { %v5151_v59 = vpop.permute.xlu1 %1842 }
 0x4de   : > { %6065 = vst [vmem:[#allocation136_spill] sm:$0xff] %v5151_v59 }
 0x4df   : > { %2046 = vrot.lane.b32.xlu1 %v4899_v20, %s3732_s17 }
 0x4e1   : > { %v5155_v18 = vpop.permute.xlu1 %2034 }
 0x4e2   : > { %6066 = vst [vmem:[#allocation137_spill] sm:$0xff] %v5155_v18  ;;  %v5173_v18 = vpop.permute.xlu0 %2202 }
 0x4e3   : > { %2336 = vrot.lane.b32.xlu1 %v4889_v7, %s3733_s18 }
 0x4e5   : > { %v5161_v28 = vpop.permute.xlu1 %2192 }
 0x4e7   : > { %2468 = vrot.lane.b32.xlu1 %v4899_v20, %s3735_s20  ;;  %v5181_v20 = vpop.permute.xlu0 %2592 }
 0x4e8   : > { %6072 = vst [vmem:[#allocation143_spill] sm:$0xff] %v5181_v20 }
 0x4e9   : > { %v5167_v1 = vpop.permute.xlu1 %2324 }
 0x4ea   : > { %6069 = vst [vmem:[#allocation140_spill] sm:$0xff] %v5167_v1 }
 0x4eb   : > { %2598 = vrot.lane.b32.xlu1 %v4863_v10, %s3736_s21  ;;  %v5187_v10 = vpop.permute.xlu0 %2724 }
 0x4ec   : > { %6074 = vst [vmem:[#allocation145_spill] sm:$0xff] %v5187_v10 }
 0x4ed   : > { %v5171_v59 = vpop.permute.xlu1 %2456 }
 0x4ee   : > { %6070 = vst [vmem:[#allocation141_spill] sm:$0xff] %v5171_v59 }
 0x4ef   : > { %2730 = vrot.lane.b32.xlu1 %v4873_v24, %s3737_s22  ;;  %v5195_v24 = vpop.permute.xlu0 %2856 }
 0x4f0   : > { %6076 = vst [vmem:[#allocation147_spill] sm:$0xff] %v5195_v24 }
 0x4f1   : > { %v5177_v7 = vpop.permute.xlu1 %2196 }
 0x4f2   : > { %6071 = vst [vmem:[#allocation142_spill] sm:$0xff] %v5177_v7 }
 0x4f3   : > { %2862 = vrot.lane.b32.xlu1 %v4853_v36, %s3734_s19 }
 0x4f5   : > { %v1845_v17 = vpop.permute.xlu1 %1844 }
 0x4f7   : > { %2602 = vrot.lane.b32.xlu1 %v4907_v57, %s3736_s21  ;;  %v1917_v57 = vadd.f32 %v1841_v0, %v4605_v52 }
 0x4f9   : > { %v5185_v2 = vpop.permute.xlu1 %2718 }
 0x4fa   : > { %6073 = vst [vmem:[#allocation144_spill] sm:$0xff] %v5185_v2  ;;  %v5202_v2 = vpop.permute.xlu0 %2596 }
 0x4fb   : > { %1858 = vrot.lane.b32.xlu1 %v4927_v31, %s3730_s15  ;;  %6077 = vst [vmem:[#allocation148_spill] sm:$0xff] %v5202_v2 }
 0x4fd   : > { %v5191_v59 = vpop.permute.xlu1 %2850 }
 0x4fe   : > { %6075 = vst [vmem:[#allocation146_spill] sm:$0xff] %v5191_v59  ;;  %v2109_v59 = vadd.f32 %v4951_v16, %v1917_v57  ;;  %v5209_v24 = vpop.permute.xlu0 %2044 }
 0x4ff   : > { %2050 = vrot.lane.b32.xlu1 %v4935_v6, %s3732_s17 }
 0x500   : > { %v2271_v1 = vadd.f32 %v5045_v33, %v2109_v59 }
 0x501   : > { %v1847_v36 = vpop.permute.xlu1 %1846 }
 0x502   : > { %v2403_v0 = vadd.f32 %v2327_v8, %v2271_v1  ;;  %v5218_v2 = vpop.permute.xlu0 %2334 }
 0x503   : > { %2208 = vrot.lane.b32.xlu1 %v4917_v21, %s3731_s16 }
 0x504   : > { %v2535_v16 = vadd.f32 %v2459_v19, %v2403_v0 }
 0x505   : > { %v5199_v20 = vpop.permute.xlu1 %1848 }
 0x506   : > { %v5224_v57 = vpop.permute.xlu0 %2466 }
 0x507   : > { %2340 = vrot.lane.b32.xlu1 %v4927_v31, %s3733_s18 }
 0x509   : > { %v2039_v10 = vpop.permute.xlu1 %2038 }
 0x50a   : > { %v5230_v8 = vpop.permute.xlu0 %2048 }
 0x50b   : > { %2472 = vrot.lane.b32.xlu1 %v4935_v6, %s3735_s20  ;;  %6080 = vst [vmem:[#allocation151_spill] sm:$0xff] %v5230_v8 }
 0x50d   : > { %v5211_v7 = vpop.permute.xlu1 %2328 }
 0x50f   : > { %2212 = vrot.lane.b32.xlu1 %v4945_v39, %s3731_s16 }
 0x511   : > { %v5216_v52 = vpop.permute.xlu1 %2460 }
 0x512   : > { %6078 = vst [vmem:[#allocation149_spill] sm:$0xff] %v5216_v52 }
 0x513   : > { %1860 = vrot.lane.b32.xlu1 %v4963_v44, %s3730_s15 }
 0x515   : > { %v2591_v31 = vpop.permute.xlu1 %2590 }
 0x516   : > { %v2667_v6 = vadd.f32 %v2591_v31, %v2535_v16 }
 0x517   : > { %2734 = vrot.lane.b32.xlu1 %v4963_v44, %s3737_s22  ;;  %v5236_v44 = vpop.permute.xlu0 %2206 }
 0x519   : > { %v2723_v33 = vpop.permute.xlu1 %2722 }
 0x51a   : > { %v2799_v59 = vadd.f32 %v2723_v33, %v2667_v6  ;;  %v1920_v33 = vadd.f32 %v1847_v36, %v4693_v47 }
 0x51b   : > { %2866 = vrot.lane.b32.xlu1 %v4955_v13, %s3734_s19  ;;  %v5241_v6 = vpop.permute.xlu0 %2338 }
 0x51c   : > { %v2112_v8 = vadd.f32 %v2039_v10, %v1920_v33 }
 0x51d   : > { %v2855_v39 = vpop.permute.xlu1 %2854 }
 0x51e   : > { %v5228_v1 = vadd.f32 %v2855_v39, %v2799_v59  ;;  %v1919_v39 = vadd.f32 %v1845_v17, %v4659_v14 }
 0x51f   : > { %1862 = vrot.lane.b32.xlu1 %v5015_v12, %s3730_s15  ;;  %v5249_v52 = vpop.permute.xlu0 %2470 }
 0x520   : > { %6079 = vst [vmem:[#allocation150_spill] sm:$0xff] %v5228_v1 }
 0x521   : > { %v2595_v19 = vpop.permute.xlu1 %2594 }
 0x523   : > { %1864 = vrot.lane.b32.xlu1 %v4999_v30, %s3730_s15  ;;  %v5257_v14 = vpop.permute.xlu0 %2728 }
 0x525   : > { %v1851_v0 = vpop.permute.xlu1 %1850 }
 0x526   : > { %v1922_v13 = vadd.f32 %v1851_v0, %v4789_v45  ;;  %v2111_v0 = vadd.f32 %v5106_v35, %v1919_v39 }
 0x527   : > { %2054 = vrot.lane.b32.xlu1 %v5025_v63, %s3732_s17  ;;  %v5264_v35 = vpop.permute.xlu0 %2860 }
 0x528   : > { %v2273_v47 = vadd.f32 %v5133_v15, %v2111_v0 }
 0x529   : > { %v2043_v31 = vpop.permute.xlu1 %2042 }
 0x52a   : > { %v2114_v16 = vadd.f32 %v2043_v31, %v1922_v13  ;;  %v2405_v17 = vadd.f32 %v5141_v46, %v2273_v47 }
 0x52b   : > { %2344 = vrot.lane.b32.xlu1 %v5015_v12, %s3733_s18  ;;  %v5269_v33 = vpop.permute.xlu0 %2210 }
 0x52d   : > { %v2201_v59 = vpop.permute.xlu1 %2200 }
 0x52e   : > { %v2274_v1 = vadd.f32 %v2201_v59, %v2112_v8 }
 0x52f   : > { %2476 = vrot.lane.b32.xlu1 %v5025_v63, %s3735_s20 }
 0x531   : > { %v2333_v45 = vpop.permute.xlu1 %2332 }
 0x532   : > { %v2406_v13 = vadd.f32 %v2333_v45, %v2274_v1  ;;  %v2537_v1 = vadd.f32 %v5149_v51, %v2405_v17  ;;  %v1921_v51 = vadd.f32 %v5199_v20, %v4738_v37  ;;  %v2812_v17 = vld [vmem:[#allocation3 + $0x19a] sm:$0xff] }
 0x533   : > { %2606 = vrot.lane.b32.xlu1 %v4989_v23, %s3736_s21 }
 0x534   : > { %v2669_v15 = vadd.f32 %v2595_v19, %v2537_v1  ;;  %v2113_v39 = vadd.f32 %v5125_v4, %v1921_v51 }
 0x535   : > { %v2465_v12 = vpop.permute.xlu1 %2464 }
 0x536   : > { %v5255_v36 = vadd.f32 %v2465_v12, %v2406_v13  ;;  %v2275_v37 = vadd.f32 %v5173_v18, %v2113_v39  ;;  %v2549_v12 = vld [vmem:[#allocation3 + $0x1a0] sm:$0xff]  ;;  %v1902_v39 = vadd.f32 %v4787_v27, %v4563_v11  ;;  %v6090_v27 = vld [vmem:[#allocation83_spill] sm:$0xff] }
 0x537   : > { %2738 = vrot.lane.b32.xlu1 %v4999_v30, %s3737_s22  ;;  %v3703_v18 = vld [vmem:[#allocation3 + $0x20] sm:$0xff] }
 0x539   : > { %v2205_v63 = vpop.permute.xlu1 %2204 }
 0x53a   : > { %v2276_v10 = vadd.f32 %v2205_v63, %v2114_v16 }
 0x53b   : > { %2870 = vrot.lane.b32.xlu1 %v4981_v25, %s3734_s19  ;;  %v2601_v25 = vpop.permute.xlu0 %2600 }
 0x53d   : > { %v1853_v23 = vpop.permute.xlu1 %1852 }
 0x53e   : > { %v1923_v4 = vadd.f32 %v1853_v23, %v4780_v22 }
 0x53f   : > { %2610 = vrot.lane.b32.xlu1 %v5035_v34, %s3736_s21  ;;  %v2733_v19 = vpop.permute.xlu0 %2732 }
 0x540   : > { %v2115_v22 = vadd.f32 %v5209_v24, %v1923_v4  ;;  %v6087_v4 = vld [vmem:[#allocation74_spill] sm:$0xff] }
 0x541   : > { %v2727_v8 = vpop.permute.xlu1 %2726 }
 0x542   : > { %v2801_v31 = vadd.f32 %v2727_v8, %v2669_v15 }
 0x543   : > { %2216 = vrot.lane.b32.xlu1 %v5043_v5, %s3731_s16  ;;  %v2865_v0 = vpop.permute.xlu0 %2864 }
 0x545   : > { %v2859_v30 = vpop.permute.xlu1 %2858 }
 0x546   : > { %v5273_v46 = vadd.f32 %v2859_v30, %v2801_v31 }
 0x547   : > { %2348 = vrot.lane.b32.xlu1 %v5053_v43, %s3733_s18  ;;  %v5299_v15 = vpop.permute.xlu0 %2604 }
 0x549   : > { %v1855_v16 = vpop.permute.xlu1 %1854 }
 0x54a   : > { %v1924_v5 = vadd.f32 %v1855_v16, %v4818_v56  ;;  %v1674_v56 = vld [vmem:[#allocation3] sm:$0xff] }
 0x54b   : > { %2480 = vrot.lane.b32.xlu1 %v5063_v62, %s3735_s20  ;;  %v1675_v62 = vld [vmem:[#allocation3 + $0x8] sm:$0xff]  ;;  %v1898_v63 = vadd.f32 %v4532_v40, %v1674_v56  ;;  %v6088_v56 = vld [vmem:[#allocation76_spill] sm:$0xff] }
 0x54c   : > { %v1899_v45 = vadd.f32 %v4579_v61, %v1675_v62  ;;  %v2407_v61 = vadd.f32 %v5218_v2, %v2275_v37  ;;  %v6081_v62 = vld [vmem:[#allocation103_spill] sm:$0xff]  ;;  %v6084_v37 = vld [vmem:[#allocation46_spill] sm:$0xff] }
 0x54d   : > { %v5279_v34 = vpop.permute.xlu1 %1856 }
 0x54f   : > { %2742 = vrot.lane.b32.xlu1 %v5078_v49, %s3737_s22  ;;  %v2091_v49 = vadd.f32 %v4601_v50, %v1899_v45  ;;  %v2090_v50 = vadd.f32 %v4544_v29, %v1898_v63  ;;  %v2277_v29 = vadd.f32 %v5236_v44, %v2115_v22  ;;  %v6082_v45 = vld [vmem:[#allocation61_spill] sm:$0xff] }
 0x550   : > { %v6089_v63 = vld [vmem:[#allocation65_spill] sm:$0xff] }
 0x551   : > { %v2047_v59 = vpop.permute.xlu1 %2046  ;;  %v2253_v1 = vadd.f32 %v4594_v48, %v2091_v49  ;;  %v2252_v40 = vadd.f32 %v4573_v41, %v2090_v50  ;;  %v2539_v48 = vadd.f32 %v5224_v57, %v2407_v61  ;;  %v6092_v50 = vld [vmem:[#allocation73_spill] sm:$0xff] }
 0x552   : > { %v5287_v43 = vadd.f32 %v2047_v59, %v1924_v5  ;;  %v3704_v5 = vld [vmem:[#allocation3 + $0x18] sm:$0xff]  ;;  %v5315_v59 = vpop.permute.xlu0 %2052 }
 0x553   : > { %2874 = vrot.lane.b32.xlu1 %v5088_v54, %s3734_s19  ;;  %v2385_v30 = vadd.f32 %v4603_v53, %v2253_v1  ;;  %v2384_v16 = vadd.f32 %v4719_v42, %v2252_v40  ;;  %v1900_v24 = vadd.f32 %v3704_v5, %v4655_v26 }
 0x555   : > { %v2337_v13 = vpop.permute.xlu1 %2336  ;;  %v2516_v53 = vadd.f32 %v4736_v58, %v2384_v16  ;;  %v2517_v42 = vadd.f32 %v4613_v3, %v2385_v30  ;;  %v2092_v44 = vadd.f32 %v4683_v38, %v1900_v24  ;;  %v6086_v58 = vld [vmem:[#allocation48_spill] sm:$0xff]  ;;  %v2094_v3 = vadd.f32 %v6087_v4, %v1902_v39 }
 0x556   : > { %v2408_v20 = vadd.f32 %v2337_v13, %v2276_v10  ;;  %v1901_v10 = vadd.f32 %v3703_v18, %v4665_v55  ;;  %v6097_v16 = vld [vmem:[#allocation92_spill] sm:$0xff] }
 0x557   : > { %2614 = vrot.lane.b32.xlu1 %v2549_v12, %s3736_s21  ;;  %v2649_v49 = vadd.f32 %v6086_v58, %v2517_v42  ;;  %v2254_v38 = vadd.f32 %v6088_v56, %v2092_v44  ;;  %v6102_v44 = vld [vmem:[#allocation93_spill] sm:$0xff]  ;;  %v6108_v56 = vld [vmem:[#allocation18_spill] sm:$0xff] }
 0x558   : > { %v2093_v31 = vadd.f32 %v4691_v9, %v1901_v10  ;;  %v6093_v10 = vld [vmem:[#allocation77_spill] sm:$0xff] }
 0x559   : > { %v2469_v47 = vpop.permute.xlu1 %2468  ;;  %v2781_v18 = vadd.f32 %v6092_v50, %v2649_v49  ;;  %v2386_v22 = vadd.f32 %v6093_v10, %v2254_v38  ;;  %v6107_v49 = vld [vmem:[#allocation13_spill] sm:$0xff]  ;;  %v6112_v50 = vld [vmem:[#allocation7_spill] sm:$0xff] }
 0x55a   : > { %v2540_v54 = vadd.f32 %v2469_v47, %v2408_v20  ;;  %v2255_v57 = vadd.f32 %v4629_v60, %v2093_v31  ;;  %v6085_v20 = vld [vmem:[#allocation87_spill] sm:$0xff]  ;;  %v2409_v60 = vadd.f32 %v5241_v6, %v2277_v29  ;;  %v6094_v6 = vld [vmem:[#allocation90_spill] sm:$0xff]  ;;  %v5341_v31 = vpop.permute.xlu0 %2342 }
 0x55b   : > { %2876 = vrot.lane.b32.xlu1 %v2812_v17, %s3734_s19  ;;  %v1904_v12 = vadd.f32 %v6085_v20, %v6084_v37  ;;  %v6091_v17 = vld [vmem:[#allocation88_spill] sm:$0xff] }
 0x55c   : > { %v2672_v23 = vadd.f32 %v2601_v25, %v2540_v54  ;;  %v3705_v25 = vld [vmem:[#allocation3 + $0x38] sm:$0xff] }
 0x55d   : > { %v2599_v8 = vpop.permute.xlu1 %2598  ;;  %v1903_v41 = vadd.f32 %v3705_v25, %v4943_v32  ;;  %v6083_v32 = vld [vmem:[#allocation82_spill] sm:$0xff]  ;;  %v2096_v61 = vadd.f32 %v6091_v17, %v1904_v12  ;;  %v6099_v25 = vld [vmem:[#allocation11_spill] sm:$0xff] }
 0x55e   : > { %v2804_v2 = vadd.f32 %v2733_v19, %v2672_v23  ;;  %v2671_v55 = vadd.f32 %v2599_v8, %v2539_v48  ;;  %v2648_v13 = vadd.f32 %v6083_v32, %v2516_v53  ;;  %v2256_v23 = vadd.f32 %v6094_v6, %v2094_v3  ;;  %v6095_v8 = vld [vmem:[#allocation6_spill] sm:$0xff]  ;;  %v6096_v48 = vld [vmem:[#allocation79_spill] sm:$0xff]  ;;  %v6101_v53 = vld [vmem:[#allocation16_spill] sm:$0xff]  ;;  %v5362_v37 = vpop.permute.xlu0 %2474 }
 0x55f   : > { %v2095_v26 = vadd.f32 %v6081_v62, %v1903_v41  ;;  %v2518_v30 = vadd.f32 %v6096_v48, %v2386_v22  ;;  %v3706_v12 = vld [vmem:[#allocation3 + $0x50] sm:$0xff]  ;;  %v3707_v22 = vld [vmem:[#allocation3 + $0x60] sm:$0xff]  ;;  %v6113_v6 = vld [vmem:[#allocation12_spill] sm:$0xff] }
 0x560   : > { %v5311_v51 = vadd.f32 %v2865_v0, %v2804_v2  ;;  %v2387_v0 = vadd.f32 %v6082_v45, %v2255_v57  ;;  %v2780_v54 = vadd.f32 %v6090_v27, %v2648_v13  ;;  %v2541_v2 = vadd.f32 %v5249_v52, %v2409_v60  ;;  %v6103_v52 = vld [vmem:[#allocation95_spill] sm:$0xff]  ;;  %v6106_v60 = vld [vmem:[#allocation5_spill] sm:$0xff] }
 0x561   : > { %v2731_v9 = vpop.permute.xlu1 %2730  ;;  %v2257_v40 = vadd.f32 %v6095_v8, %v2095_v26  ;;  %v2388_v29 = vadd.f32 %v6097_v16, %v2256_v23  ;;  %v2650_v62 = vadd.f32 %v6103_v52, %v2518_v30  ;;  %v6104_v26 = vld [vmem:[#allocation8_spill] sm:$0xff]  ;;  %v1905_v58 = vadd.f32 %v3706_v12, %v6106_v60  ;;  %v3708_v8 = vld [vmem:[#allocation3 + $0x68] sm:$0xff] }
 0x562   : > { %v2803_v19 = vadd.f32 %v2731_v9, %v2671_v55  ;;  %v2519_v11 = vadd.f32 %v6089_v63, %v2387_v0  ;;  %v6098_v55 = vld [vmem:[#allocation110_spill] sm:$0xff]  ;;  %v6105_v0 = vld [vmem:[#allocation97_spill] sm:$0xff]  ;;  %v1906_v23 = vadd.f32 %v3707_v22, %v6113_v6 }
 0x563   : > { %v5347_v5 = vadd.f32 %v6098_v55, %v2781_v18  ;;  %v6100_v9 = vld [vmem:[#allocation54_spill] sm:$0xff]  ;;  %v2520_v39 = vadd.f32 %v6102_v44, %v2388_v29  ;;  %v2389_v45 = vadd.f32 %v6104_v26, %v2257_v40  ;;  %v2782_v32 = vadd.f32 %v6105_v0, %v2650_v62  ;;  %v6114_v40 = vld [vmem:[#allocation31_spill] sm:$0xff]  ;;  %v6115_v29 = vld [vmem:[#allocation9_spill] sm:$0xff]  ;;  %v5394_v62 = vpop.permute.xlu0 %2056 }
 0x564   : > { %v2651_v41 = vadd.f32 %v6099_v25, %v2519_v11  ;;  %v5351_v57 = vadd.f32 %v6100_v9, %v2780_v54  ;;  %v6110_v11 = vld [vmem:[#allocation98_spill] sm:$0xff]  ;;  %v2097_v18 = vadd.f32 %v6112_v50, %v1905_v58 }
 0x565   : > { %v2863_v47 = vpop.permute.xlu1 %2862  ;;  %v3017_v13 = vmul.f32 %v5347_v5, %v5347_v5  ;;  %v5371_v27 = vadd.f32 %v6110_v11, %v2782_v32  ;;  %v6111_v54 = vld [vmem:[#allocation10_spill] sm:$0xff]  ;;  %v6121_v32 = vld [vmem:[#allocation15_spill] sm:$0xff] }
 0x566   : > { %v5335_v1 = vadd.f32 %v2863_v47, %v2803_v19  ;;  %v2258_v19 = vadd.f32 %v6101_v53, %v2096_v61  ;;  %v2783_v4 = vadd.f32 %v6107_v49, %v2651_v41  ;;  %v3016_v3 = vmul.f32 %v5351_v57, %v5351_v57  ;;  %v6109_v47 = vld [vmem:[#allocation21_spill] sm:$0xff]  ;;  %v6118_v53 = vld [vmem:[#allocation19_spill] sm:$0xff]  ;;  %v6120_v26 = vld [vmem:[#allocation14_spill] sm:$0xff] }
 0x567   : > { %v2652_v63 = vadd.f32 %v6109_v47, %v2520_v39  ;;  %v2521_v17 = vadd.f32 %v6111_v54, %v2389_v45  ;;  %v2947_v61 = vsel %vm348_vm1, %v5347_v5, 0.0  ;;  %v2946_v48 = vsel %vm348_vm1, %v5351_v57, 0.0  ;;  %v6119_v39 = vld [vmem:[#allocation17_spill] sm:$0xff]  ;;  %v6124_v47 = vld [vmem:[#allocation27_spill] sm:$0xff]  ;;  %v6129_v6 = vld [vmem:[#allocation22_spill] sm:$0xff] }
 0x568   : > { %v2390_v38 = vadd.f32 %v6108_v56, %v2258_v19  ;;  %v3049_v30 = vsel %vm348_vm1, %v3017_v13, 0.0  ;;  %v5384_v55 = vadd.f32 %v6115_v29, %v2783_v4  ;;  %v2948_v25 = vadd.f32 %v2947_v61, %v2946_v48  ;;  %v6123_v49 = vld [vmem:[#allocation25_spill] sm:$0xff]  ;;  %v6125_v11 = vld [vmem:[#allocation23_spill] sm:$0xff]  ;;  %v6127_v61 = vld [vmem:[#allocation26_spill] sm:$0xff] }
 0x569   : > { %v2603_v24 = vpop.permute.xlu1 %2602  ;;  %v2784_v19 = vadd.f32 %v6118_v53, %v2652_v63  ;;  %v3018_v44 = vmul.f32 %v5371_v27, %v5371_v27  ;;  %v2653_v52 = vadd.f32 %v6119_v39, %v2521_v17  ;;  %v2098_v45 = vadd.f32 %v6120_v26, %v1906_v23 }
 0x56a   : > { %v5354_v42 = vadd.f32 %v2603_v24, %v2541_v2  ;;  %v1907_v2 = vadd.f32 %v3708_v8, %v6114_v40  ;;  %6116 = vst [vmem:[#allocation103_spill] sm:$0xff] %v5384_v55  ;;  %v3048_v24 = vsel %vm348_vm1, %v3016_v3, 0.0  ;;  %v2259_v13 = vadd.f32 %v6121_v32, %v2097_v18  ;;  %v6128_v18 = vld [vmem:[#allocation43_spill] sm:$0xff]  ;;  %v6130_v8 = vld [vmem:[#allocation29_spill] sm:$0xff] }
 0x56b   : > { %v3050_v0 = vadd.f32 %v3049_v30, %v3048_v24  ;;  %v2949_v60 = vsel %vm348_vm1, %v5371_v27, 0.0  ;;  %v2260_v4 = vadd.f32 %v6123_v49, %v2098_v45  ;;  %v3019_v3 = vmul.f32 %v5384_v55, %v5384_v55  ;;  %v6131_v30 = vld [vmem:[#allocation45_spill] sm:$0xff]  ;;  %v6136_v45 = vld [vmem:[#allocation24_spill] sm:$0xff] }
 0x56c   : > { %v2950_v56 = vadd.f32 %v2949_v60, %v2948_v25  ;;  %v5407_v54 = vadd.f32 %v6125_v11, %v2784_v19  ;;  %v3051_v17 = vsel %vm348_vm1, %v3018_v44, 0.0  ;;  %v2785_v50 = vadd.f32 %v6127_v61, %v2653_v52  ;;  %v6133_v19 = vld [vmem:[#allocation35_spill] sm:$0xff]  ;;  %v6134_v52 = vld [vmem:[#allocation36_spill] sm:$0xff]  ;;  %v3710_v32 = vld [vmem:[#allocation3 + $0x80] sm:$0xff] }
 0x56d   : > { %v1859_v20 = vpop.permute.xlu1 %1858  ;;  %v3052_v22 = vadd.f32 %v3051_v17, %v3050_v0  ;;  %v2391_v23 = vadd.f32 %v6129_v6, %v2259_v13  ;;  %v3053_v29 = vsel %vm348_vm1, %v3019_v3, 0.0  ;;  %v6137_v13 = vld [vmem:[#allocation41_spill] sm:$0xff]  ;;  %v6138_v60 = vld [vmem:[#allocation30_spill] sm:$0xff]  ;;  %v6139_v49 = vld [vmem:[#allocation64_spill] sm:$0xff] }
 0x56e   : > { %v1926_v10 = vadd.f32 %v1859_v20, %v4917_v21  ;;  %v6117_v21 = vld [vmem:[#allocation20_spill] sm:$0xff]  ;;  %v6122_v20 = vld [vmem:[#allocation34_spill] sm:$0xff]  ;;  %6126 = vst [vmem:[#allocation61_spill] sm:$0xff] %v5407_v54  ;;  %v3020_v39 = vmul.f32 %v5407_v54, %v5407_v54  ;;  %v5425_v26 = vadd.f32 %v6134_v52, %v2785_v50  ;;  %v2953_v3 = vsel %vm348_vm1, %v5407_v54, 0.0  ;;  %v6143_v6 = vld [vmem:[#allocation47_spill] sm:$0xff] }
 0x56f   : > { %v2522_v9 = vadd.f32 %v6117_v21, %v2390_v38  ;;  %v2099_v12 = vadd.f32 %v6122_v20, %v1907_v2  ;;  %v2951_v2 = vsel %vm348_vm1, %v5384_v55, 0.0  ;;  %v3709_v21 = vld [vmem:[#allocation3 + $0x98] sm:$0xff]  ;;  %v2523_v0 = vadd.f32 %v6136_v45, %v2391_v23 }
 0x570   : > { %v2952_v24 = vadd.f32 %v2951_v2, %v2950_v56  ;;  %6135 = vst [vmem:[#allocation82_spill] sm:$0xff] %v5425_v26  ;;  %v1909_v20 = vadd.f32 %v3710_v32, %v6137_v13  ;;  %v6141_v11 = vld [vmem:[#allocation40_spill] sm:$0xff]  ;;  %v3055_v23 = vsel %vm348_vm1, %v3020_v39, 0.0  ;;  %v6145_v2 = vld [vmem:[#allocation37_spill] sm:$0xff]  ;;  %v2955_v39 = vsel %vm348_vm1, %v5425_v26, 0.0 }
 0x571   : > { %v2051_v16 = vpop.permute.xlu1 %2050  ;;  %v2654_v63 = vadd.f32 %v6124_v47, %v2522_v9  ;;  %v2261_v40 = vadd.f32 %v6130_v8, %v2099_v12  ;;  %v6132_v9 = vld [vmem:[#allocation72_spill] sm:$0xff]  ;;  %v3054_v12 = vadd.f32 %v3053_v29, %v3052_v22  ;;  %v3021_v8 = vmul.f32 %v5425_v26, %v5425_v26  ;;  %v3712_v29 = vld [vmem:[#allocation3 + $0x90] sm:$0xff]  ;;  %v6151_v32 = vld [vmem:[#allocation49_spill] sm:$0xff] }
 0x572   : > { %v5387_v41 = vadd.f32 %v2051_v16, %v1926_v10  ;;  %v2392_v10 = vadd.f32 %v6128_v18, %v2260_v4  ;;  %v1911_v53 = vadd.f32 %v3709_v21, %v6132_v9  ;;  %v2954_v61 = vadd.f32 %v2953_v3, %v2952_v24  ;;  %v6142_v18 = vld [vmem:[#allocation50_spill] sm:$0xff]  ;;  %v6147_v24 = vld [vmem:[#allocation53_spill] sm:$0xff]  ;;  %v6148_v9 = vld [vmem:[#allocation32_spill] sm:$0xff] }
 0x573   : > { %v2786_v44 = vadd.f32 %v6133_v19, %v2654_v63  ;;  %v3711_v63 = vld [vmem:[#allocation3 + $0x78] sm:$0xff]  ;;  %v3056_v21 = vadd.f32 %v3055_v23, %v3054_v12  ;;  %v6149_v19 = vld [vmem:[#allocation42_spill] sm:$0xff]  ;;  %v6154_v3 = vld [vmem:[#allocation101_spill] sm:$0xff] }
 0x574   : > { %v2524_v16 = vadd.f32 %v6131_v30, %v2392_v10  ;;  %v1908_v17 = vadd.f32 %v3711_v63, %v6141_v11  ;;  %v2103_v10 = vadd.f32 %v6142_v18, %v1911_v53  ;;  %v6146_v30 = vld [vmem:[#allocation28_spill] sm:$0xff]  ;;  %v2956_v12 = vadd.f32 %v2955_v39, %v2954_v61  ;;  %v6162_v61 = vld [vmem:[#allocation67_spill] sm:$0xff]  ;;  %v6165_v39 = vld [vmem:[#allocation62_spill] sm:$0xff] }
 0x575   : > { %v2209_v58 = vpop.permute.xlu1 %2208  ;;  %v5439_v22 = vadd.f32 %v6143_v6, %v2786_v44  ;;  %v6150_v52 = vld [vmem:[#allocation44_spill] sm:$0xff]  ;;  %v3057_v11 = vsel %vm348_vm1, %v3021_v8, 0.0  ;;  %v6158_v6 = vld [vmem:[#allocation38_spill] sm:$0xff] }
 0x576   : > { %v2278_v38 = vadd.f32 %v2209_v58, %v5287_v43  ;;  %v5416_v43 = vpop.permute.xlu0 %2214  ;;  %v2393_v58 = vadd.f32 %v6138_v60, %v2261_v40  ;;  %v2656_v4 = vadd.f32 %v6139_v49, %v2524_v16  ;;  %v2101_v16 = vadd.f32 %v6146_v30, %v1909_v20  ;;  %v6153_v60 = vld [vmem:[#allocation56_spill] sm:$0xff]  ;;  %v3713_v49 = vld [vmem:[#allocation3 + $0xb0] sm:$0xff] }
 0x577   : > { %6144 = vst [vmem:[#allocation46_spill] sm:$0xff] %v5439_v22  ;;  %v2100_v44 = vadd.f32 %v6149_v19, %v1908_v17  ;;  %v6157_v17 = vld [vmem:[#allocation39_spill] sm:$0xff] }
 0x578   : > { %v2525_v53 = vadd.f32 %v6148_v9, %v2393_v58  ;;  %v2788_v45 = vadd.f32 %v6150_v52, %v2656_v4  ;;  %v3022_v4 = vmul.f32 %v5439_v22, %v5439_v22  ;;  %v2263_v23 = vadd.f32 %v6158_v6, %v2101_v16 }
 0x579   : > { %v2341_v48 = vpop.permute.xlu1 %2340 }
 0x57a   : > { %v2410_v25 = vadd.f32 %v2341_v48, %v2278_v38  ;;  %v6140_v38 = vld [vmem:[#allocation33_spill] sm:$0xff]  ;;  %v5444_v40 = vpop.permute.xlu0 %2346  ;;  %v2657_v18 = vadd.f32 %v6157_v17, %v2525_v53  ;;  %v6163_v53 = vld [vmem:[#allocation55_spill] sm:$0xff]  ;;  %v6169_v17 = vld [vmem:[#allocation100_spill] sm:$0xff] }
 0x57b   : > { %v2655_v47 = vadd.f32 %v6140_v38, %v2523_v0  ;;  %v6155_v38 = vld [vmem:[#allocation58_spill] sm:$0xff] }
 0x57c   : > { %v2262_v58 = vadd.f32 %v6155_v38, %v2100_v44  ;;  %v2789_v16 = vadd.f32 %v6163_v53, %v2657_v18  ;;  %v6175_v53 = vld [vmem:[#allocation81_spill] sm:$0xff] }
 0x57d   : > { %v2473_v56 = vpop.permute.xlu1 %2472  ;;  %v2787_v48 = vadd.f32 %v6145_v2, %v2655_v47  ;;  %v6156_v47 = vld [vmem:[#allocation59_spill] sm:$0xff]  ;;  %v3058_v2 = vadd.f32 %v3057_v11, %v3056_v21  ;;  %v6164_v21 = vld [vmem:[#allocation57_spill] sm:$0xff]  ;;  %v3714_v11 = vld [vmem:[#allocation3 + $0xa8] sm:$0xff] }
 0x57e   : > { %v5435_v50 = vadd.f32 %v2473_v56, %v2410_v25  ;;  %v1910_v25 = vadd.f32 %v3712_v29, %v6147_v24  ;;  %v1913_v56 = vadd.f32 %v3713_v49, %v6154_v3  ;;  %v2265_v63 = vadd.f32 %v6156_v47, %v2103_v10  ;;  %v6160_v29 = vld [vmem:[#allocation66_spill] sm:$0xff]  ;;  %v5475_v9 = vpop.permute.xlu0 %2478 }
 0x57f   : > { %v5457_v13 = vadd.f32 %v6151_v32, %v2787_v48  ;;  %v6159_v48 = vld [vmem:[#allocation60_spill] sm:$0xff]  ;;  %v5470_v24 = vadd.f32 %v6160_v29, %v2788_v45  ;;  %v2957_v10 = vsel %vm348_vm1, %v5439_v22, 0.0  ;;  %v6166_v32 = vld [vmem:[#allocation63_spill] sm:$0xff]  ;;  %v3059_v3 = vsel %vm348_vm1, %v3022_v4, 0.0 }
 0x580   : > { %v2102_v20 = vadd.f32 %v6153_v60, %v1910_v25  ;;  %v2394_v30 = vadd.f32 %v6159_v48, %v2262_v58  ;;  %v2105_v44 = vadd.f32 %v6164_v21, %v1913_v56  ;;  %v2958_v52 = vadd.f32 %v2957_v10, %v2956_v12  ;;  %v6168_v58 = vld [vmem:[#allocation51_spill] sm:$0xff]  ;;  %v6170_v12 = vld [vmem:[#allocation69_spill] sm:$0xff]  ;;  %v6173_v29 = vld [vmem:[#allocation108_spill] sm:$0xff] }
 0x581   : > { %v5454_v0 = vpop.permute.xlu1 %2212  ;;  %6152 = vst [vmem:[#allocation87_spill] sm:$0xff] %v5457_v13  ;;  %6161 = vst [vmem:[#allocation48_spill] sm:$0xff] %v5470_v24  ;;  %v3023_v8 = vmul.f32 %v5457_v13, %v5457_v13  ;;  %v2397_v60 = vadd.f32 %v6166_v32, %v2265_v63  ;;  %v2959_v38 = vsel %vm348_vm1, %v5457_v13, 0.0  ;;  %v2395_v47 = vadd.f32 %v6168_v58, %v2263_v23  ;;  %v6176_v21 = vld [vmem:[#allocation105_spill] sm:$0xff]  ;;  %v6178_v58 = vld [vmem:[#allocation122_spill] sm:$0xff] }
 0x582   : > { %v2264_v25 = vadd.f32 %v6162_v61, %v2102_v20  ;;  %v2526_v45 = vadd.f32 %v6165_v39, %v2394_v30  ;;  %v6167_v20 = vld [vmem:[#allocation106_spill] sm:$0xff]  ;;  %v1912_v6 = vadd.f32 %v3714_v11, %v6169_v17  ;;  %v3060_v18 = vadd.f32 %v3059_v3, %v3058_v2  ;;  %v6171_v30 = vld [vmem:[#allocation85_spill] sm:$0xff]  ;;  %v5506_v11 = vpop.permute.xlu0 %2736  ;;  %v6193_v22 = vld [vmem:[#allocation91_spill] sm:$0xff] }
 0x583   : > { %v3024_v56 = vmul.f32 %v5470_v24, %v5470_v24  ;;  %v5495_v63 = vadd.f32 %v6171_v30, %v2789_v16  ;;  %v2267_v23 = vadd.f32 %v6175_v53, %v2105_v44  ;;  %v2960_v32 = vadd.f32 %v2959_v38, %v2958_v52  ;;  %v6179_v16 = vld [vmem:[#allocation70_spill] sm:$0xff] }
 0x584   : > { %v2396_v49 = vadd.f32 %v6167_v20, %v2264_v25  ;;  %v2658_v48 = vadd.f32 %v6170_v12, %v2526_v45  ;;  %v6174_v25 = vld [vmem:[#allocation52_spill] sm:$0xff]  ;;  %v2104_v39 = vadd.f32 %v6176_v21, %v1912_v6  ;;  %v3061_v2 = vsel %vm348_vm1, %v3023_v8, 0.0  ;;  %v6181_v8 = vld [vmem:[#allocation75_spill] sm:$0xff] }
 0x585   : > { %v5477_v19 = vpop.permute.xlu1 %1860  ;;  %6172 = vst [vmem:[#allocation74_spill] sm:$0xff] %v5495_v63  ;;  %v2527_v10 = vadd.f32 %v6174_v25, %v2395_v47  ;;  %v6177_v20 = vld [vmem:[#allocation68_spill] sm:$0xff]  ;;  %v3062_v12 = vadd.f32 %v3061_v2, %v3060_v18  ;;  %v6180_v47 = vld [vmem:[#allocation117_spill] sm:$0xff]  ;;  %v3063_v44 = vsel %vm348_vm1, %v3024_v56, 0.0  ;;  %v3025_v52 = vmul.f32 %v5495_v63, %v5495_v63  ;;  %v6183_v6 = vld [vmem:[#allocation115_spill] sm:$0xff] }
 0x586   : > { %v2528_v61 = vadd.f32 %v6173_v29, %v2396_v49  ;;  %v2529_v3 = vadd.f32 %v6177_v20, %v2397_v60  ;;  %v2961_v49 = vsel %vm348_vm1, %v5470_v24, 0.0  ;;  %v2266_v30 = vadd.f32 %v6180_v47, %v2104_v39  ;;  %v6182_v60 = vld [vmem:[#allocation71_spill] sm:$0xff]  ;;  %v3715_v25 = vld [vmem:[#allocation3 + $0xc8] sm:$0xff]  ;;  %v6190_v24 = vld [vmem:[#allocation116_spill] sm:$0xff] }
 0x587   : > { %v2659_v17 = vadd.f32 %v6179_v16, %v2527_v10  ;;  %v2790_v38 = vadd.f32 %v6181_v8, %v2658_v48  ;;  %v1914_v29 = vadd.f32 %v6183_v6, %v6182_v60  ;;  %v6184_v10 = vld [vmem:[#allocation89_spill] sm:$0xff]  ;;  %v2962_v21 = vadd.f32 %v2961_v49, %v2960_v32  ;;  %v6185_v20 = vld [vmem:[#allocation119_spill] sm:$0xff]  ;;  %v6186_v2 = vld [vmem:[#allocation94_spill] sm:$0xff] }
 0x588   : > { %v2660_v45 = vadd.f32 %v6178_v58, %v2528_v61  ;;  %v1915_v53 = vadd.f32 %v3715_v25, %v6184_v10  ;;  %v2398_v18 = vadd.f32 %v6185_v20, %v2266_v30  ;;  %v2399_v39 = vadd.f32 %v6186_v2, %v2267_v23  ;;  %v6187_v58 = vld [vmem:[#allocation84_spill] sm:$0xff]  ;;  %v6188_v16 = vld [vmem:[#allocation111_spill] sm:$0xff]  ;;  %v6191_v8 = vld [vmem:[#allocation86_spill] sm:$0xff]  ;;  %v5537_v20 = vpop.permute.xlu0 %2868 }
 0x589   : > { %v5498_v4 = vpop.permute.xlu1 %2734  ;;  %v2661_v56 = vadd.f32 %v6187_v58, %v2529_v3  ;;  %v5525_v47 = vadd.f32 %v6188_v16, %v2790_v38  ;;  %v2106_v48 = vadd.f32 %v6190_v24, %v1914_v29  ;;  %v6192_v60 = vld [vmem:[#allocation78_spill] sm:$0xff]  ;;  %v3064_v54 = vadd.f32 %v3063_v44, %v3062_v12  ;;  %v6194_v25 = vld [vmem:[#allocation120_spill] sm:$0xff]  ;;  %v6195_v49 = vld [vmem:[#allocation99_spill] sm:$0xff] }
 0x58a   : > { %v2792_v13 = vadd.f32 %v6191_v8, %v2660_v45  ;;  %v2791_v6 = vadd.f32 %v6192_v60, %v2659_v17  ;;  %v2107_v26 = vadd.f32 %v6193_v22, %v1915_v53  ;;  %v2530_v32 = vadd.f32 %v6194_v25, %v2398_v18  ;;  %v6196_v38 = vld [vmem:[#allocation125_spill] sm:$0xff]  ;;  %v6197_v17 = vld [vmem:[#allocation127_spill] sm:$0xff]  ;;  %v6198_v22 = vld [vmem:[#allocation80_spill] sm:$0xff] }
 0x58b   : > { %6189 = vst [vmem:[#allocation76_spill] sm:$0xff] %v5525_v47  ;;  %v2793_v30 = vadd.f32 %v6195_v49, %v2661_v56  ;;  %v2963_v23 = vsel %vm348_vm1, %v5495_v63, 0.0  ;;  %v3065_v3 = vsel %vm348_vm1, %v3025_v52, 0.0  ;;  %v2268_v10 = vadd.f32 %v6196_v38, %v2106_v48  ;;  %v6199_v12 = vld [vmem:[#allocation129_spill] sm:$0xff]  ;;  %v6200_v53 = vld [vmem:[#allocation96_spill] sm:$0xff]  ;;  %v6205_v48 = vld [vmem:[#allocation131_spill] sm:$0xff] }
 0x58c   : > { %v2964_v45 = vadd.f32 %v2963_v23, %v2962_v21  ;;  %v2662_v29 = vadd.f32 %v6197_v17, %v2530_v32  ;;  %v1916_v44 = vadd.f32 %v6199_v12, %v6198_v22  ;;  %v2531_v18 = vadd.f32 %v6200_v53, %v2399_v39  ;;  %v6201_v58 = vld [vmem:[#allocation113_spill] sm:$0xff]  ;;  %v6203_v52 = vld [vmem:[#allocation124_spill] sm:$0xff]  ;;  %v6206_v60 = vld [vmem:[#allocation102_spill] sm:$0xff] }
 0x58d   : > { %v5518_v61 = vpop.permute.xlu1 %2866  ;;  %v3026_v2 = vmul.f32 %v5525_v47, %v5525_v47  ;;  %v5548_v56 = vadd.f32 %v6201_v58, %v2791_v6  ;;  %v5551_v16 = vadd.f32 %v6203_v52, %v2792_v13  ;;  %v2400_v8 = vadd.f32 %v6205_v48, %v2268_v10  ;;  %v6207_v32 = vld [vmem:[#allocation130_spill] sm:$0xff]  ;;  %v6208_v39 = vld [vmem:[#allocation128_spill] sm:$0xff]  ;;  %v5573_v48 = vpop.permute.xlu0 %2218 }
 0x58e   : > { %v2269_v21 = vadd.f32 %v6206_v60, %v2107_v26  ;;  %v3066_v25 = vadd.f32 %v3065_v3, %v3064_v54  ;;  %v2108_v49 = vadd.f32 %v6207_v32, %v1916_v44  ;;  %v2965_v23 = vsel %vm348_vm1, %v5525_v47, 0.0  ;;  %v6210_v17 = vld [vmem:[#allocation132_spill] sm:$0xff]  ;;  %v6213_v44 = vld [vmem:[#allocation109_spill] sm:$0xff] }
 0x58f   : > { %6202 = vst [vmem:[#allocation65_spill] sm:$0xff] %v5548_v56  ;;  %6204 = vst [vmem:[#allocation83_spill] sm:$0xff] %v5551_v16  ;;  %v5559_v38 = vadd.f32 %v6208_v39, %v2793_v30  ;;  %v2532_v22 = vadd.f32 %v6210_v17, %v2400_v8  ;;  %v6211_v12 = vld [vmem:[#allocation104_spill] sm:$0xff]  ;;  %v2966_v53 = vadd.f32 %v2965_v23, %v2964_v45  ;;  %v3067_v54 = vsel %vm348_vm1, %v3026_v2, 0.0  ;;  %v3716_v39 = vld [vmem:[#allocation3 + $0xf0] sm:$0xff] }
 0x590   : > { %v2401_v13 = vadd.f32 %v6211_v12, %v2269_v21  ;;  %v6212_v58 = vld [vmem:[#allocation112_spill] sm:$0xff]  ;;  %v2270_v26 = vadd.f32 %v5161_v28, %v2108_v49  ;;  %v3027_v3 = vmul.f32 %v5548_v56, %v5548_v56  ;;  %v3028_v30 = vmul.f32 %v5551_v16, %v5551_v16  ;;  %v6215_v21 = vld [vmem:[#allocation118_spill] sm:$0xff]  ;;  %v6216_v49 = vld [vmem:[#allocation133_spill] sm:$0xff] }
 0x591   : > { %v5539_v24 = vpop.permute.xlu1 %1862  ;;  %6209 = vst [vmem:[#allocation88_spill] sm:$0xff] %v5559_v38  ;;  %v2794_v10 = vadd.f32 %v6212_v58, %v2662_v29  ;;  %v2663_v52 = vadd.f32 %v6213_v44, %v2531_v18  ;;  %v3068_v8 = vadd.f32 %v3067_v54, %v3066_v25  ;;  %v2967_v45 = vsel %vm348_vm1, %v5548_v56, 0.0  ;;  %v6214_v28 = vld [vmem:[#allocation140_spill] sm:$0xff]  ;;  %v6218_v25 = vld [vmem:[#allocation107_spill] sm:$0xff]  ;;  %v6219_v44 = vld [vmem:[#allocation114_spill] sm:$0xff] }
 0x592   : > { %v2969_v29 = vsel %vm348_vm1, %v5551_v16, 0.0  ;;  %v2402_v60 = vadd.f32 %v6214_v28, %v2270_v26  ;;  %v3029_v2 = vmul.f32 %v5559_v38, %v5559_v38  ;;  %v2664_v32 = vadd.f32 %v6215_v21, %v2532_v22  ;;  %v6217_v18 = vld [vmem:[#allocation136_spill] sm:$0xff]  ;;  %v6221_v16 = vld [vmem:[#allocation141_spill] sm:$0xff]  ;;  %v6222_v22 = vld [vmem:[#allocation134_spill] sm:$0xff] }
 0x593   : > { %v2795_v23 = vadd.f32 %v6216_v49, %v2663_v52  ;;  %v1918_v17 = vadd.f32 %v3716_v39, %v6217_v18  ;;  %v2533_v58 = vadd.f32 %v6218_v25, %v2401_v13  ;;  %v2968_v54 = vadd.f32 %v2967_v45, %v2966_v53  ;;  %v6224_v52 = vld [vmem:[#allocation137_spill] sm:$0xff]  ;;  %v6226_v25 = vld [vmem:[#allocation135_spill] sm:$0xff] }
 0x594   : > { %v5589_v56 = vadd.f32 %v6219_v44, %v2794_v10  ;;  %v2534_v26 = vadd.f32 %v6221_v16, %v2402_v60  ;;  %v3069_v28 = vsel %vm348_vm1, %v3027_v3, 0.0  ;;  %v3071_v47 = vsel %vm348_vm1, %v3028_v30, 0.0  ;;  %v6225_v10 = vld [vmem:[#allocation121_spill] sm:$0xff]  ;;  %v6227_v60 = vld [vmem:[#allocation142_spill] sm:$0xff]  ;;  %v5604_v44 = vpop.permute.xlu0 %2608 }
 0x595   : > { %v5562_v6 = vpop.permute.xlu1 %1864  ;;  %v5595_v21 = vadd.f32 %v6222_v22, %v2795_v23  ;;  %v2110_v49 = vadd.f32 %v6224_v52, %v1918_v17  ;;  %v3070_v39 = vadd.f32 %v3069_v28, %v3068_v8  ;;  %v2970_v18 = vadd.f32 %v2969_v29, %v2968_v54  ;;  %v6228_v29 = vld [vmem:[#allocation126_spill] sm:$0xff]  ;;  %v6229_v28 = vld [vmem:[#allocation144_spill] sm:$0xff]  ;;  %v6230_v52 = vld [vmem:[#allocation123_spill] sm:$0xff] }
 0x596   : > { %6220 = vst [vmem:[#allocation73_spill] sm:$0xff] %v5589_v56  ;;  %v2971_v13 = vsel %vm348_vm1, %v5559_v38, 0.0  ;;  %v3073_v53 = vsel %vm348_vm1, %v3029_v2, 0.0  ;;  %v2796_v45 = vadd.f32 %v6225_v10, %v2664_v32  ;;  %v2665_v16 = vadd.f32 %v6226_v25, %v2533_v58  ;;  %v6231_v10 = vld [vmem:[#allocation146_spill] sm:$0xff] }
 0x597   : > { %6223 = vst [vmem:[#allocation77_spill] sm:$0xff] %v5595_v21  ;;  %v2272_v3 = vadd.f32 %v6227_v60, %v2110_v49  ;;  %v3072_v23 = vadd.f32 %v3071_v47, %v3070_v39  ;;  %v3030_v8 = vmul.f32 %v5589_v56, %v5589_v56  ;;  %v2666_v17 = vadd.f32 %v6228_v29, %v2534_v26  ;;  %v6232_v47 = vld [vmem:[#allocation149_spill] sm:$0xff] }
 0x598   : > { %v2972_v54 = vadd.f32 %v2971_v13, %v2970_v18  ;;  %v3031_v2 = vmul.f32 %v5595_v21, %v5595_v21  ;;  %v2797_v32 = vadd.f32 %v6229_v28, %v2665_v16  ;;  %v5616_v49 = vadd.f32 %v6230_v52, %v2796_v45  ;;  %v6233_v13 = vld [vmem:[#allocation138_spill] sm:$0xff] }
 0x599   : > { %v5585_v12 = vpop.permute.xlu1 %2054  ;;  %v2404_v58 = vadd.f32 %v5211_v7, %v2272_v3  ;;  %v3074_v22 = vadd.f32 %v3073_v53, %v3072_v23  ;;  %v2973_v26 = vsel %vm348_vm1, %v5589_v56, 0.0  ;;  %v2975_v18 = vsel %vm348_vm1, %v5595_v21, 0.0  ;;  %v5631_v3 = vpop.permute.xlu0 %2740  ;;  %v6237_v21 = vld [vmem:[#allocation150_spill] sm:$0xff] }
 0x59a   : > { %v5619_v25 = vadd.f32 %v6231_v10, %v2797_v32  ;;  %v2798_v16 = vadd.f32 %v6233_v13, %v2666_v17  ;;  %v2974_v7 = vadd.f32 %v2973_v26, %v2972_v54  ;;  %v3075_v53 = vsel %vm348_vm1, %v3030_v8, 0.0  ;;  %v6235_v54 = vld [vmem:[#allocation139_spill] sm:$0xff]  ;;  %v6236_v13 = vld [vmem:[#allocation145_spill] sm:$0xff] }
 0x59b   : > { %v2536_v39 = vadd.f32 %v6232_v47, %v2404_v58  ;;  %v3077_v45 = vsel %vm348_vm1, %v3031_v2, 0.0  ;;  %v3076_v23 = vadd.f32 %v3075_v53, %v3074_v22  ;;  %v3032_v29 = vmul.f32 %v5616_v49, %v5616_v49  ;;  %v6234_v58 = vld [vmem:[#allocation143_spill] sm:$0xff] }
 0x59c   : > { %v2976_v28 = vadd.f32 %v2975_v18, %v2974_v7  ;;  %v3033_v32 = vmul.f32 %v5619_v25, %v5619_v25  ;;  %v5641_v47 = vadd.f32 %v6235_v54, %v2798_v16  ;;  %v2977_v8 = vsel %vm348_vm1, %v5616_v49, 0.0 }
 0x59d   : > { %v5606_v30 = vpop.permute.xlu1 %2344  ;;  %v2668_v52 = vadd.f32 %v6234_v58, %v2536_v39  ;;  %v3078_v17 = vadd.f32 %v3077_v45, %v3076_v23  ;;  %v2979_v2 = vsel %vm348_vm1, %v5619_v25, 0.0  ;;  %v3079_v26 = vsel %vm348_vm1, %v3032_v29, 0.0  ;;  %v5650_v39 = vpop.permute.xlu0 %2872  ;;  %v3717_v23 = vld [vmem:[#allocation3 + $0x140] sm:$0xff]  ;;  %v6238_v29 = vld [vmem:[#allocation148_spill] sm:$0xff] }
 0x59e   : > { %v2978_v22 = vadd.f32 %v2977_v8, %v2976_v28  ;;  %v3081_v18 = vsel %vm348_vm1, %v3033_v32, 0.0  ;;  %v3034_v16 = vmul.f32 %v5641_v47, %v5641_v47  ;;  %v1925_v58 = vadd.f32 %v3717_v23, %v5279_v34 }
 0x59f   : > { %v2800_v7 = vadd.f32 %v6236_v13, %v2668_v52  ;;  %v3080_v45 = vadd.f32 %v3079_v26, %v3078_v17  ;;  %v3035_v28 = vmul.f32 %v6237_v21, %v6237_v21  ;;  %v2670_v32 = vadd.f32 %v6238_v29, %v5255_v36  ;;  %v6239_v52 = vld [vmem:[#allocation147_spill] sm:$0xff] }
 0x5a0   : > { %v2980_v54 = vadd.f32 %v2979_v2, %v2978_v22  ;;  %v2981_v38 = vsel %vm348_vm1, %v5641_v47, 0.0  ;;  %v3083_v17 = vsel %vm348_vm1, %v3034_v16, 0.0  ;;  %v2983_v34 = vsel %vm348_vm1, %v6237_v21, 0.0  ;;  %v6240_v2 = vld [vmem:[#allocation151_spill] sm:$0xff] }
 0x5a1   : > { %v5622_v60 = vpop.permute.xlu1 %2476  ;;  %v3082_v8 = vadd.f32 %v3081_v18, %v3080_v45  ;;  %v5662_v13 = vadd.f32 %v6239_v52, %v2800_v7  ;;  %v2117_v22 = vadd.f32 %v6240_v2, %v1925_v58  ;;  %v5672_v26 = vpop.permute.xlu0 %2612  ;;  %v3085_v36 = vsel %vm348_vm1, %v3035_v28, 0.0  ;;  %v3718_v7 = vld [vmem:[#allocation3 + $0x158] sm:$0xff] }
 0x5a2   : > { %v2982_v23 = vadd.f32 %v2981_v38, %v2980_v54  ;;  %v2802_v18 = vadd.f32 %v5257_v14, %v2670_v32  ;;  %v1927_v45 = vadd.f32 %v3718_v7, %v5477_v19  ;;  %v3037_v58 = vmul.f32 %v5273_v46, %v5273_v46 }
 0x5a3   : > { %v3084_v29 = vadd.f32 %v3083_v17, %v3082_v8  ;;  %v3036_v52 = vmul.f32 %v5662_v13, %v5662_v13  ;;  %v2279_v38 = vadd.f32 %v5269_v33, %v2117_v22  ;;  %v2985_v19 = vsel %vm348_vm1, %v5662_v13, 0.0 }
 0x5a4   : > { %v2984_v16 = vadd.f32 %v2983_v34, %v2982_v23  ;;  %v5685_v54 = vadd.f32 %v5264_v35, %v2802_v18  ;;  %v2119_v14 = vadd.f32 %v5315_v59, %v1927_v45  ;;  %v2987_v28 = vsel %vm348_vm1, %v5273_v46, 0.0  ;;  %v3719_v45 = vld [vmem:[#allocation3 + $0x170] sm:$0xff] }
 0x5a5   : > { %v5638_v10 = vpop.permute.xlu1 %2606  ;;  %v3086_v55 = vadd.f32 %v3085_v36, %v3084_v29  ;;  %v5692_v32 = vpop.permute.xlu0 %2350  ;;  %v3087_v17 = vsel %vm348_vm1, %v3036_v52, 0.0  ;;  %v3089_v33 = vsel %vm348_vm1, %v3037_v58, 0.0  ;;  %v2280_v35 = vadd.f32 %v5454_v0, %v5387_v41 }
 0x5a6   : > { %v2986_v8 = vadd.f32 %v2985_v19, %v2984_v16  ;;  %v2411_v59 = vadd.f32 %v5341_v31, %v2279_v38  ;;  %v3038_v22 = vmul.f32 %v5685_v54, %v5685_v54  ;;  %v2674_v36 = vadd.f32 %v5299_v15, %v5435_v50 }
 0x5a7   : > { %v3088_v2 = vadd.f32 %v3087_v17, %v3086_v55  ;;  %v2281_v18 = vadd.f32 %v5416_v43, %v2119_v14  ;;  %v3039_v7 = vmul.f32 %v5335_v1, %v5335_v1  ;;  %v2805_v55 = vadd.f32 %v5498_v4, %v5354_v42  ;;  %v3720_v14 = vld [vmem:[#allocation3 + $0x168] sm:$0xff] }
 0x5a8   : > { %v2988_v23 = vadd.f32 %v2987_v28, %v2986_v8  ;;  %v1929_v41 = vadd.f32 %v3719_v45, %v5562_v6  ;;  %v2412_v31 = vadd.f32 %v5606_v30, %v2280_v35  ;;  %v2989_v29 = vsel %vm348_vm1, %v5685_v54, 0.0 }
 0x5a9   : > { %v5652_v53 = vpop.permute.xlu1 %2738  ;;  %v3090_v0 = vadd.f32 %v3089_v33, %v3088_v2  ;;  %v2991_v15 = vsel %vm348_vm1, %v5335_v1, 0.0  ;;  %v5715_v43 = vadd.f32 %v5518_v61, %v2805_v55  ;;  %v2543_v42 = vadd.f32 %v5362_v37, %v2411_v59  ;;  %v2483_v4 = vpop.permute.xlu0 %2482 }
 0x5aa   : > { %v2544_v50 = vadd.f32 %v5622_v60, %v2412_v31  ;;  %v2990_v16 = vadd.f32 %v2989_v29, %v2988_v23  ;;  %v3091_v6 = vsel %vm348_vm1, %v3038_v22, 0.0  ;;  %v2806_v30 = vadd.f32 %v5506_v11, %v2674_v36 }
 0x5ab   : > { %v2413_v58 = vadd.f32 %v5444_v40, %v2281_v18  ;;  %v3093_v38 = vsel %vm348_vm1, %v3039_v7, 0.0  ;;  %v1928_v19 = vadd.f32 %v3720_v14, %v5539_v24  ;;  %v2121_v61 = vadd.f32 %v5394_v62, %v1929_v41 }
 0x5ac   : > { %v2675_v28 = vadd.f32 %v5638_v10, %v2543_v42  ;;  %v3040_v37 = vmul.f32 %v5311_v51, %v5311_v51  ;;  %v3092_v60 = vadd.f32 %v3091_v6, %v3090_v0  ;;  %v2992_v8 = vadd.f32 %v2991_v15, %v2990_v16 }
 0x5ad   : > { %v5664_v56 = vpop.permute.xlu1 %2870  ;;  %v3041_v11 = vmul.f32 %v5715_v43, %v5715_v43  ;;  %v2120_v40 = vadd.f32 %v5585_v12, %v1928_v19  ;;  %v2676_v2 = vadd.f32 %v5604_v44, %v2544_v50  ;;  %v5734_v62 = vadd.f32 %v5537_v20, %v2806_v30  ;;  %v2745_v23 = vpop.permute.xlu0 %2744 }
 0x5ae   : > { %v2807_v33 = vadd.f32 %v5652_v53, %v2675_v28  ;;  %v3094_v24 = vadd.f32 %v3093_v38, %v3092_v60  ;;  %v2993_v10 = vsel %vm348_vm1, %v5311_v51, 0.0  ;;  %v2545_v35 = vadd.f32 %v5475_v9, %v2413_v58 }
 0x5af   : > { %v2995_v59 = vsel %vm348_vm1, %v5715_v43, 0.0  ;;  %v2283_v22 = vadd.f32 %v5573_v48, %v2121_v61  ;;  %v2994_v53 = vadd.f32 %v2993_v10, %v2992_v8  ;;  %v3095_v36 = vsel %vm348_vm1, %v3040_v37, 0.0 }
 0x5b0   : > { %v5743_v12 = vadd.f32 %v5664_v56, %v2807_v33  ;;  %v3097_v18 = vsel %vm348_vm1, %v3041_v11, 0.0  ;;  %v2808_v7 = vadd.f32 %v5631_v3, %v2676_v2  ;;  %v3042_v45 = vmul.f32 %v5734_v62, %v5734_v62 }
 0x5b1   : > { %v5679_v63 = vpop.permute.xlu1 %2610  ;;  %v3096_v48 = vadd.f32 %v3095_v36, %v3094_v24  ;;  %v2996_v41 = vadd.f32 %v2995_v59, %v2994_v53  ;;  %v2415_v0 = vadd.f32 %v5692_v32, %v2283_v22  ;;  %v2747_v42 = vpop.permute.xlu0 %2746 }
 0x5b2   : > { %v2677_v9 = vadd.f32 %v5679_v63, %v2545_v35  ;;  %v3043_v56 = vmul.f32 %v5743_v12, %v5743_v12  ;;  %v5755_v50 = vadd.f32 %v5650_v39, %v2808_v7  ;;  %v2997_v63 = vsel %vm348_vm1, %v5734_v62, 0.0 }
 0x5b3   : > { %v3098_v29 = vadd.f32 %v3097_v18, %v3096_v48  ;;  %v2999_v3 = vsel %vm348_vm1, %v5743_v12, 0.0  ;;  %v2998_v16 = vadd.f32 %v2997_v63, %v2996_v41  ;;  %v3099_v6 = vsel %vm348_vm1, %v3042_v45, 0.0 }
 0x5b4   : > { %v3101_v30 = vsel %vm348_vm1, %v3043_v56, 0.0  ;;  %v2547_v58 = vadd.f32 %v2483_v4, %v2415_v0  ;;  %v3044_v19 = vmul.f32 %v5755_v50, %v5755_v50  ;;  %v3001_v60 = vsel %vm348_vm1, %v5755_v50, 0.0 }
 0x5b5   : > { %v2217_v34 = vpop.permute.xlu1 %2216  ;;  %v3100_v38 = vadd.f32 %v3099_v6, %v3098_v29  ;;  %v3000_v39 = vadd.f32 %v2999_v3, %v2998_v16  ;;  %v2879_v4 = vpop.permute.xlu0 %2878 }
 0x5b6   : > { %v2282_v44 = vadd.f32 %v2217_v34, %v2120_v40  ;;  %v3103_v2 = vsel %vm348_vm1, %v3044_v19, 0.0 }
 0x5b7   : > { %v3102_v37 = vadd.f32 %v3101_v30, %v3100_v38  ;;  %v3002_v11 = vadd.f32 %v3001_v60, %v3000_v39 }
 0x5b9   : > { %v2349_v52 = vpop.permute.xlu1 %2348  ;;  %v3104_v35 = vadd.f32 %v3103_v2, %v3102_v37 }
 0x5ba   : > { %v2414_v55 = vadd.f32 %v2349_v52, %v2282_v44 }
 0x5bd   : > { %v2481_v17 = vpop.permute.xlu1 %2480 }
 0x5be   : > { %v2546_v34 = vadd.f32 %v2481_v17, %v2414_v55 }
 0x5c0   : > { %v2678_v32 = vadd.f32 %v5672_v26, %v2546_v34 }
 0x5c1   : > { %v2743_v20 = vpop.permute.xlu1 %2742 }
 0x5c2   : > { %v2809_v31 = vadd.f32 %v2743_v20, %v2677_v9  ;;  %v2810_v26 = vadd.f32 %v2745_v23, %v2678_v32 }
 0x5c5   : > { %v2875_v15 = vpop.permute.xlu1 %2874 }
 0x5c6   : > { %v5761_v52 = vadd.f32 %v2875_v15, %v2809_v31 }
 0x5c8   : > { %v3045_v61 = vmul.f32 %v5761_v52, %v5761_v52  ;;  %v3003_v8 = vsel %vm348_vm1, %v5761_v52, 0.0 }
 0x5c9   : > { %v2615_v14 = vpop.permute.xlu1 %2614  ;;  %v3004_v59 = vadd.f32 %v3003_v8, %v3002_v11  ;;  %v6241_v8 = vld [vmem:[#allocation4_spill] sm:$0xff] }
 0x5ca   : > { %v2679_v28 = vadd.f32 %v2615_v14, %v2547_v58  ;;  %v3105_v33 = vsel %vm348_vm1, %v3045_v61, 0.0  ;;  %v2944_v14 = vld [vmem:[%s5911_s5] sm:$0x1] }
 0x5cb   : > { %v3106_v53 = vadd.f32 %v3105_v33, %v3104_v35 }
 0x5cc   : > { %v2811_v17 = vadd.f32 %v2747_v42, %v2679_v28  ;;  %v2945_v28 = vld [vmem:[%s5912_s6] sm:$0x1] }
 0x5cd   : > { %v2877_v40 = vpop.permute.xlu1 %2876 }
 0x5ce   : > { %v5776_v24 = vadd.f32 %v2879_v4, %v2811_v17  ;;  %v5778_v10 = vadd.f32 %v2877_v40, %v2810_v26 }
 0x5d0   : > { %v3047_v22 = vmul.f32 %v5776_v24, %v5776_v24  ;;  %v3005_v44 = vsel %vm348_vm1, %v5778_v10, 0.0  ;;  %v3046_v23 = vmul.f32 %v5778_v10, %v5778_v10  ;;  %v3007_v20 = vsel %vm348_vm1, %v5776_v24, 0.0 }
 0x5d1   : > { %v3006_v36 = vadd.f32 %v3005_v44, %v3004_v59 }
 0x5d2   : > { %v3107_v18 = vsel %vm348_vm1, %v3046_v23, 0.0  ;;  %v3109_v55 = vsel %vm348_vm1, %v3047_v22, 0.0 }
 0x5d3   : > { %v3008_v7 = vadd.f32 %v3007_v20, %v3006_v36  ;;  %v3108_v9 = vadd.f32 %v3107_v18, %v3106_v53 }
 0x5d5   : > { %v3009_v45 = vrot.slane %v3008_v7, 4  ;;  %v3110_v48 = vadd.f32 %v3109_v55, %v3108_v9  ;;  %v6242_v9 = vld [vmem:[#allocation103_spill] sm:$0xff] }
 0x5d7   : > { %v3010_v41 = vadd.f32 %v3009_v45, %v3008_v7  ;;  %v3111_v56 = vrot.slane %v3110_v48, 4 }
 0x5d9   : > { %v3011_v34 = vrot.slane %v3010_v41, 2  ;;  %v3112_v31 = vadd.f32 %v3111_v56, %v3110_v48 }
 0x5db   : > { %v3012_v0 = vadd.f32 %v3011_v34, %v3010_v41  ;;  %v3113_v29 = vrot.slane %v3112_v31, 2  ;;  %v6243_v41 = vld [vmem:[#allocation61_spill] sm:$0xff] }
 0x5dd   : > { %v3013_v15 = vrot.slane %v3012_v0, 1  ;;  %v3114_v63 = vadd.f32 %v3113_v29, %v3112_v31 }
 0x5df   : > { %v3014_v3 = vadd.f32 %v3013_v15, %v3012_v0  ;;  %v3115_v42 = vrot.slane %v3114_v63, 1 }
 0x5e1   : > { %v3015_v16 = vmul.f32 0.00390625, %v3014_v3  ;;  %v3116_v6 = vadd.f32 %v3115_v42, %v3114_v63  ;;  %v6244_v63 = vld [vmem:[#allocation82_spill] sm:$0xff] }
 0x5e3   : > { %v3117_v30 = vmul.f32 0.00390625, %v3116_v6  ;;  %v3118_v32 = vmul.f32 %v3015_v16, %v3015_v16 }
 0x5e5   : > { %v3119_v58 = vsub.f32 %v3117_v30, %v3118_v32  ;;  %v6245_v30 = vld [vmem:[#allocation46_spill] sm:$0xff] }
 0x5e7   : > { %v3120_v38 = vmax.f32 %v3119_v58, 0.0 }
 0x5e9   : > { %v3121_v39 = vadd.f32 1e-05, %v3120_v38 }
 0x5eb   : > { %3701 = vrsqrt.f32 %v3121_v39 }
 0x5f5   : > { %v3702_v19 = vpop.eup %3701 }
 0x5f6   : > { %v3123_v61 = vmul.f32 %v3702_v19, %v2944_v14  ;;  %v6246_v14 = vld [vmem:[#allocation87_spill] sm:$0xff] }
 0x5f8   : > { %v3124_v37 = vmul.f32 %v3123_v61, %v3015_v16  ;;  %v5797_v17 = vrot.slane %v3123_v61, %v6241_v8 }
 0x5fa   : > { %v3125_v60 = vsub.f32 %v2945_v28, %v3124_v37  ;;  %v3148_v4 = vmul.f32 %v5797_v17, %v5616_v49  ;;  %v3149_v11 = vmul.f32 %v5797_v17, %v5619_v25  ;;  %v3132_v2 = vmul.f32 %v5797_v17, %v5351_v57 }
 0x5fb   : > { %v3133_v33 = vmul.f32 %v5797_v17, %v5347_v5  ;;  %v3150_v25 = vmul.f32 %v5797_v17, %v5641_v47  ;;  %v3134_v23 = vmul.f32 %v5797_v17, %v5371_v27  ;;  %v3151_v5 = vmul.f32 %v5797_v17, %v6237_v21 }
 0x5fc   : > { %v5800_v26 = vrot.slane %v3125_v60, %v6241_v8  ;;  %v3135_v47 = vmul.f32 %v5797_v17, %v6242_v9  ;;  %v3152_v45 = vmul.f32 %v5797_v17, %v5662_v13  ;;  %v3136_v56 = vmul.f32 %v5797_v17, %v6243_v41  ;;  %v6247_v8 = vld [vmem:[#allocation48_spill] sm:$0xff] }
 0x5fd   : > { %v3153_v34 = vmul.f32 %v5797_v17, %v5273_v46  ;;  %v3137_v13 = vmul.f32 %v5797_v17, %v6244_v63  ;;  %v3154_v16 = vmul.f32 %v5797_v17, %v5685_v54  ;;  %v3138_v32 = vmul.f32 %v5797_v17, %v6245_v30 }
 0x5fe   : > { %v3186_v40 = vadd.f32 %v5800_v26, %v3148_v4  ;;  %v3170_v59 = vadd.f32 %v5800_v26, %v3132_v2  ;;  %v3187_v22 = vadd.f32 %v5800_v26, %v3149_v11  ;;  %v3171_v49 = vadd.f32 %v5800_v26, %v3133_v33 }
 0x5ff   : > { %v3188_v53 = vadd.f32 %v5800_v26, %v3150_v25  ;;  %v3172_v20 = vadd.f32 %v5800_v26, %v3134_v23  ;;  %v3189_v18 = vadd.f32 %v5800_v26, %v3151_v5  ;;  %v3173_v55 = vadd.f32 %v5800_v26, %v3135_v47  ;;  %v6249_v23 = vld [vmem:[#allocation76_spill] sm:$0xff] }
 0x600   : > { %v3218_v35 = vmax.f32 %v3186_v40, 0.0  ;;  %v3202_v44 = vmax.f32 %v3170_v59, 0.0  ;;  %v3219_v57 = vmax.f32 %v3187_v22, 0.0  ;;  %v3203_v36 = vmax.f32 %v3171_v49, 0.0 }
 0x601   : > { %v3220_v7 = vmax.f32 %v3188_v53, 0.0  ;;  %v3204_v27 = vmax.f32 %v3172_v20, 0.0  ;;  %v3221_v21 = vmax.f32 %v3189_v18, 0.0  ;;  %v3190_v48 = vadd.f32 %v5800_v26, %v3152_v45  ;;  %v6250_v18 = vld [vmem:[#allocation65_spill] sm:$0xff]  ;;  %v6251_v45 = vld [vmem:[#allocation83_spill] sm:$0xff] }
 0x602   : > { %3266 = vxpose.xlu0.b32.start [1/16] (narrow) %v3218_v35, 8  ;;  %3234 = vxpose.xlu1.b32.start [1/16] (narrow) %v3202_v44, 8  ;;  %v3205_v31 = vmax.f32 %v3173_v55, 0.0  ;;  %v3174_v0 = vadd.f32 %v5800_v26, %v3136_v56  ;;  %v3191_v29 = vadd.f32 %v5800_v26, %v3153_v34  ;;  %v3175_v42 = vadd.f32 %v5800_v26, %v3137_v13  ;;  %v6248_v35 = vld [vmem:[#allocation74_spill] sm:$0xff] }
 0x603   : > { %v3222_v15 = vmax.f32 %v3190_v48, 0.0  ;;  %v3192_v6 = vadd.f32 %v5800_v26, %v3154_v16  ;;  %v3155_v58 = vmul.f32 %v5797_v17, %v5335_v1  ;;  %v3176_v39 = vadd.f32 %v5800_v26, %v3138_v32 }
 0x604   : > { %v3206_v3 = vmax.f32 %v3174_v0, 0.0  ;;  %v3223_v46 = vmax.f32 %v3191_v29, 0.0  ;;  %v3207_v38 = vmax.f32 %v3175_v42, 0.0  ;;  %v3139_v19 = vmul.f32 %v5797_v17, %v6246_v14  ;;  %v6253_v42 = vld [vmem:[#allocation73_spill] sm:$0xff] }
 0x605   : > { %v3193_v61 = vadd.f32 %v5800_v26, %v3155_v58  ;;  %v3224_v54 = vmax.f32 %v3192_v6, 0.0  ;;  %v3208_v28 = vmax.f32 %v3176_v39, 0.0  ;;  %v3156_v60 = vmul.f32 %v5797_v17, %v5311_v51 }
 0x606   : > { %3267 = vxpose.xlu0.b32.cont [2/16] (narrow) %v3219_v57, 8  ;;  %3235 = vxpose.xlu1.b32.cont [2/16] (narrow) %v3203_v36, 8  ;;  %v3177_v37 = vadd.f32 %v5800_v26, %v3139_v19  ;;  %v3140_v1 = vmul.f32 %v5797_v17, %v6247_v8  ;;  %v3157_v40 = vmul.f32 %v5797_v17, %v5715_v43 }
 0x607   : > { %v3225_v4 = vmax.f32 %v3193_v61, 0.0  ;;  %v3194_v11 = vadd.f32 %v5800_v26, %v3156_v60  ;;  %v3141_v59 = vmul.f32 %v5797_v17, %v6248_v35  ;;  %v3158_v25 = vmul.f32 %v5797_v17, %v5734_v62 }
 0x608   : > { %v3209_v2 = vmax.f32 %v3177_v37, 0.0  ;;  %v3178_v33 = vadd.f32 %v5800_v26, %v3140_v1  ;;  %v3195_v22 = vadd.f32 %v5800_v26, %v3157_v40  ;;  %v3142_v43 = vmul.f32 %v5797_v17, %v6249_v23 }
 0x609   : > { %v3226_v51 = vmax.f32 %v3194_v11, 0.0  ;;  %v3179_v49 = vadd.f32 %v5800_v26, %v3141_v59  ;;  %v3196_v53 = vadd.f32 %v5800_v26, %v3158_v25  ;;  %v3159_v5 = vmul.f32 %v5797_v17, %v5743_v12 }
 0x60a   : > { %3268 = vxpose.xlu0.b32.cont [3/16] (narrow) %v3220_v7, 8  ;;  %3236 = vxpose.xlu1.b32.cont [3/16] (narrow) %v3204_v27, 8  ;;  %v3210_v44 = vmax.f32 %v3178_v33, 0.0  ;;  %v3227_v57 = vmax.f32 %v3195_v22, 0.0  ;;  %v3180_v20 = vadd.f32 %v5800_v26, %v3142_v43  ;;  %v3143_v7 = vmul.f32 %v5797_v17, %v6250_v18 }
 0x60b   : > { %v3211_v36 = vmax.f32 %v3179_v49, 0.0  ;;  %v3197_v9 = vadd.f32 %v5800_v26, %v3159_v5  ;;  %v3228_v62 = vmax.f32 %v3196_v53, 0.0  ;;  %v3160_v55 = vmul.f32 %v5797_v17, %v5755_v50 }
 0x60c   : > { %v3212_v47 = vmax.f32 %v3180_v20, 0.0  ;;  %v3181_v27 = vadd.f32 %v5800_v26, %v3143_v7  ;;  %v3144_v12 = vmul.f32 %v5797_v17, %v6251_v45  ;;  %v3161_v41 = vmul.f32 %v5797_v17, %v5761_v52 }
 0x60d   : > { %v3198_v48 = vadd.f32 %v5800_v26, %v3160_v55  ;;  %v3146_v16 = vmul.f32 %v5797_v17, %v6253_v42 }
 0x60e   : > { %3269 = vxpose.xlu0.b32.cont [4/16] (narrow) %v3221_v21, 8  ;;  %3237 = vxpose.xlu1.b32.cont [4/16] (narrow) %v3205_v31, 8  ;;  %v3229_v21 = vmax.f32 %v3197_v9, 0.0  ;;  %v3213_v56 = vmax.f32 %v3181_v27, 0.0  ;;  %v3182_v34 = vadd.f32 %v5800_v26, %v3144_v12  ;;  %v6252_v31 = vld [vmem:[#allocation88_spill] sm:$0xff]  ;;  %v3199_v29 = vadd.f32 %v5800_v26, %v3161_v41 }
 0x60f   : > { %v3145_v0 = vmul.f32 %v5797_v17, %v6252_v31  ;;  %v3230_v50 = vmax.f32 %v3198_v48, 0.0  ;;  %v3184_v30 = vadd.f32 %v5800_v26, %v3146_v16 }
 0x610   : > { %v3214_v63 = vmax.f32 %v3182_v34, 0.0 }
 0x611   : > { %v3183_v13 = vadd.f32 %v5800_v26, %v3145_v0  ;;  %v3216_v39 = vmax.f32 %v3184_v30, 0.0 }
 0x612   : > { %3270 = vxpose.xlu0.b32.cont [5/16] (narrow) %v3222_v15, 8  ;;  %3238 = vxpose.xlu1.b32.cont [5/16] (narrow) %v3206_v3, 8  ;;  %v3162_v15 = vmul.f32 %v5797_v17, %v5778_v10  ;;  %v3231_v3 = vmax.f32 %v3199_v29, 0.0  ;;  %v6254_v10 = vld [vmem:[#allocation77_spill] sm:$0xff] }
 0x613   : > { %v3215_v6 = vmax.f32 %v3183_v13, 0.0  ;;  %v3147_v32 = vmul.f32 %v5797_v17, %v6254_v10 }
 0x614   : > { %v3200_v52 = vadd.f32 %v5800_v26, %v3162_v15 }
 0x615   : > { %v3185_v14 = vadd.f32 %v5800_v26, %v3147_v32 }
 0x616   : > { %3271 = vxpose.xlu0.b32.cont [6/16] (narrow) %v3223_v46, 8  ;;  %3239 = vxpose.xlu1.b32.cont [6/16] (narrow) %v3207_v38, 8  ;;  %v3163_v46 = vmul.f32 %v5797_v17, %v5776_v24  ;;  %v3232_v58 = vmax.f32 %v3200_v52, 0.0 }
 0x617   : > { %v3217_v24 = vmax.f32 %v3185_v14, 0.0 }
 0x618   : > { %v3201_v38 = vadd.f32 %v5800_v26, %v3163_v46 }
 0x61a   : > { %3272 = vxpose.xlu0.b32.cont [7/16] (narrow) %v3224_v54, 8  ;;  %3240 = vxpose.xlu1.b32.cont [7/16] (narrow) %v3208_v28, 8  ;;  %v3233_v19 = vmax.f32 %v3201_v38, 0.0 }
 0x61e   : > { %3273 = vxpose.xlu0.b32.cont [8/16] (narrow) %v3225_v4, 8  ;;  %3241 = vxpose.xlu1.b32.cont [8/16] (narrow) %v3209_v2, 8 }
 0x622   : > { %3274 = vxpose.xlu0.b32.cont [9/16] (narrow) %v3226_v51, 8  ;;  %3242 = vxpose.xlu1.b32.cont [9/16] (narrow) %v3210_v44, 8 }
 0x626   : > { %3275 = vxpose.xlu0.b32.cont [10/16] (narrow) %v3227_v57, 8  ;;  %3243 = vxpose.xlu1.b32.cont [10/16] (narrow) %v3211_v36, 8 }
 0x62a   : > { %3276 = vxpose.xlu0.b32.cont [11/16] (narrow) %v3228_v62, 8  ;;  %3244 = vxpose.xlu1.b32.cont [11/16] (narrow) %v3212_v47, 8 }
 0x62e   : > { %3277 = vxpose.xlu0.b32.cont [12/16] (narrow) %v3229_v21, 8  ;;  %3245 = vxpose.xlu1.b32.cont [12/16] (narrow) %v3213_v56, 8 }
 0x632   : > { %3278 = vxpose.xlu0.b32.cont [13/16] (narrow) %v3230_v50, 8  ;;  %3246 = vxpose.xlu1.b32.cont [13/16] (narrow) %v3214_v63, 8 }
 0x636   : > { %3279 = vxpose.xlu0.b32.cont [14/16] (narrow) %v3231_v3, 8  ;;  %3247 = vxpose.xlu1.b32.cont [14/16] (narrow) %v3215_v6, 8 }
 0x63a   : > { %3280 = vxpose.xlu0.b32.cont [15/16] (narrow) %v3232_v58, 8  ;;  %3248 = vxpose.xlu1.b32.cont [15/16] (narrow) %v3216_v39, 8 }
 0x63e   : > { %3281 = vxpose.xlu0.b32.end [16/16] (narrow) %v3233_v19, 8  ;;  %3249 = vxpose.xlu1.b32.end [16/16] (narrow) %v3217_v24, 8 }
 0x682   : > { %v3282_v61 = vpop.trf.xlu0  ;;  %v3250_v17 = vpop.trf.xlu1 }
 0x683   : > { %v3300_v54 = vcombine.low %v3250_v17, %v3282_v61 }
 0x685   : > { %3302 = vst [vmem:[%s278_s9] sm:$0xff] %v3300_v54 }
 0x686 PF: > { %s17_s24 = sadd.s32 1, %s3727_s24  }
 0x687   : > { %p14_p4 = scmp.ge.s32.totalorder %s17_s24, 4  }
 0x689   :  { %16 = sbr.rel (!%p14_p4) target bundleno = 1 (0x1), region = 82 }

</bundles_post_ra>
